<compile_context>
chip_gen: v7x
topology: tpu7x:2x2x1
jax: 0.10.0
libtpu: 0.0.40
codegen_flags: <defaults>
</compile_context>

<pallas_src>
import functools

import jax
import jax.numpy as jnp
from jax import lax
from jax.experimental import pallas as pl
from jax.experimental.pallas import tpu as pltpu


def _basic_block_kernel(xpad_ref, w1_ref, b1_ref, w2_ref, b2_ref, out_ref,
                        h1pad_ref, *, H, W, Cp, TH):
    """One grid step = one image (NHWC channels-last, C zero-padded to Cp).

    xpad_ref : (H+2, W+2, Cp) bf16  zero-padded input image (pipelined block)
    w1_ref   : (9, Cp, Cp)    bf16  conv1 taps (ky*3+kx), BN1 scale folded in
    b1_ref   : (1, Cp)        f32   folded BN1 bias
    w2_ref   : (9, Cp, Cp)    bf16  conv2 taps, BN2 scale folded in
    b2_ref   : (1, Cp)        f32   folded BN2 bias
    out_ref  : (H, W, Cp)     bf16
    h1pad_ref: (H+2, W+2, Cp) bf16  scratch: zero-halo padded relu(bn1(conv1))
    """
    n_tiles = H // TH

    # Zero only the 1-pixel halo of the h1 scratch (the interior is fully
    # rewritten by pass 1 every grid step).
    # TODO(synk): halos could be zeroed once per core instead of per step, but
    # scratch is not guaranteed zero-initialized and program_id(0)==0 is not a
    # safe "first step" guard under megacore sharding; kept per-step (small).
    zrow = jnp.zeros((1, W + 2, Cp), jnp.bfloat16)
    zcol = jnp.zeros((H, 1, Cp), jnp.bfloat16)
    h1pad_ref[0:1, :, :] = zrow
    h1pad_ref[H + 1:H + 2, :, :] = zrow
    h1pad_ref[1:1 + H, 0:1, :] = zcol
    h1pad_ref[1:1 + H, W + 1:W + 2, :] = zcol

    # Loop-invariant bias broadcasts, hoisted (JAX does not CSE broadcast_in_dim).
    b1b = jnp.broadcast_to(b1_ref[...], (TH * W, Cp))
    b2b = jnp.broadcast_to(b2_ref[...], (TH * W, Cp))

    def conv_tile(src_ref, w_ref, r0):
        """3x3 conv for output rows [r0, r0+TH); returns (TH*W, Cp) f32."""
        acc = jnp.zeros((TH * W, Cp), jnp.float32)
        for dy in range(3):
            r = r0 + dy
            for dx in range(3):
                patch = src_ref[pl.ds(r, TH), dx:dx + W, :]
                acc += jnp.dot(patch.reshape(TH * W, Cp),
                               w_ref[dy * 3 + dx],
                               preferred_element_type=jnp.float32)
        return acc

    # ---- pass 1: h1 = relu(conv1_scaled(x) + b1), staged padded in VMEM ----
    def pass1(t, carry):
        r0 = pl.multiple_of(t * TH, TH)
        acc = conv_tile(xpad_ref, w1_ref, r0)
        h1 = jnp.maximum(acc + b1b, 0.0).astype(jnp.bfloat16)
        h1pad_ref[pl.ds(1 + r0, TH), 1:1 + W, :] = h1.reshape(TH, W, Cp)
        return carry

    lax.fori_loop(0, n_tiles, pass1, 0)

    # ---- pass 2: out = relu(conv2_scaled(h1) + b2 + x) ----
    def pass2(t, carry):
        r0 = pl.multiple_of(t * TH, TH)
        acc = conv_tile(h1pad_ref, w2_ref, r0)
        residual = xpad_ref[pl.ds(1 + r0, TH), 1:1 + W, :].astype(jnp.float32)
        out = jnp.maximum(acc + b2b + residual.reshape(TH * W, Cp), 0.0)
        out_ref[pl.ds(r0, TH), :, :] = (
            out.reshape(TH, W, Cp).astype(out_ref.dtype))
        return carry

    lax.fori_loop(0, n_tiles, pass2, 0)


def basic_block_pallas(x_nchw, w1, g1, be1, m1, v1, w2, g2, be2, m2, v2,
                       eps=1e-5):
    """x_nchw: (N, C, H, W) f32; w*: (Cout, Cin, 3, 3) PyTorch conv weights."""
    N, C, H, W = x_nchw.shape
    assert w1.shape == (C, C, 3, 3) and w2.shape == (C, C, 3, 3), (
        "identity residual requires inplanes == planes (stride=1, no downsample)")

    # Lane-dense channel padding: pad C to 128 when C < 128 so MXU operands and
    # output stores use all 128 lanes.  C >= 128 is already lane-dense.
    Cp = C if C >= 128 else 128
    pc = Cp - C

    # NHWC + bf16 for the MXU.  The channel pad forces one wrapper-side rewrite
    # of x anyway, so the 1-px spatial halo is folded into the same pad and the
    # padded image block is BlockSpec-pipelined straight into VMEM (no manual
    # DMA, no in-kernel staging copy, no x-halo zeroing).
    x_nhwc = jnp.transpose(x_nchw, (0, 2, 3, 1)).astype(jnp.bfloat16)
    x_pad = jnp.pad(x_nhwc, ((0, 0), (1, 1), (1, 1), (0, pc)))

    def fold_bn(gamma, beta, mean, var):
        scale = (gamma / jnp.sqrt(var + eps)).astype(jnp.float32)
        bias = (beta - mean * scale).astype(jnp.float32)
        return scale, bias

    s1, b1 = fold_bn(g1, be1, m1, v1)
    s2, b2 = fold_bn(g2, be2, m2, v2)

    def prep_w(w, scale):
        # (Cout, Cin, ky, kx) -> (ky*3+kx, Cin, Cout); BN scale folded into
        # Cout; Cin/Cout zero-padded to Cp.
        wt = jnp.transpose(w, (2, 3, 1, 0)) * scale[None, None, None, :]
        wt = wt.reshape(9, C, C)
        wt = jnp.pad(wt, ((0, 0), (0, pc), (0, pc)))
        return wt.astype(jnp.bfloat16)

    def prep_b(b):
        return jnp.pad(b.reshape(1, C), ((0, 0), (0, pc)))

    w1p, w2p = prep_w(w1, s1), prep_w(w2, s2)
    b1p, b2p = prep_b(b1), prep_b(b2)

    # Row tile: target M = TH*W around 128-256 (fills the 256-row MXU on
    # v6e/v7x; 128 is already the native tile on v5e) while keeping the f32
    # accumulator under ~96 KB (<= ~24 of 64 vregs) to avoid spills.
    TH = 1
    for t in (32, 16, 8, 4, 2, 1):
        if H % t == 0 and t * W <= 512 and t * W * Cp * 4 <= 96 * 1024:
            TH = t
            break

    kernel = functools.partial(_basic_block_kernel, H=H, W=W, Cp=Cp, TH=TH)

    # Explicit VMEM budget: double-buffered padded-x and bf16 out blocks, both
    # weight tensors (x2 buffers each), biases and the h1 scratch, + headroom.
    def nbytes(shape, itemsize):
        n = 1
        for s in shape:
            n *= s
        return n * itemsize

    vmem_bytes = (
        2 * nbytes((H + 2, W + 2, Cp), 2)      # x block, double buffered
        + 2 * nbytes((H, W, Cp), 2)            # out block, double buffered
        + 2 * 2 * nbytes((9, Cp, Cp), 2)       # conv1/conv2 weights
        + 2 * 2 * nbytes((1, Cp), 4)           # biases
        + nbytes((H + 2, W + 2, Cp), 2)        # h1 padded scratch
    )
    vmem_limit = int(min(100 << 20, max(32 << 20, 2 * vmem_bytes + (8 << 20))))

    out_nhwc = pl.pallas_call(
        kernel,
        out_shape=jax.ShapeDtypeStruct((N, H, W, Cp), jnp.bfloat16),
        grid_spec=pltpu.PrefetchScalarGridSpec(
            num_scalar_prefetch=0,
            grid=(N,),                           # one image per step; parallel
            in_specs=[
                pl.BlockSpec((None, H + 2, W + 2, Cp), lambda n: (n, 0, 0, 0)),
                pl.BlockSpec((9, Cp, Cp), lambda n: (0, 0, 0)),
                pl.BlockSpec((1, Cp), lambda n: (0, 0)),
                pl.BlockSpec((9, Cp, Cp), lambda n: (0, 0, 0)),
                pl.BlockSpec((1, Cp), lambda n: (0, 0)),
            ],
            out_specs=pl.BlockSpec((None, H, W, Cp), lambda n: (n, 0, 0, 0)),
            scratch_shapes=[
                pltpu.VMEM((H + 2, W + 2, Cp), jnp.bfloat16),   # padded h1
            ],
        ),
        compiler_params=pltpu.CompilerParams(
            dimension_semantics=("parallel",),
            vmem_limit_bytes=vmem_limit),
    )(x_pad, w1p, b1p, w2p, b2p)

    # Strip the channel pad; back to NCHW f32 to match the torch module dtype.
    out = out_nhwc[..., :C].astype(jnp.float32)
    return jnp.transpose(out, (0, 3, 1, 2))


# ---------------- pure-JAX reference (for a correctness check) ----------------
def _ref_basic_block(x, w1, g1, be1, m1, v1, w2, g2, be2, m2, v2, eps=1e-5):
    dn = lax.conv_dimension_numbers(x.shape, w1.shape, ("NCHW", "OIHW", "NCHW"))

    def conv(a, w):
        return lax.conv_general_dilated(a, w, (1, 1), ((1, 1), (1, 1)),
                                        dimension_numbers=dn)

    def bn(a, g, b, m, v):
        g, b, m, v = (t.reshape(1, -1, 1, 1) for t in (g, b, m, v))
        return (a - m) / jnp.sqrt(v + eps) * g + b

    out = jnp.maximum(bn(conv(x, w1), g1, be1, m1, v1), 0.0)
    out = bn(conv(out, w2), g2, be2, m2, v2)
    return jnp.maximum(out + x, 0.0)


if __name__ == "__main__":
    N, C, H, W = 2, 4, 16, 16  # inplanes == planes so the residual add is valid
    key = jax.random.PRNGKey(0)
    ks = jax.random.split(key, 11)

    def bf16r(a):  # round to bf16-representable f32 so kernel & ref share inputs
        return a.astype(jnp.bfloat16).astype(jnp.float32)

    x = bf16r(jax.random.normal(ks[0], (N, C, H, W), jnp.float32))
    w1 = bf16r(jax.random.normal(ks[1], (C, C, 3, 3), jnp.float32) * 0.2)
    w2 = bf16r(jax.random.normal(ks[2], (C, C, 3, 3), jnp.float32) * 0.2)
    g1 = 1.0 + 0.1 * jax.random.normal(ks[3], (C,), jnp.float32)
    be1 = 0.1 * jax.random.normal(ks[4], (C,), jnp.float32)
    m1 = 0.1 * jax.random.normal(ks[5], (C,), jnp.float32)
    v1 = 1.0 + 0.1 * jnp.abs(jax.random.normal(ks[6], (C,), jnp.float32))
    g2 = 1.0 + 0.1 * jax.random.normal(ks[7], (C,), jnp.float32)
    be2 = 0.1 * jax.random.normal(ks[8], (C,), jnp.float32)
    m2 = 0.1 * jax.random.normal(ks[9], (C,), jnp.float32)
    v2 = 1.0 + 0.1 * jnp.abs(jax.random.normal(ks[10], (C,), jnp.float32))

    out = basic_block_pallas(x, w1, g1, be1, m1, v1, w2, g2, be2, m2, v2)
    out = jax.block_until_ready(out)

    ref = _ref_basic_block(x, w1, g1, be1, m1, v1, w2, g2, be2, m2, v2)
    err = float(jnp.max(jnp.abs(out - ref)))
    assert out.shape == (N, C, H, W)
    assert jnp.allclose(out, ref, atol=5e-2, rtol=5e-2), f"max err {err}"

    print("KERNEL_OK")
</pallas_src>

<mosaic_0001>
module attributes {stable_mosaic.version = 11 : i64} {
  func.func @_basic_block_kernel(%arg0: i32, %arg1: memref<1x18x18x128xbf16, #tpu.memory_space<vmem>>, %arg2: memref<9x128x128xbf16, #tpu.memory_space<vmem>>, %arg3: memref<1x128xf32, #tpu.memory_space<vmem>>, %arg4: memref<9x128x128xbf16, #tpu.memory_space<vmem>>, %arg5: memref<1x128xf32, #tpu.memory_space<vmem>>, %arg6: memref<1x16x16x128xbf16, #tpu.memory_space<vmem>>, %arg7: memref<18x18x128xbf16, #tpu.memory_space<vmem>>) attributes {dimension_semantics = [#tpu.dimension_semantics<parallel>], iteration_bounds = array<i64: 2>, scalar_prefetch = 0 : i64, scratch_operands = 1 : i64, tpu.core_type = #tpu.core_type<tc>, window_params = [{transform_indices = @transform_0, window_bounds = array<i64: 1, 18, 18, 128>}, {pipeline_mode = #tpu.pipeline_mode<synchronous>, transform_indices = @transform_1, window_bounds = array<i64: 9, 128, 128>}, {pipeline_mode = #tpu.pipeline_mode<synchronous>, transform_indices = @transform_2, window_bounds = array<i64: 1, 128>}, {pipeline_mode = #tpu.pipeline_mode<synchronous>, transform_indices = @transform_3, window_bounds = array<i64: 9, 128, 128>}, {pipeline_mode = #tpu.pipeline_mode<synchronous>, transform_indices = @transform_4, window_bounds = array<i64: 1, 128>}, {transform_indices = @transform_5, window_bounds = array<i64: 1, 16, 16, 128>}]} {
    %cst = arith.constant 0.000000e+00 : bf16
    %0 = vector.broadcast %cst : bf16 to vector<1x18x128xbf16>
    %cst_0 = arith.constant 0.000000e+00 : bf16
    %1 = vector.broadcast %cst_0 : bf16 to vector<16x1x128xbf16>
    %c0 = arith.constant 0 : index
    %c0_1 = arith.constant 0 : index
    %c0_2 = arith.constant 0 : index
    %2 = vector.load %arg7[%c0, %c0_1, %c0_2] : memref<18x18x128xbf16, #tpu.memory_space<vmem>>, vector<1x18x128xbf16>
    tpu.vector_store %arg7[%c0, %c0_1, %c0_2], %0 {strides = array<i32>} : memref<18x18x128xbf16, #tpu.memory_space<vmem>>, vector<1x18x128xbf16>,
    %c17 = arith.constant 17 : index
    %c0_3 = arith.constant 0 : index
    %c0_4 = arith.constant 0 : index
    %3 = vector.load %arg7[%c17, %c0_3, %c0_4] : memref<18x18x128xbf16, #tpu.memory_space<vmem>>, vector<1x18x128xbf16>
    tpu.vector_store %arg7[%c17, %c0_3, %c0_4], %0 {strides = array<i32>} : memref<18x18x128xbf16, #tpu.memory_space<vmem>>, vector<1x18x128xbf16>,
    %c1 = arith.constant 1 : index
    %c0_5 = arith.constant 0 : index
    %c0_6 = arith.constant 0 : index
    %4 = vector.load %arg7[%c1, %c0_5, %c0_6] : memref<18x18x128xbf16, #tpu.memory_space<vmem>>, vector<16x1x128xbf16>
    tpu.vector_store %arg7[%c1, %c0_5, %c0_6], %1 {strides = array<i32>} : memref<18x18x128xbf16, #tpu.memory_space<vmem>>, vector<16x1x128xbf16>,
    %c1_7 = arith.constant 1 : index
    %c17_8 = arith.constant 17 : index
    %c0_9 = arith.constant 0 : index
    %5 = vector.load %arg7[%c1_7, %c17_8, %c0_9] : memref<18x18x128xbf16, #tpu.memory_space<vmem>>, vector<16x1x128xbf16>
    tpu.vector_store %arg7[%c1_7, %c17_8, %c0_9], %1 {strides = array<i32>} : memref<18x18x128xbf16, #tpu.memory_space<vmem>>, vector<16x1x128xbf16>,
    %c0_10 = arith.constant 0 : index
    %c0_11 = arith.constant 0 : index
    %6 = vector.load %arg3[%c0_10, %c0_11] : memref<1x128xf32, #tpu.memory_space<vmem>>, vector<1x128xf32>
    %7 = vector.shape_cast %6 : vector<1x128xf32> to vector<1x128xf32>
    %8 = vector.broadcast %7 : vector<1x128xf32> to vector<128x128xf32>
    %c0_12 = arith.constant 0 : index
    %c0_13 = arith.constant 0 : index
    %9 = vector.load %arg5[%c0_12, %c0_13] : memref<1x128xf32, #tpu.memory_space<vmem>>, vector<1x128xf32>
    %10 = vector.shape_cast %9 : vector<1x128xf32> to vector<1x128xf32>
    %11 = vector.broadcast %10 : vector<1x128xf32> to vector<128x128xf32>
    %c0_i32 = arith.constant 0 : i32
    %c2_i32 = arith.constant 2 : i32
    %12 = arith.addi %c0_i32, %c2_i32 : i32
    %c1_i32 = arith.constant 1 : i32
    scf.for %arg8 = %c0_i32 to %12 step %c1_i32  : i32 {
      %c8_i32 = arith.constant 8 : i32
      %14 = arith.muli %arg8, %c8_i32 : i32
      %15 = tpu.assume_multiple %14, 8 : i32
      %cst_19 = arith.constant 0.000000e+00 : f32
      %16 = vector.broadcast %cst_19 : f32 to vector<128x128xf32>
      %c0_i32_20 = arith.constant 0 : i32
      %17 = arith.addi %15, %c0_i32_20 : i32
      %c0_21 = arith.constant 0 : index
      %18 = arith.index_cast %17 : i32 to index
      %c0_22 = arith.constant 0 : index
      %c0_23 = arith.constant 0 : index
      %19 = vector.load %arg1[%c0_21, %18, %c0_22, %c0_23] : memref<1x18x18x128xbf16, #tpu.memory_space<vmem>>, vector<1x8x16x128xbf16>
      %20 = vector.shape_cast %19 : vector<1x8x16x128xbf16> to vector<8x16x128xbf16>
      %21 = vector.shape_cast %20 : vector<8x16x128xbf16> to vector<128x128xbf16>
      %c0_24 = arith.constant 0 : index
      %c0_25 = arith.constant 0 : index
      %c0_26 = arith.constant 0 : index
      %22 = vector.load %arg2[%c0_24, %c0_25, %c0_26] : memref<9x128x128xbf16, #tpu.memory_space<vmem>>, vector<1x128x128xbf16>
      %23 = vector.shape_cast %22 : vector<1x128x128xbf16> to vector<128x128xbf16>
      %cst_27 = arith.constant dense<0.000000e+00> : vector<128x128xf32>
      %24 = tpu.matmul %21, %23, %cst_27 {dimension_numbers = #tpu.dot_dimension_numbers<[1], [0], [0], [1], [0, 0, 1, 1], [], []>} : vector<128x128xbf16>, vector<128x128xbf16>, vector<128x128xf32> -> vector<128x128xf32>
      %25 = arith.addf %16, %24 : vector<128x128xf32>
      %c0_28 = arith.constant 0 : index
      %26 = arith.index_cast %17 : i32 to index
      %c1_29 = arith.constant 1 : index
      %c0_30 = arith.constant 0 : index
      %27 = vector.load %arg1[%c0_28, %26, %c1_29, %c0_30] : memref<1x18x18x128xbf16, #tpu.memory_space<vmem>>, vector<1x8x16x128xbf16>
      %28 = vector.shape_cast %27 : vector<1x8x16x128xbf16> to vector<8x16x128xbf16>
      %29 = vector.shape_cast %28 : vector<8x16x128xbf16> to vector<128x128xbf16>
      %c1_31 = arith.constant 1 : index
      %c0_32 = arith.constant 0 : index
      %c0_33 = arith.constant 0 : index
      %30 = vector.load %arg2[%c1_31, %c0_32, %c0_33] : memref<9x128x128xbf16, #tpu.memory_space<vmem>>, vector<1x128x128xbf16>
      %31 = vector.shape_cast %30 : vector<1x128x128xbf16> to vector<128x128xbf16>
      %cst_34 = arith.constant dense<0.000000e+00> : vector<128x128xf32>
      %32 = tpu.matmul %29, %31, %cst_34 {dimension_numbers = #tpu.dot_dimension_numbers<[1], [0], [0], [1], [0, 0, 1, 1], [], []>} : vector<128x128xbf16>, vector<128x128xbf16>, vector<128x128xf32> -> vector<128x128xf32>
      %33 = arith.addf %25, %32 : vector<128x128xf32>
      %c0_35 = arith.constant 0 : index
      %34 = arith.index_cast %17 : i32 to index
      %c2 = arith.constant 2 : index
      %c0_36 = arith.constant 0 : index
      %35 = vector.load %arg1[%c0_35, %34, %c2, %c0_36] : memref<1x18x18x128xbf16, #tpu.memory_space<vmem>>, vector<1x8x16x128xbf16>
      %36 = vector.shape_cast %35 : vector<1x8x16x128xbf16> to vector<8x16x128xbf16>
      %37 = vector.shape_cast %36 : vector<8x16x128xbf16> to vector<128x128xbf16>
      %c2_37 = arith.constant 2 : index
      %c0_38 = arith.constant 0 : index
      %c0_39 = arith.constant 0 : index
      %38 = vector.load %arg2[%c2_37, %c0_38, %c0_39] : memref<9x128x128xbf16, #tpu.memory_space<vmem>>, vector<1x128x128xbf16>
      %39 = vector.shape_cast %38 : vector<1x128x128xbf16> to vector<128x128xbf16>
      %cst_40 = arith.constant dense<0.000000e+00> : vector<128x128xf32>
      %40 = tpu.matmul %37, %39, %cst_40 {dimension_numbers = #tpu.dot_dimension_numbers<[1], [0], [0], [1], [0, 0, 1, 1], [], []>} : vector<128x128xbf16>, vector<128x128xbf16>, vector<128x128xf32> -> vector<128x128xf32>
      %41 = arith.addf %33, %40 : vector<128x128xf32>
      %c1_i32_41 = arith.constant 1 : i32
      %42 = arith.addi %15, %c1_i32_41 : i32
      %c0_42 = arith.constant 0 : index
      %43 = arith.index_cast %42 : i32 to index
      %c0_43 = arith.constant 0 : index
      %c0_44 = arith.constant 0 : index
      %44 = vector.load %arg1[%c0_42, %43, %c0_43, %c0_44] : memref<1x18x18x128xbf16, #tpu.memory_space<vmem>>, vector<1x8x16x128xbf16>
      %45 = vector.shape_cast %44 : vector<1x8x16x128xbf16> to vector<8x16x128xbf16>
      %46 = vector.shape_cast %45 : vector<8x16x128xbf16> to vector<128x128xbf16>
      %c3 = arith.constant 3 : index
      %c0_45 = arith.constant 0 : index
      %c0_46 = arith.constant 0 : index
      %47 = vector.load %arg2[%c3, %c0_45, %c0_46] : memref<9x128x128xbf16, #tpu.memory_space<vmem>>, vector<1x128x128xbf16>
      %48 = vector.shape_cast %47 : vector<1x128x128xbf16> to vector<128x128xbf16>
      %cst_47 = arith.constant dense<0.000000e+00> : vector<128x128xf32>
      %49 = tpu.matmul %46, %48, %cst_47 {dimension_numbers = #tpu.dot_dimension_numbers<[1], [0], [0], [1], [0, 0, 1, 1], [], []>} : vector<128x128xbf16>, vector<128x128xbf16>, vector<128x128xf32> -> vector<128x128xf32>
      %50 = arith.addf %41, %49 : vector<128x128xf32>
      %c0_48 = arith.constant 0 : index
      %51 = arith.index_cast %42 : i32 to index
      %c1_49 = arith.constant 1 : index
      %c0_50 = arith.constant 0 : index
      %52 = vector.load %arg1[%c0_48, %51, %c1_49, %c0_50] : memref<1x18x18x128xbf16, #tpu.memory_space<vmem>>, vector<1x8x16x128xbf16>
      %53 = vector.shape_cast %52 : vector<1x8x16x128xbf16> to vector<8x16x128xbf16>
      %54 = vector.shape_cast %53 : vector<8x16x128xbf16> to vector<128x128xbf16>
      %c4 = arith.constant 4 : index
      %c0_51 = arith.constant 0 : index
      %c0_52 = arith.constant 0 : index
      %55 = vector.load %arg2[%c4, %c0_51, %c0_52] : memref<9x128x128xbf16, #tpu.memory_space<vmem>>, vector<1x128x128xbf16>
      %56 = vector.shape_cast %55 : vector<1x128x128xbf16> to vector<128x128xbf16>
      %cst_53 = arith.constant dense<0.000000e+00> : vector<128x128xf32>
      %57 = tpu.matmul %54, %56, %cst_53 {dimension_numbers = #tpu.dot_dimension_numbers<[1], [0], [0], [1], [0, 0, 1, 1], [], []>} : vector<128x128xbf16>, vector<128x128xbf16>, vector<128x128xf32> -> vector<128x128xf32>
      %58 = arith.addf %50, %57 : vector<128x128xf32>
      %c0_54 = arith.constant 0 : index
      %59 = arith.index_cast %42 : i32 to index
      %c2_55 = arith.constant 2 : index
      %c0_56 = arith.constant 0 : index
      %60 = vector.load %arg1[%c0_54, %59, %c2_55, %c0_56] : memref<1x18x18x128xbf16, #tpu.memory_space<vmem>>, vector<1x8x16x128xbf16>
      %61 = vector.shape_cast %60 : vector<1x8x16x128xbf16> to vector<8x16x128xbf16>
      %62 = vector.shape_cast %61 : vector<8x16x128xbf16> to vector<128x128xbf16>
      %c5 = arith.constant 5 : index
      %c0_57 = arith.constant 0 : index
      %c0_58 = arith.constant 0 : index
      %63 = vector.load %arg2[%c5, %c0_57, %c0_58] : memref<9x128x128xbf16, #tpu.memory_space<vmem>>, vector<1x128x128xbf16>
      %64 = vector.shape_cast %63 : vector<1x128x128xbf16> to vector<128x128xbf16>
      %cst_59 = arith.constant dense<0.000000e+00> : vector<128x128xf32>
      %65 = tpu.matmul %62, %64, %cst_59 {dimension_numbers = #tpu.dot_dimension_numbers<[1], [0], [0], [1], [0, 0, 1, 1], [], []>} : vector<128x128xbf16>, vector<128x128xbf16>, vector<128x128xf32> -> vector<128x128xf32>
      %66 = arith.addf %58, %65 : vector<128x128xf32>
      %c2_i32_60 = arith.constant 2 : i32
      %67 = arith.addi %15, %c2_i32_60 : i32
      %c0_61 = arith.constant 0 : index
      %68 = arith.index_cast %67 : i32 to index
      %c0_62 = arith.constant 0 : index
      %c0_63 = arith.constant 0 : index
      %69 = vector.load %arg1[%c0_61, %68, %c0_62, %c0_63] : memref<1x18x18x128xbf16, #tpu.memory_space<vmem>>, vector<1x8x16x128xbf16>
      %70 = vector.shape_cast %69 : vector<1x8x16x128xbf16> to vector<8x16x128xbf16>
      %71 = vector.shape_cast %70 : vector<8x16x128xbf16> to vector<128x128xbf16>
      %c6 = arith.constant 6 : index
      %c0_64 = arith.constant 0 : index
      %c0_65 = arith.constant 0 : index
      %72 = vector.load %arg2[%c6, %c0_64, %c0_65] : memref<9x128x128xbf16, #tpu.memory_space<vmem>>, vector<1x128x128xbf16>
      %73 = vector.shape_cast %72 : vector<1x128x128xbf16> to vector<128x128xbf16>
      %cst_66 = arith.constant dense<0.000000e+00> : vector<128x128xf32>
      %74 = tpu.matmul %71, %73, %cst_66 {dimension_numbers = #tpu.dot_dimension_numbers<[1], [0], [0], [1], [0, 0, 1, 1], [], []>} : vector<128x128xbf16>, vector<128x128xbf16>, vector<128x128xf32> -> vector<128x128xf32>
      %75 = arith.addf %66, %74 : vector<128x128xf32>
      %c0_67 = arith.constant 0 : index
      %76 = arith.index_cast %67 : i32 to index
      %c1_68 = arith.constant 1 : index
      %c0_69 = arith.constant 0 : index
      %77 = vector.load %arg1[%c0_67, %76, %c1_68, %c0_69] : memref<1x18x18x128xbf16, #tpu.memory_space<vmem>>, vector<1x8x16x128xbf16>
      %78 = vector.shape_cast %77 : vector<1x8x16x128xbf16> to vector<8x16x128xbf16>
      %79 = vector.shape_cast %78 : vector<8x16x128xbf16> to vector<128x128xbf16>
      %c7 = arith.constant 7 : index
      %c0_70 = arith.constant 0 : index
      %c0_71 = arith.constant 0 : index
      %80 = vector.load %arg2[%c7, %c0_70, %c0_71] : memref<9x128x128xbf16, #tpu.memory_space<vmem>>, vector<1x128x128xbf16>
      %81 = vector.shape_cast %80 : vector<1x128x128xbf16> to vector<128x128xbf16>
      %cst_72 = arith.constant dense<0.000000e+00> : vector<128x128xf32>
      %82 = tpu.matmul %79, %81, %cst_72 {dimension_numbers = #tpu.dot_dimension_numbers<[1], [0], [0], [1], [0, 0, 1, 1], [], []>} : vector<128x128xbf16>, vector<128x128xbf16>, vector<128x128xf32> -> vector<128x128xf32>
      %83 = arith.addf %75, %82 : vector<128x128xf32>
      %c0_73 = arith.constant 0 : index
      %84 = arith.index_cast %67 : i32 to index
      %c2_74 = arith.constant 2 : index
      %c0_75 = arith.constant 0 : index
      %85 = vector.load %arg1[%c0_73, %84, %c2_74, %c0_75] : memref<1x18x18x128xbf16, #tpu.memory_space<vmem>>, vector<1x8x16x128xbf16>
      %86 = vector.shape_cast %85 : vector<1x8x16x128xbf16> to vector<8x16x128xbf16>
      %87 = vector.shape_cast %86 : vector<8x16x128xbf16> to vector<128x128xbf16>
      %c8 = arith.constant 8 : index
      %c0_76 = arith.constant 0 : index
      %c0_77 = arith.constant 0 : index
      %88 = vector.load %arg2[%c8, %c0_76, %c0_77] : memref<9x128x128xbf16, #tpu.memory_space<vmem>>, vector<1x128x128xbf16>
      %89 = vector.shape_cast %88 : vector<1x128x128xbf16> to vector<128x128xbf16>
      %cst_78 = arith.constant dense<0.000000e+00> : vector<128x128xf32>
      %90 = tpu.matmul %87, %89, %cst_78 {dimension_numbers = #tpu.dot_dimension_numbers<[1], [0], [0], [1], [0, 0, 1, 1], [], []>} : vector<128x128xbf16>, vector<128x128xbf16>, vector<128x128xf32> -> vector<128x128xf32>
      %91 = arith.addf %83, %90 : vector<128x128xf32>
      %92 = arith.addf %91, %8 : vector<128x128xf32>
      %cst_79 = arith.constant 0.000000e+00 : f32
      %93 = vector.broadcast %cst_79 : f32 to vector<128x128xf32>
      %94 = arith.maximumf %92, %93 : vector<128x128xf32>
      %95 = arith.truncf %94 : vector<128x128xf32> to vector<128x128xbf16>
      %96 = vector.shape_cast %95 : vector<128x128xbf16> to vector<8x16x128xbf16>
      %c1_i32_80 = arith.constant 1 : i32
      %97 = arith.addi %c1_i32_80, %15 : i32
      %98 = arith.index_cast %97 : i32 to index
      %c1_81 = arith.constant 1 : index
      %c0_82 = arith.constant 0 : index
      %99 = vector.load %arg7[%98, %c1_81, %c0_82] : memref<18x18x128xbf16, #tpu.memory_space<vmem>>, vector<8x16x128xbf16>
      tpu.vector_store %arg7[%98, %c1_81, %c0_82], %96 {strides = array<i32>} : memref<18x18x128xbf16, #tpu.memory_space<vmem>>, vector<8x16x128xbf16>,
    }
    %c2_i32_14 = arith.constant 2 : i32
    %c0_i32_15 = arith.constant 0 : i32
    %c2_i32_16 = arith.constant 2 : i32
    %13 = arith.addi %c0_i32_15, %c2_i32_16 : i32
    %c1_i32_17 = arith.constant 1 : i32
    scf.for %arg8 = %c0_i32_15 to %13 step %c1_i32_17  : i32 {
      %c8_i32 = arith.constant 8 : i32
      %14 = arith.muli %arg8, %c8_i32 : i32
      %15 = tpu.assume_multiple %14, 8 : i32
      %cst_19 = arith.constant 0.000000e+00 : f32
      %16 = vector.broadcast %cst_19 : f32 to vector<128x128xf32>
      %c0_i32_20 = arith.constant 0 : i32
      %17 = arith.addi %15, %c0_i32_20 : i32
      %18 = arith.index_cast %17 : i32 to index
      %c0_21 = arith.constant 0 : index
      %c0_22 = arith.constant 0 : index
      %19 = vector.load %arg7[%18, %c0_21, %c0_22] : memref<18x18x128xbf16, #tpu.memory_space<vmem>>, vector<8x16x128xbf16>
      %20 = vector.shape_cast %19 : vector<8x16x128xbf16> to vector<128x128xbf16>
      %c0_23 = arith.constant 0 : index
      %c0_24 = arith.constant 0 : index
      %c0_25 = arith.constant 0 : index
      %21 = vector.load %arg4[%c0_23, %c0_24, %c0_25] : memref<9x128x128xbf16, #tpu.memory_space<vmem>>, vector<1x128x128xbf16>
      %22 = vector.shape_cast %21 : vector<1x128x128xbf16> to vector<128x128xbf16>
      %cst_26 = arith.constant dense<0.000000e+00> : vector<128x128xf32>
      %23 = tpu.matmul %20, %22, %cst_26 {dimension_numbers = #tpu.dot_dimension_numbers<[1], [0], [0], [1], [0, 0, 1, 1], [], []>} : vector<128x128xbf16>, vector<128x128xbf16>, vector<128x128xf32> -> vector<128x128xf32>
      %24 = arith.addf %16, %23 : vector<128x128xf32>
      %25 = arith.index_cast %17 : i32 to index
      %c1_27 = arith.constant 1 : index
      %c0_28 = arith.constant 0 : index
      %26 = vector.load %arg7[%25, %c1_27, %c0_28] : memref<18x18x128xbf16, #tpu.memory_space<vmem>>, vector<8x16x128xbf16>
      %27 = vector.shape_cast %26 : vector<8x16x128xbf16> to vector<128x128xbf16>
      %c1_29 = arith.constant 1 : index
      %c0_30 = arith.constant 0 : index
      %c0_31 = arith.constant 0 : index
      %28 = vector.load %arg4[%c1_29, %c0_30, %c0_31] : memref<9x128x128xbf16, #tpu.memory_space<vmem>>, vector<1x128x128xbf16>
      %29 = vector.shape_cast %28 : vector<1x128x128xbf16> to vector<128x128xbf16>
      %cst_32 = arith.constant dense<0.000000e+00> : vector<128x128xf32>
      %30 = tpu.matmul %27, %29, %cst_32 {dimension_numbers = #tpu.dot_dimension_numbers<[1], [0], [0], [1], [0, 0, 1, 1], [], []>} : vector<128x128xbf16>, vector<128x128xbf16>, vector<128x128xf32> -> vector<128x128xf32>
      %31 = arith.addf %24, %30 : vector<128x128xf32>
      %32 = arith.index_cast %17 : i32 to index
      %c2 = arith.constant 2 : index
      %c0_33 = arith.constant 0 : index
      %33 = vector.load %arg7[%32, %c2, %c0_33] : memref<18x18x128xbf16, #tpu.memory_space<vmem>>, vector<8x16x128xbf16>
      %34 = vector.shape_cast %33 : vector<8x16x128xbf16> to vector<128x128xbf16>
      %c2_34 = arith.constant 2 : index
      %c0_35 = arith.constant 0 : index
      %c0_36 = arith.constant 0 : index
      %35 = vector.load %arg4[%c2_34, %c0_35, %c0_36] : memref<9x128x128xbf16, #tpu.memory_space<vmem>>, vector<1x128x128xbf16>
      %36 = vector.shape_cast %35 : vector<1x128x128xbf16> to vector<128x128xbf16>
      %cst_37 = arith.constant dense<0.000000e+00> : vector<128x128xf32>
      %37 = tpu.matmul %34, %36, %cst_37 {dimension_numbers = #tpu.dot_dimension_numbers<[1], [0], [0], [1], [0, 0, 1, 1], [], []>} : vector<128x128xbf16>, vector<128x128xbf16>, vector<128x128xf32> -> vector<128x128xf32>
      %38 = arith.addf %31, %37 : vector<128x128xf32>
      %c1_i32_38 = arith.constant 1 : i32
      %39 = arith.addi %15, %c1_i32_38 : i32
      %40 = arith.index_cast %39 : i32 to index
      %c0_39 = arith.constant 0 : index
      %c0_40 = arith.constant 0 : index
      %41 = vector.load %arg7[%40, %c0_39, %c0_40] : memref<18x18x128xbf16, #tpu.memory_space<vmem>>, vector<8x16x128xbf16>
      %42 = vector.shape_cast %41 : vector<8x16x128xbf16> to vector<128x128xbf16>
      %c3 = arith.constant 3 : index
      %c0_41 = arith.constant 0 : index
      %c0_42 = arith.constant 0 : index
      %43 = vector.load %arg4[%c3, %c0_41, %c0_42] : memref<9x128x128xbf16, #tpu.memory_space<vmem>>, vector<1x128x128xbf16>
      %44 = vector.shape_cast %43 : vector<1x128x128xbf16> to vector<128x128xbf16>
      %cst_43 = arith.constant dense<0.000000e+00> : vector<128x128xf32>
      %45 = tpu.matmul %42, %44, %cst_43 {dimension_numbers = #tpu.dot_dimension_numbers<[1], [0], [0], [1], [0, 0, 1, 1], [], []>} : vector<128x128xbf16>, vector<128x128xbf16>, vector<128x128xf32> -> vector<128x128xf32>
      %46 = arith.addf %38, %45 : vector<128x128xf32>
      %47 = arith.index_cast %39 : i32 to index
      %c1_44 = arith.constant 1 : index
      %c0_45 = arith.constant 0 : index
      %48 = vector.load %arg7[%47, %c1_44, %c0_45] : memref<18x18x128xbf16, #tpu.memory_space<vmem>>, vector<8x16x128xbf16>
      %49 = vector.shape_cast %48 : vector<8x16x128xbf16> to vector<128x128xbf16>
      %c4 = arith.constant 4 : index
      %c0_46 = arith.constant 0 : index
      %c0_47 = arith.constant 0 : index
      %50 = vector.load %arg4[%c4, %c0_46, %c0_47] : memref<9x128x128xbf16, #tpu.memory_space<vmem>>, vector<1x128x128xbf16>
      %51 = vector.shape_cast %50 : vector<1x128x128xbf16> to vector<128x128xbf16>
      %cst_48 = arith.constant dense<0.000000e+00> : vector<128x128xf32>
      %52 = tpu.matmul %49, %51, %cst_48 {dimension_numbers = #tpu.dot_dimension_numbers<[1], [0], [0], [1], [0, 0, 1, 1], [], []>} : vector<128x128xbf16>, vector<128x128xbf16>, vector<128x128xf32> -> vector<128x128xf32>
      %53 = arith.addf %46, %52 : vector<128x128xf32>
      %54 = arith.index_cast %39 : i32 to index
      %c2_49 = arith.constant 2 : index
      %c0_50 = arith.constant 0 : index
      %55 = vector.load %arg7[%54, %c2_49, %c0_50] : memref<18x18x128xbf16, #tpu.memory_space<vmem>>, vector<8x16x128xbf16>
      %56 = vector.shape_cast %55 : vector<8x16x128xbf16> to vector<128x128xbf16>
      %c5 = arith.constant 5 : index
      %c0_51 = arith.constant 0 : index
      %c0_52 = arith.constant 0 : index
      %57 = vector.load %arg4[%c5, %c0_51, %c0_52] : memref<9x128x128xbf16, #tpu.memory_space<vmem>>, vector<1x128x128xbf16>
      %58 = vector.shape_cast %57 : vector<1x128x128xbf16> to vector<128x128xbf16>
      %cst_53 = arith.constant dense<0.000000e+00> : vector<128x128xf32>
      %59 = tpu.matmul %56, %58, %cst_53 {dimension_numbers = #tpu.dot_dimension_numbers<[1], [0], [0], [1], [0, 0, 1, 1], [], []>} : vector<128x128xbf16>, vector<128x128xbf16>, vector<128x128xf32> -> vector<128x128xf32>
      %60 = arith.addf %53, %59 : vector<128x128xf32>
      %c2_i32_54 = arith.constant 2 : i32
      %61 = arith.addi %15, %c2_i32_54 : i32
      %62 = arith.index_cast %61 : i32 to index
      %c0_55 = arith.constant 0 : index
      %c0_56 = arith.constant 0 : index
      %63 = vector.load %arg7[%62, %c0_55, %c0_56] : memref<18x18x128xbf16, #tpu.memory_space<vmem>>, vector<8x16x128xbf16>
      %64 = vector.shape_cast %63 : vector<8x16x128xbf16> to vector<128x128xbf16>
      %c6 = arith.constant 6 : index
      %c0_57 = arith.constant 0 : index
      %c0_58 = arith.constant 0 : index
      %65 = vector.load %arg4[%c6, %c0_57, %c0_58] : memref<9x128x128xbf16, #tpu.memory_space<vmem>>, vector<1x128x128xbf16>
      %66 = vector.shape_cast %65 : vector<1x128x128xbf16> to vector<128x128xbf16>
      %cst_59 = arith.constant dense<0.000000e+00> : vector<128x128xf32>
      %67 = tpu.matmul %64, %66, %cst_59 {dimension_numbers = #tpu.dot_dimension_numbers<[1], [0], [0], [1], [0, 0, 1, 1], [], []>} : vector<128x128xbf16>, vector<128x128xbf16>, vector<128x128xf32> -> vector<128x128xf32>
      %68 = arith.addf %60, %67 : vector<128x128xf32>
      %69 = arith.index_cast %61 : i32 to index
      %c1_60 = arith.constant 1 : index
      %c0_61 = arith.constant 0 : index
      %70 = vector.load %arg7[%69, %c1_60, %c0_61] : memref<18x18x128xbf16, #tpu.memory_space<vmem>>, vector<8x16x128xbf16>
      %71 = vector.shape_cast %70 : vector<8x16x128xbf16> to vector<128x128xbf16>
      %c7 = arith.constant 7 : index
      %c0_62 = arith.constant 0 : index
      %c0_63 = arith.constant 0 : index
      %72 = vector.load %arg4[%c7, %c0_62, %c0_63] : memref<9x128x128xbf16, #tpu.memory_space<vmem>>, vector<1x128x128xbf16>
      %73 = vector.shape_cast %72 : vector<1x128x128xbf16> to vector<128x128xbf16>
      %cst_64 = arith.constant dense<0.000000e+00> : vector<128x128xf32>
      %74 = tpu.matmul %71, %73, %cst_64 {dimension_numbers = #tpu.dot_dimension_numbers<[1], [0], [0], [1], [0, 0, 1, 1], [], []>} : vector<128x128xbf16>, vector<128x128xbf16>, vector<128x128xf32> -> vector<128x128xf32>
      %75 = arith.addf %68, %74 : vector<128x128xf32>
      %76 = arith.index_cast %61 : i32 to index
      %c2_65 = arith.constant 2 : index
      %c0_66 = arith.constant 0 : index
      %77 = vector.load %arg7[%76, %c2_65, %c0_66] : memref<18x18x128xbf16, #tpu.memory_space<vmem>>, vector<8x16x128xbf16>
      %78 = vector.shape_cast %77 : vector<8x16x128xbf16> to vector<128x128xbf16>
      %c8 = arith.constant 8 : index
      %c0_67 = arith.constant 0 : index
      %c0_68 = arith.constant 0 : index
      %79 = vector.load %arg4[%c8, %c0_67, %c0_68] : memref<9x128x128xbf16, #tpu.memory_space<vmem>>, vector<1x128x128xbf16>
      %80 = vector.shape_cast %79 : vector<1x128x128xbf16> to vector<128x128xbf16>
      %cst_69 = arith.constant dense<0.000000e+00> : vector<128x128xf32>
      %81 = tpu.matmul %78, %80, %cst_69 {dimension_numbers = #tpu.dot_dimension_numbers<[1], [0], [0], [1], [0, 0, 1, 1], [], []>} : vector<128x128xbf16>, vector<128x128xbf16>, vector<128x128xf32> -> vector<128x128xf32>
      %82 = arith.addf %75, %81 : vector<128x128xf32>
      %c1_i32_70 = arith.constant 1 : i32
      %83 = arith.addi %c1_i32_70, %15 : i32
      %c0_71 = arith.constant 0 : index
      %84 = arith.index_cast %83 : i32 to index
      %c1_72 = arith.constant 1 : index
      %c0_73 = arith.constant 0 : index
      %85 = vector.load %arg1[%c0_71, %84, %c1_72, %c0_73] : memref<1x18x18x128xbf16, #tpu.memory_space<vmem>>, vector<1x8x16x128xbf16>
      %86 = vector.shape_cast %85 : vector<1x8x16x128xbf16> to vector<8x16x128xbf16>
      %87 = arith.extf %86 : vector<8x16x128xbf16> to vector<8x16x128xf32>
      %88 = arith.addf %82, %11 : vector<128x128xf32>
      %89 = vector.shape_cast %87 : vector<8x16x128xf32> to vector<128x128xf32>
      %90 = arith.addf %88, %89 : vector<128x128xf32>
      %cst_74 = arith.constant 0.000000e+00 : f32
      %91 = vector.broadcast %cst_74 : f32 to vector<128x128xf32>
      %92 = arith.maximumf %90, %91 : vector<128x128xf32>
      %93 = vector.shape_cast %92 : vector<128x128xf32> to vector<8x16x128xf32>
      %94 = arith.truncf %93 : vector<8x16x128xf32> to vector<8x16x128xbf16>
      %c0_75 = arith.constant 0 : index
      %95 = arith.index_cast %15 : i32 to index
      %c0_76 = arith.constant 0 : index
      %c0_77 = arith.constant 0 : index
      %96 = vector.load %arg6[%c0_75, %95, %c0_76, %c0_77] : memref<1x16x16x128xbf16, #tpu.memory_space<vmem>>, vector<1x8x16x128xbf16>
      %97 = vector.shape_cast %96 : vector<1x8x16x128xbf16> to vector<8x16x128xbf16>
      %98 = vector.shape_cast %94 : vector<8x16x128xbf16> to vector<1x8x16x128xbf16>
      tpu.vector_store %arg6[%c0_75, %95, %c0_76, %c0_77], %98 {strides = array<i32>} : memref<1x16x16x128xbf16, #tpu.memory_space<vmem>>, vector<1x8x16x128xbf16>,
    }
    %c2_i32_18 = arith.constant 2 : i32
    return
  }
  func.func @transform_0(%arg0: i32) -> (i32, i32, i32, i32) {
    %c0_i32 = arith.constant 0 : i32
    %c0_i32_0 = arith.constant 0 : i32
    %c0_i32_1 = arith.constant 0 : i32
    %c0_i32_2 = arith.constant 0 : i32
    return %arg0, %c0_i32, %c0_i32_0, %c0_i32_1 : i32, i32, i32, i32
  }
  func.func @transform_1(%arg0: i32) -> (i32, i32, i32) {
    %c0_i32 = arith.constant 0 : i32
    %c0_i32_0 = arith.constant 0 : i32
    %c0_i32_1 = arith.constant 0 : i32
    %c0_i32_2 = arith.constant 0 : i32
    return %c0_i32, %c0_i32_0, %c0_i32_1 : i32, i32, i32
  }
  func.func @transform_2(%arg0: i32) -> (i32, i32) {
    %c0_i32 = arith.constant 0 : i32
    %c0_i32_0 = arith.constant 0 : i32
    %c0_i32_1 = arith.constant 0 : i32
    return %c0_i32, %c0_i32_0 : i32, i32
  }
  func.func @transform_3(%arg0: i32) -> (i32, i32, i32) {
    %c0_i32 = arith.constant 0 : i32
    %c0_i32_0 = arith.constant 0 : i32
    %c0_i32_1 = arith.constant 0 : i32
    %c0_i32_2 = arith.constant 0 : i32
    return %c0_i32, %c0_i32_0, %c0_i32_1 : i32, i32, i32
  }
  func.func @transform_4(%arg0: i32) -> (i32, i32) {
    %c0_i32 = arith.constant 0 : i32
    %c0_i32_0 = arith.constant 0 : i32
    %c0_i32_1 = arith.constant 0 : i32
    return %c0_i32, %c0_i32_0 : i32, i32
  }
  func.func @transform_5(%arg0: i32) -> (i32, i32, i32, i32) {
    %c0_i32 = arith.constant 0 : i32
    %c0_i32_0 = arith.constant 0 : i32
    %c0_i32_1 = arith.constant 0 : i32
    %c0_i32_2 = arith.constant 0 : i32
    return %arg0, %c0_i32, %c0_i32_0, %c0_i32_1 : i32, i32, i32, i32
  }
}

</mosaic_0001>

<bundles_post_ra>
// kernel: tpu_custom_call.1
= control target key start
LH: loop header
LB: loop body
LE: loop exit
PB: predicated region body
PF: predicated region fallthrough
CT: control target
= control target key end

     0   :  { %10 = vsyncpa [#allocation4], 0  ;;  %s11518_s0 = inlined_call_operand.vmem [shape: bf16[2,18,18,128], index: 0, kind: input, shape index: {}]   ;;  %s11519_s1 = inlined_call_operand.vmem [shape: bf16[9,128,128], index: 1, kind: input, shape index: {}]   ;;  %s11520_s2 = inlined_call_operand.vmem [shape: f32[1,128], index: 2, kind: input, shape index: {}]   ;;  %s11521_s3 = inlined_call_operand.hbm [shape: bf16[9,128,128], index: 3, kind: input, shape index: {}]   ;;  %s11522_s4 = inlined_call_operand.vmem [shape: f32[1,128], index: 4, kind: input, shape index: {}]   ;;  %s11523_s5 = inlined_call_operand.hbm [shape: bf16[2,16,16,128], index: 5, kind: output, shape index: {}]  }
   0x1   :  { %11 = vsyncpa [#allocation5], 0 }
   0x2   :  { %13 = vsyncpa [#allocation5 + $0x1], 0  ;;  %s9248_s18 = smov 0   ;;  %s9250_s19 = smov 0  }
   0x3   :  { %s9252_s20 = smov 0   ;;  %s9254_s21 = smov 0  }
   0x4 LB: > { %s9269_s22 = sadd.s32 4294967295, %s9201_s21   ;;  %s6784_s23 = sadd.s32 4294967294, %s9201_s21   ;;  %s9201_s21 = sphi %s9254_s21, %s11589_s21   ;;  %s9197_s20 = sphi %s9252_s20, %s11588_s20   ;;  %s9193_s19 = sphi %s9250_s19, %s11587_s19   ;;  %s9189_s18 = sphi %s9248_s18, %s11586_s18  }
   0x5   : > { %s9273_s24 = sadd.s32 1, %s9201_s21   ;;  %s136_s25 = sadd.s32 1, %s9197_s20 }
   0x6   : > { %s133_s26 = ssub.s32 %s9201_s21, %s9273_s24  ;;  %p146_p0 = scmp.ne.s32.totalorder %s9197_s20, %s9193_s19 }
   0x7   : > { %p134_p1 = scmp.eq.s32.totalorder %s133_s26, 0  ;;  %p147_p2 = scmp.eq.s32.totalorder %s9269_s22, 1 }
   0x8   : > { %p152_p3 = scmp.ne.s32.totalorder %s9193_s19, %s9189_s18  ;;  %p153_p4 = scmp.eq.s32.totalorder %s6784_s23, 1 }
   0x9   : > { %s9284_s27 = scalar_select %p134_p1, %s9197_s20, %s136_s25  }
   0xa   : > { %p9286_p5 = por %p147_p2, %p146_p0  ;;  %p9290_p6 = por %p153_p4, %p152_p3 }
   0xb   : > { %p6785_p7 = scmp.ge.s32.totalorder %s9201_s21, 1  ;;  %p160_p8 = scmp.lt.s32.totalorder %s9201_s21, 3 }
   0xc   : > { %s11538_s28 = scalar_select %p9286_p5, 1, 0 }
   0xd   : > { %s11539_s29 = scalar_select %p9290_p6, 1, 0 }
   0xe   : > { %p11524_p9 = scmp.eq.s32.totalorder %s9269_s22, 0  ;;  %p9297_p10 = pnand %p6785_p7, %p160_p8 }
   0xf   : > { %s9211_s6 = smov [#allocation3]   ;;  %s9099_s11 = scalar_lea.hbm %s11521_s3, 9216 }
  0x10   : > { %s11540_s30 = scalar_select %p9297_p10, 1, 0 }
  0x11   : > { %s178_s7 = sshll.u32 %s9211_s6, 4  ;;  %p8834_p11 = pneg %p9297_p10  ;;  %s179_s7 = int_to_ptr.vmem [resolvable:$true] %s178_s7 }
  0x12   : > { %p9100_p13 = scmp.ne.s32.totalorder %s11521_s3, %s9099_s11  ;;  %p9106_p3 = scmp.lt.u32.totalorder %s9099_s11, %s11521_s3 }
  0x13   : > { %p9305_p12 = pnand %p11524_p9, %p8834_p11 }
  0x15   : > { %p9101_p0 = pneg %p9305_p12 }
  0x17   : > { %p9102_p1 = pnand %p9101_p0, %p9100_p13 }
  0x19   : > { %p9103_p2 = pneg %p9102_p1 }
  0x1b   : > { %p9108_p4 = pnand %p9106_p3, %p9103_p2 }
  0x1d   : > { %9111 = shalt.err (!%p9108_p4)
}
  0x1e   : > { %s9112_s16 = scalar_lea.vmem %s179_s7, 9216  ;;  %p9120_p9 = scmp.lt.s32.totalorder %s179_s7, %s179_s7 }
  0x1f   : > { %p9113_p7 = scmp.ne.s32.totalorder %s179_s7, %s9112_s16  ;;  %p9121_p6 = scmp.lt.s32.totalorder %s9112_s16, %s9112_s16 }
  0x21   : > { %p9115_p8 = pnand %p9113_p7, %p9101_p0  ;;  %p9122_p5 = por %p9121_p6, %p9120_p9 }
  0x23   : > { %p9116_p11 = pneg %p9115_p8 }
  0x25   : > { %p9123_p10 = pnand %p9122_p5, %p9116_p11 }
  0x27   : > { %9126 = shalt.err (!%p9123_p10)
}
  0x28   : > { %s9212_s17 = smov 64   ;;  %s9213_s23 = smov 4  }
  0x29   : > { %8837 = dma.hbm_to_vmem [thread:$0]  (!%p9305_p12), %s11521_s3, 9216, %s179_s7, [#allocation4], %s9212_s17, %s9212_s17, %s9213_s23  }
  0x2a   : > { %p11542_p13 = scmp.ne.s32.totalorder %s11540_s30, 0 }
  0x2c   : > { %205 = sbr.rel (%p11542_p13) target bundleno = 977 (0x3d1), region = 40 }
  0x33   : > { %p11543_p1 = scmp.eq.s32.totalorder %s9269_s22, 0 }
  0x35   : > { %9180 = dma.done.wait (%p11543_p1), [#allocation4], 9216   ;;  %p11544_p0 = pmov %p11543_p1 }
  0x36   : > { %s230_s6 = sand.u32 1, %s9193_s19   ;;  %p233_p5 = scmp.lt.s32.totalorder %s9269_s22, 1  ;;  %v9214_v0 = vmov 0   ;;  %vm247_vm0 = vcmask 1040384   ;;  %vm248_vm1 = vsmask.f32 256 }
  0x37   : > { %9182 = vsyncadd (%p11544_p0), [#allocation4], 4294958080  ;;  %s9335_s8 = sshll.u32 %s230_s6, 7  ;;  %239 = vst [vmem:[#allocation2] sm:$0xf] %v9214_v0  ;;  %v11545_v1 = vmov 0 }
  0x38   : > { %240 = vst [vmem:[#allocation2 + $0x4] sm:$0xf] %v9214_v0  ;;  %241 = vst [vmem:[#allocation2 + $0x8] sm:$0x1] %v9214_v0  ;;  %s234_s30 = scalar_select %p233_p5, %s9269_s22, 1 }
  0x39   : > { %243 = vst [vmem:[#allocation2 + $0xcc] sm:$0xf] %v9214_v0  ;;  %244 = vst [vmem:[#allocation2 + $0xd0] sm:$0xf] %v9214_v0  ;;  %vm298_vm3 = vsmask.f32 7938 }
  0x3a   : > { %245 = vst [vmem:[#allocation2 + $0xd4] sm:$0x1] %v9214_v0  ;;  %s8827_s7 = smul.u32 216, %s234_s30  ;;  %vm9340_vm2 = vmand %vm247_vm0, %vm248_vm1  ;;  %v9347_v2 = vld [vmem:[%s11520_s2] ss:$0 sm:$0xff]  ;;  %s232_s16 = scalar_lea.vmem [#allocation6], %s9335_s8 }
  0x3b   : > { %v11546_v1 = vsel %vm9340_vm2, 4294967295, %v11545_v1  ;;  %11548 = vst [vmem:[#allocation10_spill] sm:$0xff] %v9347_v2  ;;  %v9352_v3 = vld [vmem:[%s11522_s4] ss:$0 sm:$0xff]  ;;  %v250_v4 = vld [vmem:[#allocation2 + $0xc] sm:$0x1]  ;;  %vm9383_vm4 = vmand %vm247_vm0, %vm298_vm3 }
  0x3c   : > { %11547 = vst [vmem:[#allocation9_spill] sm:$0xff] %v11546_v1  ;;  %11549 = vst [vmem:[#allocation11_spill] sm:$0xff] %v9352_v3  ;;  %s9357_s15 = scalar_lea.vmem %s11518_s0, %s8827_s7  ;;  %v251_v5 = vsel %vm9340_vm2, 0, %v250_v4  ;;  %v253_v6 = vld [vmem:[#allocation2 + $0x18] sm:$0x1]  ;;  %s9430_s17 = smov 0  }
  0x3d   : > { %v256_v7 = vld [vmem:[#allocation2 + $0x24] sm:$0x1]  ;;  %252 = vst [vmem:[#allocation2 + $0xc] sm:$0x1] %v251_v5  ;;  %v254_v8 = vsel %vm9340_vm2, 0, %v253_v6 }
  0x3e   : > { %v257_v9 = vsel %vm9340_vm2, 0, %v256_v7  ;;  %v259_v10 = vld [vmem:[#allocation2 + $0x30] sm:$0x1]  ;;  %v262_v11 = vld [vmem:[#allocation2 + $0x3c] sm:$0x1] }
  0x3f   : > { %255 = vst [vmem:[#allocation2 + $0x18] sm:$0x1] %v254_v8  ;;  %258 = vst [vmem:[#allocation2 + $0x24] sm:$0x1] %v257_v9  ;;  %v260_v12 = vsel %vm9340_vm2, 0, %v259_v10  ;;  %v263_v13 = vsel %vm9340_vm2, 0, %v262_v11 }
  0x40   : > { %v265_v14 = vld [vmem:[#allocation2 + $0x48] sm:$0x1]  ;;  %v268_v15 = vld [vmem:[#allocation2 + $0x54] sm:$0x1]  ;;  %261 = vst [vmem:[#allocation2 + $0x30] sm:$0x1] %v260_v12 }
  0x41   : > { %264 = vst [vmem:[#allocation2 + $0x3c] sm:$0x1] %v263_v13  ;;  %v266_v16 = vsel %vm9340_vm2, 0, %v265_v14  ;;  %v269_v17 = vsel %vm9340_vm2, 0, %v268_v15  ;;  %v271_v18 = vld [vmem:[#allocation2 + $0x60] sm:$0x1] }
  0x42   : > { %v274_v19 = vld [vmem:[#allocation2 + $0x6c] sm:$0x1]  ;;  %267 = vst [vmem:[#allocation2 + $0x48] sm:$0x1] %v266_v16  ;;  %270 = vst [vmem:[#allocation2 + $0x54] sm:$0x1] %v269_v17 }
  0x43   : > { %v272_v20 = vsel %vm9340_vm2, 0, %v271_v18  ;;  %v275_v21 = vsel %vm9340_vm2, 0, %v274_v19  ;;  %v277_v22 = vld [vmem:[#allocation2 + $0x78] sm:$0x1]  ;;  %v280_v23 = vld [vmem:[#allocation2 + $0x84] sm:$0x1] }
  0x44   : > { %273 = vst [vmem:[#allocation2 + $0x60] sm:$0x1] %v272_v20  ;;  %276 = vst [vmem:[#allocation2 + $0x6c] sm:$0x1] %v275_v21  ;;  %v278_v24 = vsel %vm9340_vm2, 0, %v277_v22  ;;  %v281_v25 = vsel %vm9340_vm2, 0, %v280_v23 }
  0x45   : > { %v283_v26 = vld [vmem:[#allocation2 + $0x90] sm:$0x1]  ;;  %v286_v27 = vld [vmem:[#allocation2 + $0x9c] sm:$0x1]  ;;  %279 = vst [vmem:[#allocation2 + $0x78] sm:$0x1] %v278_v24 }
  0x46   : > { %282 = vst [vmem:[#allocation2 + $0x84] sm:$0x1] %v281_v25  ;;  %v284_v29 = vsel %vm9340_vm2, 0, %v283_v26  ;;  %v287_v30 = vsel %vm9340_vm2, 0, %v286_v27  ;;  %v289_v31 = vld [vmem:[#allocation2 + $0xa8] sm:$0x1] }
  0x47   : > { %v292_v32 = vld [vmem:[#allocation2 + $0xb4] sm:$0x1]  ;;  %285 = vst [vmem:[#allocation2 + $0x90] sm:$0x1] %v284_v29  ;;  %288 = vst [vmem:[#allocation2 + $0x9c] sm:$0x1] %v287_v30 }
  0x48   : > { %v290_v33 = vsel %vm9340_vm2, 0, %v289_v31  ;;  %v293_v34 = vsel %vm9340_vm2, 0, %v292_v32  ;;  %v295_v35 = vld [vmem:[#allocation2 + $0xc0] sm:$0x1]  ;;  %v300_v36 = vld [vmem:[#allocation2 + $0x14] sm:$0x1] }
  0x49   : > { %291 = vst [vmem:[#allocation2 + $0xa8] sm:$0x1] %v290_v33  ;;  %294 = vst [vmem:[#allocation2 + $0xb4] sm:$0x1] %v293_v34  ;;  %v296_v37 = vsel %vm9340_vm2, 0, %v295_v35  ;;  %v301_v38 = vsel %vm9383_vm4, 0, %v300_v36 }
  0x4a   : > { %v303_v39 = vld [vmem:[#allocation2 + $0x20] sm:$0x1]  ;;  %v306_v40 = vld [vmem:[#allocation2 + $0x2c] sm:$0x1]  ;;  %297 = vst [vmem:[#allocation2 + $0xc0] sm:$0x1] %v296_v37 }
  0x4b   : > { %302 = vst [vmem:[#allocation2 + $0x14] sm:$0x1] %v301_v38  ;;  %v304_v41 = vsel %vm9383_vm4, 0, %v303_v39  ;;  %v307_v42 = vsel %vm9383_vm4, 0, %v306_v40  ;;  %v309_v43 = vld [vmem:[#allocation2 + $0x38] sm:$0x1] }
  0x4c   : > { %v312_v44 = vld [vmem:[#allocation2 + $0x44] sm:$0x1]  ;;  %305 = vst [vmem:[#allocation2 + $0x20] sm:$0x1] %v304_v41  ;;  %308 = vst [vmem:[#allocation2 + $0x2c] sm:$0x1] %v307_v42 }
  0x4d   : > { %v310_v45 = vsel %vm9383_vm4, 0, %v309_v43  ;;  %v313_v46 = vsel %vm9383_vm4, 0, %v312_v44  ;;  %v315_v47 = vld [vmem:[#allocation2 + $0x50] sm:$0x1]  ;;  %v318_v48 = vld [vmem:[#allocation2 + $0x5c] sm:$0x1] }
  0x4e   : > { %311 = vst [vmem:[#allocation2 + $0x38] sm:$0x1] %v310_v45  ;;  %314 = vst [vmem:[#allocation2 + $0x44] sm:$0x1] %v313_v46  ;;  %v316_v49 = vsel %vm9383_vm4, 0, %v315_v47  ;;  %v319_v50 = vsel %vm9383_vm4, 0, %v318_v48 }
  0x4f   : > { %v321_v51 = vld [vmem:[#allocation2 + $0x68] sm:$0x1]  ;;  %v324_v52 = vld [vmem:[#allocation2 + $0x74] sm:$0x1]  ;;  %317 = vst [vmem:[#allocation2 + $0x50] sm:$0x1] %v316_v49 }
  0x50   : > { %320 = vst [vmem:[#allocation2 + $0x5c] sm:$0x1] %v319_v50  ;;  %v322_v53 = vsel %vm9383_vm4, 0, %v321_v51  ;;  %v325_v54 = vsel %vm9383_vm4, 0, %v324_v52  ;;  %v327_v55 = vld [vmem:[#allocation2 + $0x80] sm:$0x1] }
  0x51   : > { %v330_v56 = vld [vmem:[#allocation2 + $0x8c] sm:$0x1]  ;;  %323 = vst [vmem:[#allocation2 + $0x68] sm:$0x1] %v322_v53  ;;  %326 = vst [vmem:[#allocation2 + $0x74] sm:$0x1] %v325_v54 }
  0x52   : > { %v328_v57 = vsel %vm9383_vm4, 0, %v327_v55  ;;  %v331_v58 = vsel %vm9383_vm4, 0, %v330_v56  ;;  %v333_v59 = vld [vmem:[#allocation2 + $0x98] sm:$0x1]  ;;  %v336_v60 = vld [vmem:[#allocation2 + $0xa4] sm:$0x1] }
  0x53   : > { %329 = vst [vmem:[#allocation2 + $0x80] sm:$0x1] %v328_v57  ;;  %332 = vst [vmem:[#allocation2 + $0x8c] sm:$0x1] %v331_v58  ;;  %v334_v61 = vsel %vm9383_vm4, 0, %v333_v59  ;;  %v337_v62 = vsel %vm9383_vm4, 0, %v336_v60 }
  0x54   : > { %v339_v63 = vld [vmem:[#allocation2 + $0xb0] sm:$0x1]  ;;  %v342_v0 = vld [vmem:[#allocation2 + $0xbc] sm:$0x1]  ;;  %335 = vst [vmem:[#allocation2 + $0x98] sm:$0x1] %v334_v61 }
  0x55   : > { %338 = vst [vmem:[#allocation2 + $0xa4] sm:$0x1] %v337_v62  ;;  %v340_v4 = vsel %vm9383_vm4, 0, %v339_v63  ;;  %v343_v5 = vsel %vm9383_vm4, 0, %v342_v0  ;;  %v345_v6 = vld [vmem:[#allocation2 + $0xc8] sm:$0x1] }
  0x56   : > { %341 = vst [vmem:[#allocation2 + $0xb0] sm:$0x1] %v340_v4  ;;  %344 = vst [vmem:[#allocation2 + $0xbc] sm:$0x1] %v343_v5  ;;  %v346_v7 = vsel %vm9383_vm4, 0, %v345_v6 }
  0x57   : > { %347 = vst [vmem:[#allocation2 + $0xc8] sm:$0x1] %v346_v7 }
  0x58 LB: >> { %v8899_v8 = vld [vmem:[%s11519_s1 + $0x40] sm:$0xff]   ;;  %v8901_v10 = vld [vmem:[%s11519_s1 + $0x48] sm:$0xff]   ;;  %v8903_v12 = vld [vmem:[%s11519_s1 + $0x50] sm:$0xff]   ;;  %s7571_s9 = smul.u32 96, %s9205_s17  ;;  %vm412_vm5 = vsmask.f32 3328  ;;  %s9205_s17 = sphi %s9430_s17, %s367_s17  }
  0x59   : >> { %v8900_v9 = vld [vmem:[%s11519_s1 + $0x100] sm:$0xff]   ;;  %7963 = vmatprep.subr.bf16.mxu1 %v8899_v8  ;;  %v8902_v11 = vld [vmem:[%s11519_s1 + $0x108] sm:$0xff]   ;;  %v8904_v13 = vld [vmem:[%s11519_s1 + $0x110] sm:$0xff]   ;;  %vm413_vm6 = vsmask.f32 7440  ;;  %vm1018_vm8 = vcmask 1042432  }
  0x5a   : >> { %8091 = vmatprep.subr.bf16.mxu0 %v8900_v9  ;;  %7964 = vmatpush3.bf16.msra.mxu1 %v8899_v8  ;;  %v8905_v14 = vld [vmem:[%s11519_s1 + $0x58] sm:$0xff]   ;;  %v8907_v16 = vld [vmem:[%s11519_s1 + $0x60] sm:$0xff]   ;;  %s9469_s14 = scalar_lea.vmem %s9357_s15, %s7571_s9  ;;  %v8909_v18 = vld [vmem:[%s11519_s1 + $0x68] sm:$0xff]   ;;  %vm1019_vm9 = vcmask 1046532   ;;  %vm3471_vm11 = vcmask 1043456   ;;  %s367_s17 = sadd.s32 1, %s9205_s17  }
  0x5b   : >> { %8092 = vmatpush3.bf16.msra.mxu0 %v8900_v9  ;;  %7965 = vmatprep.subr.bf16.mxu1 %v8901_v10  ;;  %v8906_v15 = vld [vmem:[%s11519_s1 + $0x118] sm:$0xff]   ;;  %v8908_v17 = vld [vmem:[%s11519_s1 + $0x120] sm:$0xff]   ;;  %v8910_v19 = vld [vmem:[%s11519_s1 + $0x128] sm:$0xff]   ;;  %vm3307_vm12 = vsmask.f32 4368  ;;  %p364_p6 = scmp.ge.s32.totalorder %s367_s17, 2  }
  0x5c   : >> { %8093 = vmatprep.subr.bf16.mxu0 %v8902_v11  ;;  %v9478_v20 = vld [vmem:[%s9469_s14] sm:$0xf]  ;;  %v9481_v21 = vld [vmem:[%s9469_s14 + $0x4] sm:$0xf]  ;;  %v9484_v22 = vld [vmem:[%s9469_s14 + $0x8] sm:$0x1] }
  0x5d   : >> { %v416_v23 = vshrl.u32 %v9478_v20, 16  ;;  %v419_v24 = vshll.u32 %v9478_v20, 16  ;;  %v425_v25 = vshll.u32 %v9481_v21, 16  ;;  %v429_v26 = vshrl.u32 %v9481_v21, 16  ;;  %v6935_v28 = vld [vmem:[%s9469_s14 + $0xc] sm:$0xf]  ;;  %vm9514_vm7 = vmor %vm412_vm5, %vm413_vm6 }
  0x5e   : >> { %7966 = vmatpush3.bf16.msra.mxu1 %v8901_v10  ;;  %v435_v27 = vshll.u32 %v9484_v22, 16  ;;  %v9493_v31 = vld [vmem:[%s9469_s14 + $0x10] sm:$0xf]  ;;  %v9496_v32 = vld [vmem:[%s9469_s14 + $0x14] sm:$0x1]  ;;  %v1558_v36 = vshrl.u32 %v6935_v28, 16  ;;  %vm9811_vm10 = vmor %vm1018_vm8, %vm1019_vm9 }
  0x5f   : >> { %8094 = vmatpush3.bf16.msra.mxu0 %v8902_v11  ;;  %7967 = vmatprep.subr.bf16.mxu1 %v8903_v12  ;;  %v418_v29 = vrot.slane %v416_v23, 4  ;;  %v421_v30 = vrot.slane %v419_v24, 5  ;;  %v8911_v33 = vld [vmem:[%s11519_s1 + $0x70] sm:$0xff]   ;;  %v427_v34 = vrot.slane %v425_v25, 5  ;;  %v431_v35 = vrot.slane %v429_v26, 4  ;;  %v8913_v43 = vld [vmem:[%s11519_s1 + $0x78] sm:$0xff]   ;;  %vm10463_vm13 = vmand %vm3471_vm11, %vm298_vm3 }
  0x60   : >> { %8095 = vmatprep.subr.bf16.mxu0 %v8904_v13  ;;  %v8912_v37 = vld [vmem:[%s11519_s1 + $0x130] sm:$0xff]   ;;  %v1561_v39 = vshll.u32 %v6935_v28, 16  ;;  %v1567_v40 = vshll.u32 %v9493_v31, 16  ;;  %v1571_v41 = vshrl.u32 %v9493_v31, 16  ;;  %v9507_v42 = vld [vmem:[%s9469_s14 + $0xc] sm:$0xf]  ;;  %vm10482_vm14 = vmor %vm248_vm1, %vm3307_vm12 }
  0x61   : >> { %v422_v38 = vor.u32 %v421_v30, %v418_v29  ;;  %v432_v45 = vor.u32 %v431_v35, %v427_v34  ;;  %v437_v46 = vrot.slane %v435_v27, 5  ;;  %v1560_v47 = vrot.slane %v1558_v36, 4  ;;  %v9520_v49 = vld [vmem:[%s9469_s14 + $0x10] sm:$0xf]  ;;  %v8914_v58 = vld [vmem:[%s11519_s1 + $0x138] sm:$0xff]  }
  0x62   : >> { %7968 = vmatpush3.bf16.msra.mxu1 %v8903_v12  ;;  %v1577_v48 = vshll.u32 %v9496_v32, 16  ;;  %v1563_v51 = vrot.slane %v1561_v39, 5  ;;  %v1569_v52 = vrot.slane %v1567_v40, 5  ;;  %v1573_v53 = vrot.slane %v1571_v41, 4  ;;  %v9530_v62 = vld [vmem:[%s9469_s14 + $0x14] sm:$0x1] }
  0x63   : >> { %8096 = vmatpush3.bf16.msra.mxu0 %v8904_v13  ;;  %7969 = vmatprep.subr.bf16.mxu1 %v8905_v14  ;;  %v423_v50 = vrot.slane %v422_v38, 4  ;;  %v433_v54 = vrot.slane %v432_v45, 4  ;;  %v440_v56 = vshrl.u32 %v9507_v42, 16  ;;  %v443_v57 = vshll.u32 %v9507_v42, 16  ;;  %v6938_v0 = vld [vmem:[%s9469_s14 + $0x18] sm:$0xf] }
  0x64   : >> { %8097 = vmatprep.subr.bf16.mxu0 %v8906_v15  ;;  %v1579_v55 = vrot.slane %v1577_v48, 5  ;;  %v1564_v60 = vor.u32 %v1563_v51, %v1560_v47  ;;  %v1574_v61 = vor.u32 %v1573_v53, %v1569_v52  ;;  %v449_v63 = vshll.u32 %v9520_v49, 16  ;;  %v9538_v8 = vld [vmem:[%s9469_s14 + $0x1c] sm:$0xf]  ;;  %v8915_v13 = vld [vmem:[%s11519_s1] sm:$0xff]  }
  0x65   : >> { %v428_v59 = vsel %vm9514_vm7, %v423_v50, %v427_v34  ;;  %v438_v4 = vsel %vm9514_vm7, %v433_v54, %v437_v46  ;;  %v442_v5 = vrot.slane %v440_v56, 4  ;;  %v445_v6 = vrot.slane %v443_v57, 5  ;;  %v9559_v36 = vld [vmem:[%s9469_s14 + $0x18] sm:$0xf]  ;;  %v9567_v46 = vld [vmem:[%s9469_s14 + $0x1c] sm:$0xf] }
  0x66   : >> { %7970 = vmatpush3.bf16.msra.mxu1 %v8905_v14  ;;  %v453_v7 = vshrl.u32 %v9520_v49, 16  ;;  %v6813_v9 = vcombine.low %v428_v59, %v438_v4  ;;  %v1565_v10 = vrot.slane %v1564_v60, 4  ;;  %v1575_v11 = vrot.slane %v1574_v61, 4  ;;  %v9546_v14 = vld [vmem:[%s11519_s1 + $0x140] sm:$0xff]   ;;  %v8917_v57 = vld [vmem:[%s11519_s1 + $0x8] sm:$0xff]  }
  0x67   : >> { %8098 = vmatpush3.bf16.msra.mxu0 %v8906_v15  ;;  %7971 = vmatprep.subr.bf16.mxu1 %v8907_v16  ;;  %v451_v12 = vrot.slane %v449_v63, 5  ;;  %v446_v15 = vor.u32 %v445_v6, %v442_v5  ;;  %v1582_v24 = vshrl.u32 %v6938_v0, 16  ;;  %v1585_v25 = vshll.u32 %v6938_v0, 16  ;;  %v406_v47 = vld [vmem:[%s9469_s14 + $0x20] sm:$0x1] }
  0x68   : >> { %8099 = vmatprep.subr.bf16.mxu0 %v8908_v17  ;;  %7979 = vmatprep.mubr.bf16.mxu1 %v6813_v9  ;;  %v1580_v23 = vsel %vm9514_vm7, %v1575_v11, %v1579_v55  ;;  %v1591_v34 = vshll.u32 %v9538_v8, 16  ;;  %v1595_v35 = vshrl.u32 %v9538_v8, 16  ;;  %v6941_v53 = vld [vmem:[%s9469_s14 + $0x24] sm:$0xf]  ;;  %v473_v60 = vshll.u32 %v9567_v46, 16  ;;  %v8918_v11 = vld [vmem:[%s11519_s1 + $0x148] sm:$0xff]  }
  0x69   : >> { %v447_v27 = vrot.slane %v446_v15, 4  ;;  %v1584_v30 = vrot.slane %v1582_v24, 4  ;;  %v477_v61 = vshrl.u32 %v9567_v46, 16  ;;  %v483_v63 = vshll.u32 %v406_v47, 16  ;;  %v9582_v0 = vld [vmem:[%s9469_s14 + $0x28] sm:$0xf] }
  0x6a   : >> { %7972 = vmatpush3.bf16.msra.mxu1 %v8907_v16  ;;  %v455_v16 = vrot.slane %v453_v7, 4  ;;  %v1597_v45 = vrot.slane %v1595_v35, 4  ;;  %v9587_v7 = vld [vmem:[%s9469_s14 + $0x2c] sm:$0x1]  ;;  %v1606_v9 = vshrl.u32 %v6941_v53, 16 }
  0x6b   : >> { %8100 = vmatpush3.bf16.msra.mxu0 %v8908_v17  ;;  %7973 = vmatprep.subr.bf16.mxu1 %v8909_v18  ;;  %v459_v17 = vshll.u32 %v9530_v62, 16  ;;  %v452_v38 = vsel %vm9514_vm7, %v447_v27, %v451_v12  ;;  %v479_v15 = vrot.slane %v477_v61, 4 }
  0x6c   : >> { %8101 = vmatprep.subr.bf16.mxu0 %v8910_v19  ;;  %v456_v28 = vor.u32 %v455_v16, %v451_v12  ;;  %v475_v12 = vrot.slane %v473_v60, 5  ;;  %v485_v16 = vrot.slane %v483_v63, 5 }
  0x6d   : >> { %v461_v29 = vrot.slane %v459_v17, 5  ;;  %v1609_v17 = vshll.u32 %v6941_v53, 16 }
  0x6e   : >> { %7974 = vmatpush3.bf16.msra.mxu1 %v8909_v18  ;;  %v9550_v18 = vld [vmem:[%s9469_s14 + $0x20] sm:$0x1]  ;;  %v457_v39 = vrot.slane %v456_v28, 4  ;;  %v480_v27 = vor.u32 %v479_v15, %v475_v12 }
  0x6f   : >> { %8102 = vmatpush3.bf16.msra.mxu0 %v8910_v19  ;;  %7975 = vmatprep.subr.bf16.mxu1 %v8911_v33  ;;  %v1570_v19 = vsel %vm9514_vm7, %v1565_v10, %v1569_v52  ;;  %v1601_v40 = vshll.u32 %v9550_v18, 16  ;;  %v464_v52 = vshrl.u32 %v9559_v36, 16  ;;  %v8919_v10 = vld [vmem:[%s11519_s1 + $0x10] sm:$0xff]   ;;  %v1611_v28 = vrot.slane %v1609_v17, 5 }
  0x70   : >> { %8103 = vmatprep.subr.bf16.mxu0 %v8912_v37  ;;  %v6975_v26 = vcombine.low %v1570_v19, %v1580_v23  ;;  %v462_v48 = vsel %vm9514_vm7, %v457_v39, %v461_v29  ;;  %v9596_v19 = vld [vmem:[%s9469_s14 + $0x24] sm:$0xf]  ;;  %v1619_v29 = vshrl.u32 %v9582_v0, 16 }
  0x71   : >> { %v1603_v50 = vrot.slane %v1601_v40, 5  ;;  %v6814_v54 = vcombine.low %v452_v38, %v462_v48  ;;  %v466_v59 = vrot.slane %v464_v52, 4  ;;  %v1625_v38 = vshll.u32 %v9587_v7, 16  ;;  %v6944_v40 = vld [vmem:[%s9469_s14 + $0x30] sm:$0xf] }
  0x72   : >> { %7976 = vmatpush3.bf16.msra.mxu1 %v8911_v33  ;;  %v1587_v33 = vrot.slane %v1585_v25, 5  ;;  %8107 = vmatprep.mubr.bf16.mxu0 %v6975_v26  ;;  %v1608_v25 = vrot.slane %v1606_v9, 4  ;;  %v488_v39 = vshrl.u32 %v9596_v19, 16  ;;  %v491_v47 = vshll.u32 %v9596_v19, 16  ;;  %v9613_v48 = vld [vmem:[%s9469_s14 + $0x34] sm:$0xf] }
  0x73   : >> { %8104 = vmatpush3.bf16.msra.mxu0 %v8912_v37  ;;  %7977 = vmatprep.subr.bf16.mxu1 %v8913_v43  ;;  %v1627_v53 = vrot.slane %v1625_v38, 5  ;;  %v1630_v15 = vshrl.u32 %v6944_v40, 16 }
  0x74   : >> { %8105 = vmatprep.subr.bf16.mxu0 %v8914_v58  ;;  %v1588_v41 = vor.u32 %v1587_v33, %v1584_v30  ;;  %v9603_v30 = vld [vmem:[%s9469_s14 + $0x28] sm:$0xf]  ;;  %v9606_v33 = vld [vmem:[%s9469_s14 + $0x2c] sm:$0x1] }
  0x75   : >> { %v501_v63 = vshrl.u32 %v9603_v30, 16 }
  0x76   : >> { %7978 = vmatpush3.bf16.msra.mxu1 %v8913_v43  ;;  %v1593_v43 = vrot.slane %v1591_v34, 5  ;;  %v1589_v55 = vrot.slane %v1588_v41, 4  ;;  %v481_v41 = vrot.slane %v480_v27, 4 }
  0x77   : >> { %8106 = vmatpush3.bf16.msra.mxu0 %v8914_v58  ;;  %7995 = vmatprep.subr.bf16.mxu1 %v8915_v13  ;;  %v467_v58 = vshll.u32 %v9559_v36, 16  ;;  %v503_v17 = vrot.slane %v501_v63, 4 }
  0x78   : >> { %8123 = vmatprep.subr.bf16.mxu0 %v9546_v14  ;;  %v1598_v56 = vor.u32 %v1597_v45, %v1593_v43  ;;  %v1594_v4 = vsel %vm9514_vm7, %v1589_v55, %v1593_v43  ;;  %v1612_v43 = vor.u32 %v1611_v28, %v1608_v25  ;;  %v1621_v45 = vrot.slane %v1619_v29, 4  ;;  %v9645_v29 = vld [vmem:[%s9469_s14 + $0x34] sm:$0xf] }
  0x79   : >> { %7980 = vmatmul.mubr.bf16.vlgmr.msra.gmra.mrb[0].mxu1 %v6814_v54  ;;  %v469_v6 = vrot.slane %v467_v58, 5  ;;  %v490_v54 = vrot.slane %v488_v39, 4  ;;  %v497_v55 = vshll.u32 %v9603_v30, 16  ;;  %v1639_v25 = vshll.u32 %v9613_v48, 16 }
  0x7a   : >> { %v1599_v5 = vrot.slane %v1598_v56, 4  ;;  %7996 = vmatpush3.bf16.msra.mxu1 %v8915_v13  ;;  %v1615_v13 = vshll.u32 %v9582_v0, 16  ;;  %v8921_v56 = vld [vmem:[%s11519_s1 + $0x18] sm:$0xff]   ;;  %v1613_v58 = vrot.slane %v1612_v43, 4  ;;  %v1632_v28 = vrot.slane %v1630_v15, 4 }
  0x7b   : >> { %7997 = vmatprep.subr.bf16.mxu1 %v8917_v57  ;;  %v470_v24 = vor.u32 %v469_v6, %v466_v59  ;;  %v499_v61 = vrot.slane %v497_v55, 5  ;;  %v1641_v39 = vrot.slane %v1639_v25, 5  ;;  %v521_v55 = vshll.u32 %v9645_v29, 16  ;;  %v8927_v25 = vld [vmem:[%s11519_s1 + $0x30] sm:$0xff]  }
  0x7c   : >> { %v1604_v23 = vsel %vm9514_vm7, %v1599_v5, %v1603_v50  ;;  %v1617_v35 = vrot.slane %v1615_v13, 5  ;;  %v8920_v50 = vld [vmem:[%s11519_s1 + $0x150] sm:$0xff]  }
  0x7d   : >> { %v6976_v26 = vcombine.low %v1594_v4, %v1604_v23  ;;  %v471_v34 = vrot.slane %v470_v24, 4  ;;  %v507_v4 = vshll.u32 %v9606_v33, 16  ;;  %v1633_v24 = vshll.u32 %v6944_v40, 16  ;;  %v9639_v13 = vld [vmem:[%s9469_s14 + $0x30] sm:$0xf] }
  0x7e   : >> { %7998 = vmatpush3.bf16.msra.mxu1 %v8917_v57  ;;  %v486_v57 = vsel %vm9514_vm7, %v481_v41, %v485_v16  ;;  %v1622_v59 = vor.u32 %v1621_v45, %v1617_v35  ;;  %v1618_v5 = vsel %vm9514_vm7, %v1613_v58, %v1617_v35  ;;  %v8922_v16 = vld [vmem:[%s11519_s1 + $0x158] sm:$0xff]   ;;  %v504_v35 = vor.u32 %v503_v17, %v499_v61 }
  0x7f   : >> { %8108 = vmatmul.mubr.bf16.vlgmr.msra.gmra.mrb[0].mxu0 %v6976_v26  ;;  %v476_v52 = vsel %vm9514_vm7, %v471_v34, %v475_v12  ;;  %7999 = vmatprep.subr.bf16.mxu1 %v8919_v10  ;;  %v9632_v12 = vld [vmem:[%s9469_s14 + $0x38] sm:$0x1]  ;;  %v509_v23 = vrot.slane %v507_v4, 5  ;;  %v1635_v38 = vrot.slane %v1633_v24, 5  ;;  %v512_v45 = vshrl.u32 %v9639_v13, 16 }
  0x80   : >> { %8124 = vmatpush3.bf16.msra.mxu0 %v9546_v14  ;;  %v493_v14 = vrot.slane %v491_v47, 5  ;;  %v6815_v60 = vcombine.low %v476_v52, %v486_v57  ;;  %v1623_v6 = vrot.slane %v1622_v59, 4  ;;  %v1649_v43 = vshll.u32 %v9632_v12, 16  ;;  %v8925_v57 = vld [vmem:[%s11519_s1 + $0x28] sm:$0xff]  }
  0x81   : >> { %8125 = vmatprep.subr.bf16.mxu0 %v8918_v11  ;;  %v505_v47 = vrot.slane %v504_v35, 4  ;;  %v1636_v52 = vor.u32 %v1635_v38, %v1632_v28 }
  0x82   : >> { %v494_v9 = vor.u32 %v493_v14, %v490_v54  ;;  %8000 = vmatpush3.bf16.msra.mxu1 %v8919_v10  ;;  %7983 = vmatprep.mubr.bf16.mxu1 %v6815_v60  ;;  %v1628_v26 = vsel %vm9514_vm7, %v1623_v6, %v1627_v53  ;;  %v1643_v10 = vshrl.u32 %v9613_v48, 16  ;;  %v9655_v53 = vld [vmem:[%s9469_s14 + $0x38] sm:$0x1]  ;;  %v515_v54 = vshll.u32 %v9639_v13, 16  ;;  %v6947_v60 = vld [vmem:[%s9469_s14 + $0x3c] sm:$0xf] }
  0x83   : >> { %8001 = vmatprep.subr.bf16.mxu1 %v8921_v56  ;;  %v6977_v34 = vcombine.low %v1618_v5, %v1628_v26  ;;  %v1651_v59 = vrot.slane %v1649_v43, 5  ;;  %v525_v14 = vshrl.u32 %v9645_v29, 16  ;;  %v1637_v63 = vrot.slane %v1636_v52, 4  ;;  %v9670_v6 = vld [vmem:[%s9469_s14 + $0x40] sm:$0xf] }
  0x84   : >> { %8126 = vmatpush3.bf16.msra.mxu0 %v8918_v11  ;;  %v495_v27 = vrot.slane %v494_v9, 4  ;;  %v8923_v11 = vld [vmem:[%s11519_s1 + $0x20] sm:$0xff]   ;;  %v1645_v41 = vrot.slane %v1643_v10, 4  ;;  %v517_v4 = vrot.slane %v515_v54, 5  ;;  %v523_v5 = vrot.slane %v521_v55, 5  ;;  %v8929_v54 = vld [vmem:[%s11519_s1 + $0x38] sm:$0xff]  }
  0x85   : >> { %8127 = vmatprep.subr.bf16.mxu0 %v8920_v50  ;;  %8111 = vmatprep.mubr.bf16.mxu0 %v6977_v34  ;;  %v527_v17 = vrot.slane %v525_v14, 4  ;;  %v531_v24 = vshll.u32 %v9655_v53, 16  ;;  %v1654_v28 = vshrl.u32 %v6947_v60, 16  ;;  %v1657_v10 = vshll.u32 %v6947_v60, 16  ;;  %v9694_v52 = vld [vmem:[%s9469_s14 + $0x44] sm:$0x1] }
  0x86   : >> { %v500_v40 = vsel %vm9514_vm7, %v495_v27, %v499_v61  ;;  %8002 = vmatpush3.bf16.msra.mxu1 %v8921_v56  ;;  %v1646_v58 = vor.u32 %v1645_v41, %v1641_v39  ;;  %v514_v56 = vrot.slane %v512_v45, 4  ;;  %v510_v61 = vsel %vm9514_vm7, %v505_v47, %v509_v23  ;;  %v9679_v27 = vld [vmem:[%s9469_s14 + $0x44] sm:$0x1]  ;;  %11554 = vst [vmem:[#allocation12_spill] sm:$0xff] %v9694_v52  ;;  %v6950_v14 = vld [vmem:[%s9469_s14 + $0x48] sm:$0xf] }
  0x87   : >> { %8003 = vmatprep.subr.bf16.mxu1 %v8923_v11  ;;  %v6816_v9 = vcombine.low %v500_v40, %v510_v61  ;;  %v1642_v23 = vsel %vm9514_vm7, %v1637_v63, %v1641_v39  ;;  %v528_v35 = vor.u32 %v527_v17, %v523_v5  ;;  %v533_v38 = vrot.slane %v531_v24, 5  ;;  %v9688_v39 = vld [vmem:[%s9469_s14 + $0x3c] sm:$0xf]  ;;  %v9691_v40 = vld [vmem:[%s9469_s14 + $0x40] sm:$0xf] }
  0x88   : >> { %8128 = vmatpush3.bf16.msra.mxu0 %v8920_v50  ;;  %v8924_v50 = vld [vmem:[%s11519_s1 + $0x160] sm:$0xff]   ;;  %v1647_v15 = vrot.slane %v1646_v58, 4  ;;  %v518_v26 = vor.u32 %v517_v4, %v514_v56  ;;  %v1656_v45 = vrot.slane %v1654_v28, 4  ;;  %v1659_v47 = vrot.slane %v1657_v10, 5  ;;  %v8928_v10 = vld [vmem:[%s11519_s1 + $0x170] sm:$0xff]  }
  0x89   : >> { %8129 = vmatprep.subr.bf16.mxu0 %v8922_v16  ;;  %7984 = vmatmul.mubr.bf16.gmra.mrb[4].mxu1 %v6816_v9  ;;  %v529_v55 = vrot.slane %v528_v35, 4  ;;  %v1673_v56 = vshll.u32 %v9679_v27, 16  ;;  %v536_v63 = vshrl.u32 %v9688_v39, 16  ;;  %v539_v4 = vshll.u32 %v9688_v39, 16  ;;  %v9707_v9 = vld [vmem:[%s9469_s14 + $0x4c] sm:$0xf] }
  0x8a   : >> { %8004 = vmatpush3.bf16.msra.mxu1 %v8923_v11  ;;  %v8926_v11 = vld [vmem:[%s11519_s1 + $0x168] sm:$0xff]   ;;  %v1652_v34 = vsel %vm9514_vm7, %v1647_v15, %v1651_v59  ;;  %v519_v43 = vrot.slane %v518_v26, 4  ;;  %v1667_v59 = vshrl.u32 %v9670_v6, 16  ;;  %v1660_v61 = vor.u32 %v1659_v47, %v1656_v45 }
  0x8b   : >> { %8005 = vmatprep.subr.bf16.mxu1 %v8925_v57  ;;  %v6978_v41 = vcombine.low %v1642_v23, %v1652_v34  ;;  %v534_v15 = vsel %vm9514_vm7, %v529_v55, %v533_v38  ;;  %v1675_v24 = vrot.slane %v1673_v56, 5  ;;  %v545_v23 = vshll.u32 %v9691_v40, 16  ;;  %v9725_v55 = vld [vmem:[%s11519_s1 + $0x80] sm:$0xff]  }
  0x8c   : >> { %8130 = vmatpush3.bf16.msra.mxu0 %v8922_v16  ;;  %v1663_v16 = vshll.u32 %v9670_v6, 16  ;;  %v524_v60 = vsel %vm9514_vm7, %v519_v43, %v523_v5  ;;  %v1669_v17 = vrot.slane %v1667_v59, 4  ;;  %v1661_v26 = vrot.slane %v1660_v61, 4  ;;  %v9720_v43 = vld [vmem:[%s9469_s14 + $0x50] sm:$0x1] }
  0x8d   : >> { %8131 = vmatprep.subr.bf16.mxu0 %v8924_v50  ;;  %8112 = vmatmul.mubr.bf16.gmra.mrb[4].mxu0 %v6978_v41  ;;  %v538_v5 = vrot.slane %v536_v63, 4  ;;  %v541_v28 = vrot.slane %v539_v4, 5  ;;  %v547_v35 = vrot.slane %v545_v23, 5  ;;  %v555_v38 = vshll.u32 %v9694_v52, 16 }
  0x8e   : >> { %v1665_v58 = vrot.slane %v1663_v16, 5  ;;  %8006 = vmatpush3.bf16.msra.mxu1 %v8925_v57  ;;  %v6817_v57 = vcombine.low %v524_v60, %v534_v15  ;;  %v549_v16 = vshrl.u32 %v9691_v40, 16  ;;  %v1678_v45 = vshrl.u32 %v6950_v14, 16  ;;  %v9733_v15 = vld [vmem:[%s9469_s14 + $0x48] sm:$0xf] }
  0x8f   : >> { %8007 = vmatprep.subr.bf16.mxu1 %v8927_v25  ;;  %v542_v41 = vor.u32 %v541_v28, %v538_v5  ;;  %v1681_v47 = vshll.u32 %v6950_v14, 16  ;;  %v1687_v60 = vshll.u32 %v9707_v9, 16  ;;  %v1691_v4 = vshrl.u32 %v9707_v9, 16 }
  0x90   : >> { %8132 = vmatpush3.bf16.msra.mxu0 %v8924_v50  ;;  %v1670_v34 = vor.u32 %v1669_v17, %v1665_v58  ;;  %7987 = vmatprep.mubr.bf16.mxu1 %v6817_v57  ;;  %v1666_v50 = vsel %vm9514_vm7, %v1661_v26, %v1665_v58  ;;  %v551_v56 = vrot.slane %v549_v16, 4  ;;  %v8930_v58 = vld [vmem:[%s11519_s1 + $0x178] sm:$0xff]   ;;  %v1680_v14 = vrot.slane %v1678_v45, 4  ;;  %v9739_v26 = vld [vmem:[%s9469_s14 + $0x4c] sm:$0xf] }
  0x91   : >> { %8133 = vmatprep.subr.bf16.mxu0 %v8926_v11  ;;  %v543_v61 = vrot.slane %v542_v41, 4  ;;  %v1683_v63 = vrot.slane %v1681_v47, 5  ;;  %v1689_v57 = vrot.slane %v1687_v60, 5  ;;  %v1693_v16 = vrot.slane %v1691_v4, 4  ;;  %v6953_v41 = vld [vmem:[%s9469_s14 + $0x54] sm:$0xf] }
  0x92   : >> { %8008 = vmatpush3.bf16.msra.mxu1 %v8927_v25  ;;  %v1671_v59 = vrot.slane %v1670_v34, 4  ;;  %v557_v25 = vrot.slane %v555_v38, 5  ;;  %v552_v23 = vor.u32 %v551_v56, %v547_v35  ;;  %v9744_v38 = vld [vmem:[%s9469_s14 + $0x50] sm:$0x1]  ;;  %v560_v47 = vshrl.u32 %v9733_v15, 16  ;;  %v9755_v60 = vld [vmem:[%s11519_s1 + $0x180] sm:$0xff]  }
  0x93   : >> { %8009 = vmatprep.subr.bf16.mxu1 %v8929_v54  ;;  %v548_v28 = vsel %vm9514_vm7, %v543_v61, %v547_v35  ;;  %v1684_v34 = vor.u32 %v1683_v63, %v1680_v14  ;;  %11555 = vst [vmem:[#allocation13_spill] sm:$0xff] %v9744_v38  ;;  %v1694_v35 = vor.u32 %v1693_v16, %v1689_v57  ;;  %v573_v56 = vshrl.u32 %v9739_v26, 16  ;;  %v9761_v4 = vld [vmem:[%s9469_s14 + $0x58] sm:$0xf]  ;;  %v9769_v16 = vld [vmem:[%s9469_s14 + $0x54] sm:$0xf] }
  0x94   : >> { %8134 = vmatpush3.bf16.msra.mxu0 %v8926_v11  ;;  %v1676_v17 = vsel %vm9514_vm7, %v1671_v59, %v1675_v24  ;;  %v1697_v11 = vshll.u32 %v9720_v43, 16  ;;  %v553_v45 = vrot.slane %v552_v23, 4  ;;  %v563_v59 = vshll.u32 %v9733_v15, 16 }
  0x95   : >> { %8135 = vmatprep.subr.bf16.mxu0 %v8928_v10  ;;  %v6979_v5 = vcombine.low %v1666_v50, %v1676_v17  ;;  %v569_v50 = vshll.u32 %v9739_v26, 16  ;;  %v579_v63 = vshll.u32 %v9744_v38, 16  ;;  %v575_v51 = vrot.slane %v573_v56, 4  ;;  %v9796_v38 = vld [vmem:[%s9469_s14 + $0x68] sm:$0x1] }
  0x96   : >> { %8010 = vmatpush3.bf16.msra.mxu1 %v8929_v54  ;;  %v1699_v24 = vrot.slane %v1697_v11, 5  ;;  %v1685_v54 = vrot.slane %v1684_v34, 4  ;;  %v558_v61 = vsel %vm9514_vm7, %v553_v45, %v557_v25  ;;  %v565_v14 = vrot.slane %v563_v59, 5  ;;  %v9766_v34 = vld [vmem:[%s9469_s14 + $0x5c] sm:$0x1] }
  0x97   : >> { %8027 = vmatprep.subr.bf16.mxu1 %v9725_v55  ;;  %8115 = vmatprep.mubr.bf16.mxu0 %v6979_v5  ;;  %v6818_v17 = vcombine.low %v548_v28, %v558_v61  ;;  %v1695_v11 = vrot.slane %v1694_v35, 4  ;;  %v571_v5 = vrot.slane %v569_v50, 5  ;;  %v581_v3 = vrot.slane %v579_v63, 5  ;;  %v9772_v45 = vld [vmem:[%s9469_s14 + $0x58] sm:$0xf] }
  0x98   : >> { %8136 = vmatpush3.bf16.msra.mxu0 %v8928_v10  ;;  %v562_v10 = vrot.slane %v560_v47, 4  ;;  %v1690_v23 = vsel %vm9514_vm7, %v1685_v54, %v1689_v57  ;;  %v1702_v25 = vshrl.u32 %v6953_v41, 16  ;;  %v1705_v57 = vshll.u32 %v6953_v41, 16  ;;  %v6956_v41 = vld [vmem:[%s9469_s14 + $0x60] sm:$0xf] }
  0x99   : >> { %8137 = vmatprep.subr.bf16.mxu0 %v8930_v58  ;;  %7988 = vmatmul.mubr.bf16.gmra.mrb[8].mxu1 %v6818_v17  ;;  %v1700_v28 = vsel %vm9514_vm7, %v1695_v11, %v1699_v24  ;;  %v1711_v47 = vshll.u32 %v9761_v4, 16  ;;  %v1715_v59 = vshrl.u32 %v9761_v4, 16  ;;  %v576_v50 = vor.u32 %v575_v51, %v571_v5 }
  0x9a   : >> { %v566_v37 = vor.u32 %v565_v14, %v562_v10  ;;  %v6980_v54 = vcombine.low %v1690_v23, %v1700_v28  ;;  %v1704_v56 = vrot.slane %v1702_v25, 4  ;;  %v1721_v24 = vshll.u32 %v9766_v34, 16  ;;  %v9781_v14 = vld [vmem:[%s9469_s14 + $0x5c] sm:$0x1] }
  0x9b   : >> { %v1713_v61 = vrot.slane %v1711_v47, 5  ;;  %v1717_v10 = vrot.slane %v1715_v59, 4  ;;  %v577_v17 = vrot.slane %v576_v50, 4  ;;  %v587_v51 = vshll.u32 %v9769_v16, 16 }
  0x9c   : >> { %8138 = vmatpush3.bf16.msra.mxu0 %v8930_v58  ;;  %v567_v35 = vrot.slane %v566_v37, 4  ;;  %v1707_v58 = vrot.slane %v1705_v57, 5  ;;  %v584_v37 = vshrl.u32 %v9769_v16, 16  ;;  %v1723_v25 = vrot.slane %v1721_v24, 5  ;;  %v9790_v57 = vld [vmem:[%s9469_s14 + $0x64] sm:$0xf] }
  0x9d   : >> { %8155 = vmatprep.subr.bf16.mxu0 %v9755_v60  ;;  %8116 = vmatmul.mubr.bf16.gmra.mrb[8].mxu0 %v6980_v54  ;;  %v1718_v11 = vor.u32 %v1717_v10, %v1713_v61  ;;  %v593_v28 = vshll.u32 %v9772_v45, 16  ;;  %v582_v47 = vsel %vm9514_vm7, %v577_v17, %v581_v3  ;;  %v589_v54 = vrot.slane %v587_v51, 5 }
  0x9e   : >> { %v572_v63 = vsel %vm9514_vm7, %v567_v35, %v571_v5  ;;  %v1708_v23 = vor.u32 %v1707_v58, %v1704_v56  ;;  %v586_v59 = vrot.slane %v584_v37, 4  ;;  %v597_v5 = vshrl.u32 %v9772_v45, 16  ;;  %v6991_v56 = vld [vmem:[%s9469_s14 + $0xc] sm:$0xe] }
  0x9f   : >> { %v6819_v35 = vcombine.low %v572_v63, %v582_v47  ;;  %v1719_v1 = vrot.slane %v1718_v11, 4  ;;  %v595_v2 = vrot.slane %v593_v28, 5  ;;  %v603_v24 = vshll.u32 %v9781_v14, 16 }
  0xa0   : >> { %v1709_v50 = vrot.slane %v1708_v23, 4  ;;  %v590_v58 = vor.u32 %v589_v54, %v586_v59  ;;  %v599_v10 = vrot.slane %v597_v5, 4  ;;  %v1726_v52 = vshrl.u32 %v6956_v41, 16 }
  0xa1   : >> { %7991 = vmatprep.mubr.bf16.mxu1 %v6819_v35  ;;  %v1724_v17 = vsel %vm9514_vm7, %v1719_v1, %v1723_v25  ;;  %v1729_v37 = vshll.u32 %v6956_v41, 16  ;;  %v1735_v63 = vshll.u32 %v9790_v57, 16  ;;  %v605_v28 = vrot.slane %v603_v24, 5  ;;  %v6992_v24 = vld [vmem:[%s9469_s14 + $0x18] sm:$0xe] }
  0xa2   : >> { %v1714_v3 = vsel %vm9514_vm7, %v1709_v50, %v1713_v61  ;;  %v591_v23 = vrot.slane %v590_v58, 4  ;;  %v600_v11 = vor.u32 %v599_v10, %v595_v2  ;;  %v1728_v47 = vrot.slane %v1726_v52, 4 }
  0xa3   : >> { %v6981_v51 = vcombine.low %v1714_v3, %v1724_v17  ;;  %v1731_v59 = vrot.slane %v1729_v37, 5  ;;  %v1737_v54 = vrot.slane %v1735_v63, 5  ;;  %v1739_v5 = vshrl.u32 %v9790_v57, 16  ;;  %v6993_v3 = vld [vmem:[%s9469_s14 + $0x24] sm:$0xe] }
  0xa4   : >> { %v596_v61 = vsel %vm9514_vm7, %v591_v23, %v595_v2  ;;  %v601_v35 = vrot.slane %v600_v11, 4  ;;  %v1745_v1 = vshll.u32 %v9796_v38, 16  ;;  %v6999_v41 = vrot.slane %v6991_v56, 9 }
  0xa5   : >> { %8119 = vmatprep.mubr.bf16.mxu0 %v6981_v51  ;;  %v1732_v25 = vor.u32 %v1731_v59, %v1728_v47  ;;  %v1741_v50 = vrot.slane %v1739_v5, 4  ;;  %v1993_v52 = vrot.slane %v9493_v31, 5  ;;  %v6829_v2 = vcombine.low %v9478_v20, %v9481_v21 }
  0xa6   : >> { %v606_v10 = vsel %vm9514_vm7, %v601_v35, %v605_v28  ;;  %v1747_v63 = vrot.slane %v1745_v1, 5  ;;  %v2007_v28 = vrot.slane %v9582_v0, 5  ;;  %v11558_v20 = vrot.slane %v9538_v8, 5  ;;  %v9861_v8 = vld [vmem:[%s9469_s14 + $0x48] sm:$0xe] }
  0xa7   : >> { %v6820_v17 = vcombine.low %v596_v61, %v606_v10  ;;  %v1733_v56 = vrot.slane %v1732_v25, 4  ;;  %v1742_v37 = vor.u32 %v1741_v50, %v1737_v54  ;;  %v1994_v51 = vsel %vm9811_vm10, %v6999_v41, %v1993_v52  ;;  %v6994_v41 = vld [vmem:[%s9469_s14 + $0x30] sm:$0xe] }
  0xa8   : >> { %v1995_v23 = vrot.slane %v1993_v52, 4  ;;  %v2002_v21 = vrot.slane %v11558_v20, 4  ;;  %v2003_v47 = vrot.slane %v9550_v18, 5  ;;  %v11559_v59 = vrot.slane %v9496_v32, 5 }
  0xa9   : >> { %7992 = vmatmul.mubr.bf16.gmra.mrb[12].mxu1 %v6820_v17  ;;  %v1738_v31 = vsel %vm9514_vm7, %v1733_v56, %v1737_v54  ;;  %v1743_v11 = vrot.slane %v1742_v37, 4  ;;  %v7000_v54 = vrot.slane %v6992_v24, 9  ;;  %v7001_v1 = vrot.slane %v6993_v3, 9  ;;  %v6995_v24 = vld [vmem:[%s9469_s14 + $0x3c] sm:$0xe]  ;;  %v8935_v17 = vld [vmem:[%s11519_s1 + $0x88] sm:$0xff]  }
  0xaa   : >> { %8011 = vmatprep.mubr.bf16.mxu1 %v6829_v2  ;;  %v1997_v5 = vsel %vm9811_vm10, %v1995_v23, %v11559_v59  ;;  %v2009_v25 = vrot.slane %v2007_v28, 4  ;;  %v2010_v50 = vrot.slane %v9587_v7, 5  ;;  %v1026_v18 = vrot.slane %v9484_v22, 5 }
  0xab   : >> { %v1748_v61 = vsel %vm9514_vm7, %v1743_v11, %v1747_v63  ;;  %v7023_v35 = vcombine.low %v1994_v51, %v1997_v5  ;;  %v1033_v32 = vrot.slane %v9530_v62, 5  ;;  %v6830_v52 = vcombine.low %v9507_v42, %v9520_v49  ;;  %v8941_v5 = vld [vmem:[%s11519_s1 + $0x98] sm:$0xff]  }
  0xac   : >> { %v6982_v0 = vcombine.low %v1738_v31, %v1748_v61  ;;  %v2004_v10 = vsel %vm9811_vm10, %v2002_v21, %v2003_v47  ;;  %v6831_v2 = vcombine.low %v9559_v36, %v9567_v46  ;;  %v11560_v3 = vmov %v11558_v20  ;;  %v9871_v31 = vld [vmem:[%s9469_s14 + $0x54] sm:$0xe] }
  0xad   : >> { %v2001_v7 = vsel %vm9811_vm10, %v7000_v54, %v11560_v3  ;;  %v7002_v42 = vrot.slane %v6994_v41, 9  ;;  %v2014_v49 = vrot.slane %v9613_v48, 5  ;;  %v2021_v56 = vrot.slane %v9670_v6, 5  ;;  %v8936_v6 = vld [vmem:[%s11519_s1 + $0x188] sm:$0xff]  }
  0xae   : >> { %8120 = vmatmul.mubr.bf16.gmra.mrb[12].mxu0 %v6982_v0  ;;  %v2008_v36 = vsel %vm9811_vm10, %v7001_v1, %v2007_v28  ;;  %v2011_v46 = vsel %vm9811_vm10, %v2009_v25, %v2010_v50  ;;  %v2017_v37 = vrot.slane %v9632_v12, 5  ;;  %v7003_v63 = vrot.slane %v6995_v24, 9  ;;  %v9874_v12 = vld [vmem:[%s9469_s14 + $0x60] sm:$0xe]  ;;  %v9901_v25 = vld [vmem:[%s9469_s14 + $0x4] sm:$0xf] }
  0xaf   : >> { %8139 = vmatprep.mubr.bf16.mxu0 %v7023_v35  ;;  %v2024_v51 = vrot.slane %v9679_v27, 5  ;;  %v2028_v23 = vrot.slane %v9707_v9, 5  ;;  %v7024_v48 = vcombine.low %v2001_v7, %v2004_v10  ;;  %v7025_v11 = vcombine.low %v2008_v36, %v2011_v46  ;;  %v8945_v24 = vld [vmem:[%s11519_s1 + $0xa0] sm:$0xff]   ;;  %v9956_v9 = vld [vmem:[%s9469_s14 + $0x18] sm:$0xe] }
  0xb0   : >> { %v2016_v28 = vrot.slane %v2014_v49, 4  ;;  %v2023_v20 = vrot.slane %v2021_v56, 4  ;;  %v6832_v27 = vcombine.low %v9596_v19, %v9603_v30  ;;  %v2015_v21 = vsel %vm9811_vm10, %v7002_v42, %v2014_v49  ;;  %v9924_v49 = vld [vmem:[%s9469_s14 + $0x10] sm:$0xf] }
  0xb1   : >> { %8012 = vmatmul.mubr.bf16.vlgmr.msra.gmra.mrb[0].mxu1 %v6830_v52  ;;  %v6833_v47 = vcombine.low %v9639_v13, %v9645_v29  ;;  %v7004_v59 = vrot.slane %v9861_v8, 9  ;;  %v2030_v19 = vrot.slane %v2028_v23, 4  ;;  %v2031_v61 = vrot.slane %v9720_v43, 5  ;;  %v8940_v13 = vld [vmem:[%s11519_s1 + $0x190] sm:$0xff]   ;;  %v994_v52 = vld [vmem:[%s9469_s14] sm:$0xe] }
  0xb2   : >> { %8028 = vmatpush3.bf16.msra.mxu1 %v9725_v55  ;;  %8015 = vmatprep.mubr.bf16.mxu1 %v6831_v2  ;;  %v8939_v55 = vld [vmem:[%s11519_s1 + $0x90] sm:$0xff]   ;;  %v7005_v35 = vrot.slane %v9871_v31, 9  ;;  %v2035_v54 = vrot.slane %v9761_v4, 5  ;;  %v2038_v1 = vrot.slane %v9766_v34, 5  ;;  %v7006_v41 = vrot.slane %v9874_v12, 9 }
  0xb3   : >> { %8029 = vmatprep.subr.bf16.mxu1 %v8935_v17  ;;  %v2042_v0 = vrot.slane %v9790_v57, 5  ;;  %v1023_v43 = vrot.slane %v9901_v25, 5  ;;  %v2018_v4 = vsel %vm9811_vm10, %v2016_v28, %v2017_v37  ;;  %v2022_v50 = vsel %vm9811_vm10, %v7003_v63, %v2021_v56  ;;  %v997_v8 = vld [vmem:[%s9469_s14 + $0x24] sm:$0xe]  ;;  %v999_v25 = vld [vmem:[%s9469_s14 + $0x3c] sm:$0xe] }
  0xb4   : >> { %v2025_v34 = vsel %vm9811_vm10, %v2023_v20, %v2024_v51  ;;  %v7026_v10 = vcombine.low %v2015_v21, %v2018_v4  ;;  %v2037_v3 = vrot.slane %v2035_v54, 4  ;;  %v2045_v7 = vrot.slane %v9796_v38, 5  ;;  %v8947_v51 = vld [vmem:[%s11519_s1 + $0xa8] sm:$0xff]   ;;  %v8997_v4 = vld [vmem:[%s9469_s14 + $0x1c] sm:$0xf]  ;;  %v8952_v38 = vld [vmem:[%s11519_s1 + $0x1b0] sm:$0xff]  }
  0xb5   : >> { %v7027_v2 = vcombine.low %v2022_v50, %v2025_v34  ;;  %v6845_v42 = vrot.slane %v994_v52, 9  ;;  %v1030_v56 = vrot.slane %v9924_v49, 5  ;;  %v1044_v36 = vrot.slane %v9603_v30, 5  ;;  %v1001_v49 = vld [vmem:[%s9469_s14 + $0x54] sm:$0xe] }
  0xb6   : >> { %8140 = vmatmul.mubr.bf16.vlgmr.msra.gmra.mrb[0].mxu0 %v7024_v48  ;;  %8030 = vmatpush3.bf16.msra.mxu1 %v8935_v17  ;;  %v9921_v17 = vrot.slane %v2042_v0, 4  ;;  %v1025_v46 = vrot.slane %v1023_v43, 4  ;;  %v1047_v37 = vrot.slane %v9606_v33, 5  ;;  %v6834_v63 = vcombine.low %v9688_v39, %v9691_v40 }
  0xb7   : >> { %8156 = vmatpush3.bf16.msra.mxu0 %v9755_v60  ;;  %8143 = vmatprep.mubr.bf16.mxu0 %v7025_v11  ;;  %v8942_v60 = vld [vmem:[%s11519_s1 + $0x198] sm:$0xff]   ;;  %v6835_v48 = vcombine.low %v9733_v15, %v9739_v26  ;;  %v6848_v30 = vrot.slane %v997_v8, 9  ;;  %v1046_v31 = vrot.slane %v1044_v36, 4  ;;  %v2029_v33 = vsel %vm9811_vm10, %v7004_v59, %v2028_v23  ;;  %v8946_v11 = vld [vmem:[%s11519_s1 + $0x1a0] sm:$0xff]  }
  0xb8   : >> { %8157 = vmatprep.subr.bf16.mxu0 %v8936_v6  ;;  %8031 = vmatprep.subr.bf16.mxu1 %v8939_v55  ;;  %v2032_v39 = vsel %vm9811_vm10, %v2030_v19, %v2031_v61  ;;  %v2036_v15 = vsel %vm9811_vm10, %v7005_v35, %v2035_v54  ;;  %v2039_v28 = vsel %vm9811_vm10, %v2037_v3, %v2038_v1  ;;  %v1051_v21 = vrot.slane %v9645_v29, 5  ;;  %v998_v19 = vld [vmem:[%s9469_s14 + $0x30] sm:$0xe]  ;;  %v8948_v35 = vld [vmem:[%s11519_s1 + $0x1a8] sm:$0xff]  }
  0xb9   : >> { %8016 = vmatmul.mubr.bf16.gmra.mrb[4].mxu1 %v6832_v27  ;;  %v9960_v23 = vsel %vm9811_vm10, %v6848_v30, %v1044_v36  ;;  %v9964_v20 = vsel %vm9811_vm10, %v1046_v31, %v1047_v37  ;;  %v6836_v59 = vcombine.low %v9769_v16, %v9772_v45  ;;  %v1054_v61 = vrot.slane %v9655_v53, 5  ;;  %v8951_v53 = vld [vmem:[%s11519_s1 + $0xb0] sm:$0xff]   ;;  %v11562_v37 = vld [vmem:[#allocation13_spill] sm:$0xff] }
  0xba   : >> { %8032 = vmatpush3.bf16.msra.mxu1 %v8939_v55  ;;  %8019 = vmatprep.mubr.bf16.mxu1 %v6833_v47  ;;  %v6872_v55 = vcombine.low %v9960_v23, %v9964_v20  ;;  %v7028_v47 = vcombine.low %v2029_v33, %v2032_v39  ;;  %v7029_v29 = vcombine.low %v2036_v15, %v2039_v28  ;;  %v6849_v16 = vrot.slane %v998_v19, 9  ;;  %v8954_v30 = vld [vmem:[%s11519_s1 + $0x1b8] sm:$0xff]   ;;  %v8967_v23 = vld [vmem:[%s9469_s14 + $0x48] sm:$0xff]   ;;  %v8968_v20 = vld [vmem:[%s11519_s1 + $0xe0] sm:$0xff]  }
  0xbb   : >> { %8158 = vmatpush3.bf16.msra.mxu0 %v8936_v6  ;;  %8033 = vmatprep.subr.bf16.mxu1 %v8941_v5  ;;  %v9940_v6 = vld [vmem:[%s9469_s14 + $0xc] sm:$0xe]  ;;  %v1024_v54 = vsel %vm9811_vm10, %v6845_v42, %v1023_v43  ;;  %v1027_v1 = vsel %vm9811_vm10, %v1025_v46, %v1026_v18  ;;  %v1037_v50 = vrot.slane %v8997_v4, 5  ;;  %v1058_v34 = vrot.slane %v9691_v40, 5  ;;  %v11561_v43 = vld [vmem:[#allocation12_spill] sm:$0xff]  ;;  %v8953_v18 = vld [vmem:[%s11519_s1 + $0xb8] sm:$0xff]  }
  0xbc   : >> { %8159 = vmatprep.subr.bf16.mxu0 %v8940_v13  ;;  %v6846_v27 = vrot.slane %v9940_v6, 9  ;;  %v1061_v52 = vrot.slane %v11561_v43, 5  ;;  %v2043_v40 = vsel %vm9811_vm10, %v7006_v41, %v2042_v0  ;;  %v2046_v57 = vsel %vm9811_vm10, %v9921_v17, %v2045_v7  ;;  %v1000_v17 = vld [vmem:[%s9469_s14 + $0x48] sm:$0xe] }
  0xbd   : >> { %v1060_v36 = vrot.slane %v1058_v34, 4  ;;  %v6869_v12 = vcombine.low %v1024_v54, %v1027_v1  ;;  %v1039_v0 = vrot.slane %v1037_v50, 4  ;;  %v1065_v8 = vrot.slane %v9739_v26, 5  ;;  %v10091_v1 = vld [vmem:[%s9469_s14 + $0x20] sm:$0x1] }
  0xbe   : >> { %8144 = vmatmul.mubr.bf16.gmra.mrb[4].mxu0 %v7026_v10  ;;  %8034 = vmatpush3.bf16.msra.mxu1 %v8941_v5  ;;  %v1032_v5 = vrot.slane %v1030_v56, 4  ;;  %v6847_v10 = vrot.slane %v9956_v9, 9  ;;  %v1031_v26 = vsel %vm9811_vm10, %v6846_v27, %v1030_v56  ;;  %v1072_v39 = vrot.slane %v9772_v45, 5  ;;  %v8956_v45 = vld [vmem:[%s11519_s1 + $0xc0] sm:$0xff]  }
  0xbf   : >> { %8160 = vmatpush3.bf16.msra.mxu0 %v8940_v13  ;;  %8147 = vmatprep.mubr.bf16.mxu0 %v7027_v2  ;;  %v1053_v13 = vrot.slane %v1051_v21, 4  ;;  %v6850_v2 = vrot.slane %v999_v25, 9  ;;  %v10026_v46 = vsel %vm9811_vm10, %v1060_v36, %v1061_v52  ;;  %v1067_v6 = vrot.slane %v1065_v8, 4  ;;  %v8960_v25 = vld [vmem:[%s11519_s1 + $0x1c8] sm:$0xff]  }
  0xc0   : >> { %8161 = vmatprep.subr.bf16.mxu0 %v8942_v60  ;;  %8035 = vmatprep.subr.bf16.mxu1 %v8945_v24  ;;  %v1034_v31 = vsel %vm9811_vm10, %v1032_v5, %v1033_v32  ;;  %v1038_v33 = vsel %vm9811_vm10, %v6847_v10, %v1037_v50  ;;  %v1075_v56 = vrot.slane %v9781_v14, 5  ;;  %v6852_v28 = vrot.slane %v1001_v49, 9  ;;  %v8959_v5 = vld [vmem:[%s11519_s1 + $0xc8] sm:$0xff]   ;;  %v7092_v10 = vld [vmem:[%s9469_s14 + $0x24] sm:$0xf] }
  0xc1   : >> { %8020 = vmatmul.mubr.bf16.gmra.mrb[8].mxu1 %v6834_v63  ;;  %v10001_v22 = vsel %vm9811_vm10, %v1053_v13, %v1054_v61  ;;  %v10022_v41 = vsel %vm9811_vm10, %v6850_v2, %v1058_v34  ;;  %v1068_v63 = vrot.slane %v11562_v37, 5  ;;  %v1074_v9 = vrot.slane %v1072_v39, 4  ;;  %v8958_v61 = vld [vmem:[%s11519_s1 + $0x1c0] sm:$0xff]   ;;  %v8962_v34 = vld [vmem:[%s11519_s1 + $0xd0] sm:$0xff]   ;;  %v10112_v36 = vld [vmem:[%s9469_s14 + $0x28] sm:$0xf] }
  0xc2   : >> { %8036 = vmatpush3.bf16.msra.mxu1 %v8945_v24  ;;  %8023 = vmatprep.mubr.bf16.mxu1 %v6835_v48  ;;  %v8998_v24 = vld [vmem:[%s9469_s14 + $0x20] sm:$0x1]  ;;  %v6874_v7 = vcombine.low %v10022_v41, %v10026_v46  ;;  %v6851_v48 = vrot.slane %v1000_v17, 9  ;;  %v6870_v27 = vcombine.low %v1031_v26, %v1034_v31  ;;  %v8957_v13 = vld [vmem:[%s9469_s14 + $0x24] sm:$0xff]   ;;  %v8964_v2 = vld [vmem:[%s11519_s1 + $0x1d0] sm:$0xff]  }
  0xc3   : >> { %8162 = vmatpush3.bf16.msra.mxu0 %v8942_v60  ;;  %8037 = vmatprep.subr.bf16.mxu1 %v8947_v51  ;;  %v9997_v60 = vsel %vm9811_vm10, %v6849_v16, %v1051_v21  ;;  %v1040_v3 = vrot.slane %v8998_v24, 5  ;;  %v10061_v32 = vsel %vm9811_vm10, %v1067_v6, %v1068_v63  ;;  %v10070_v21 = vsel %vm9811_vm10, %v6852_v28, %v1072_v39  ;;  %v8963_v17 = vld [vmem:[%s9469_s14 + $0x3c] sm:$0xff]   ;;  %v10131_v26 = vld [vmem:[%s9469_s14 + $0x34] sm:$0xf]  ;;  %v10154_v28 = vld [vmem:[%s9469_s14 + $0x38] sm:$0x1] }
  0xc4   : >> { %8163 = vmatprep.subr.bf16.mxu0 %v8946_v11  ;;  %v6873_v42 = vcombine.low %v9997_v60, %v10001_v22  ;;  %v10057_v62 = vsel %vm9811_vm10, %v6851_v48, %v1065_v8  ;;  %v8966_v37 = vld [vmem:[%s11519_s1 + $0x1d8] sm:$0xff]   ;;  %v2561_v63 = vshll.u32 %v10112_v36, 16  ;;  %v2585_v49 = vshll.u32 %v10131_v26, 16 }
  0xc5   : >> { %v1041_v15 = vsel %vm9811_vm10, %v1039_v0, %v1040_v3  ;;  %v6875_v14 = vcombine.low %v10057_v62, %v10061_v32  ;;  %v2555_v0 = vshll.u32 %v7092_v10, 16  ;;  %v2589_v39 = vshrl.u32 %v10131_v26, 16  ;;  %v8972_v62 = vld [vmem:[%s11519_s1 + $0x1e8] sm:$0xff]   ;;  %v8974_v32 = vld [vmem:[%s11519_s1 + $0xf0] sm:$0xff]  }
  0xc6   : >> { %8148 = vmatmul.mubr.bf16.gmra.mrb[8].mxu0 %v7028_v47  ;;  %8038 = vmatpush3.bf16.msra.mxu1 %v8947_v51  ;;  %v7030_v51 = vcombine.low %v2043_v40, %v2046_v57  ;;  %v6871_v47 = vcombine.low %v1038_v33, %v1041_v15  ;;  %v8965_v40 = vld [vmem:[%s11519_s1 + $0xd8] sm:$0xff]   ;;  %v10115_v57 = vld [vmem:[%s9469_s14 + $0x2c] sm:$0x1] }
  0xc7   : >> { %8164 = vmatpush3.bf16.msra.mxu0 %v8946_v11  ;;  %8151 = vmatprep.mubr.bf16.mxu0 %v7029_v29  ;;  %v8955_v11 = vld [vmem:[%s9469_s14 + $0x18] sm:$0xff]   ;;  %v2571_v6 = vshll.u32 %v10115_v57, 16 }
  0xc8   : >> { %8165 = vmatprep.subr.bf16.mxu0 %v8948_v35  ;;  %8039 = vmatprep.subr.bf16.mxu1 %v8951_v53  ;;  %v10086_v29 = vld [vmem:[%s9469_s14 + $0x1c] sm:$0xf] }
  0xc9   : >> { %8024 = vmatmul.mubr.bf16.gmra.mrb[12].mxu1 %v6836_v59  ;;  %v10074_v59 = vsel %vm9811_vm10, %v1074_v9, %v1075_v56  ;;  %v2537_v4 = vshll.u32 %v10086_v29, 16  ;;  %v2541_v50 = vshrl.u32 %v10086_v29, 16  ;;  %v8970_v56 = vld [vmem:[%s11519_s1 + $0x1e0] sm:$0xff]  }
  0xca   : >> { %8040 = vmatpush3.bf16.msra.mxu1 %v8951_v53  ;;  %8043 = vmatprep.mubr.bf16.mxu1 %v6869_v12  ;;  %v6876_v19 = vcombine.low %v10070_v21, %v10074_v59  ;;  %v8961_v53 = vld [vmem:[%s9469_s14 + $0x30] sm:$0xff]   ;;  %v2552_v12 = vshrl.u32 %v7092_v10, 16  ;;  %v10198_v10 = vrot.slane %v2571_v6, 5 }
  0xcb   : >> { %8166 = vmatpush3.bf16.msra.mxu0 %v8948_v35  ;;  %8041 = vmatprep.subr.bf16.mxu1 %v8953_v18  ;;  %v7089_v35 = vld [vmem:[%s9469_s14 + $0x18] sm:$0xf]  ;;  %v10109_v24 = vrot.slane %v2537_v4, 5  ;;  %v2543_v3 = vrot.slane %v2541_v50, 4 }
  0xcc   : >> { %8167 = vmatprep.subr.bf16.mxu0 %v8952_v38  ;;  %v2528_v54 = vshrl.u32 %v7089_v35, 16  ;;  %v2531_v16 = vshll.u32 %v7089_v35, 16  ;;  %v2554_v22 = vrot.slane %v2552_v12, 4  ;;  %v8973_v35 = vld [vmem:[%s9469_s14 + $0x60] sm:$0xff]   ;;  %v8977_v12 = vld [vmem:[%s11519_s1 + $0xf8] sm:$0xff]  }
  0xce   : >> { %8152 = vmatmul.mubr.bf16.gmra.mrb[12].mxu0 %v7030_v51  ;;  %8042 = vmatpush3.bf16.msra.mxu1 %v8953_v18  ;;  %v2530_v43 = vrot.slane %v2528_v54, 4  ;;  %v2533_v52 = vrot.slane %v2531_v16, 5  ;;  %v2547_v18 = vshll.u32 %v10091_v1, 16  ;;  %v2565_v51 = vshrl.u32 %v10112_v36, 16 }
  0xcf   : >> { %8168 = vmatpush3.bf16.msra.mxu0 %v8952_v38  ;;  %8171 = vmatprep.mubr.bf16.mxu0 %v8955_v11  ;;  %v7095_v38 = vld [vmem:[%s9469_s14 + $0x30] sm:$0xf]  ;;  %v10151_v11 = vrot.slane %v2561_v63, 5  ;;  %v10169_v16 = vrot.slane %v2585_v49, 5  ;;  %v10216_v63 = vld [vmem:[%s9469_s14 + $0x44] sm:$0x1] }
  0xd0   : >> { %8169 = vmatprep.subr.bf16.mxu0 %v8954_v30  ;;  %8059 = vmatprep.subr.bf16.mxu1 %v8956_v45  ;;  %v2534_v8 = vor.u32 %v2533_v52, %v2530_v43  ;;  %v2576_v48 = vshrl.u32 %v7095_v38, 16  ;;  %v10138_v60 = vrot.slane %v2547_v18, 5  ;;  %v2579_v33 = vshll.u32 %v7095_v38, 16 }
  0xd1   : >> { %8044 = vmatmul.mubr.bf16.vlgmr.msra.gmra.mrb[0].mxu1 %v6870_v27  ;;  %v2567_v15 = vrot.slane %v2565_v51, 4  ;;  %v7098_v27 = vld [vmem:[%s9469_s14 + $0x3c] sm:$0xf] }
  0xd2   : >> { %8060 = vmatpush3.bf16.msra.mxu1 %v8956_v45  ;;  %8047 = vmatprep.mubr.bf16.mxu1 %v6871_v47  ;;  %v10144_v31 = vrot.slane %v2534_v8, 4  ;;  %v10158_v9 = vrot.slane %v2576_v48, 4  ;;  %v2581_v54 = vrot.slane %v2579_v33, 5  ;;  %v2600_v50 = vshrl.u32 %v7098_v27, 16  ;;  %v8975_v48 = vld [vmem:[%s9469_s14 + $0x6c] sm:$0xff]  }
  0xd3   : >> { %8170 = vmatpush3.bf16.msra.mxu0 %v8954_v30  ;;  %8061 = vmatprep.subr.bf16.mxu1 %v8959_v5  ;;  %v8971_v30 = vld [vmem:[%s11519_s1 + $0xe8] sm:$0xff]   ;;  %v2568_v4 = vor.u32 %v2567_v15, %v10151_v11  ;;  %v2603_v41 = vshll.u32 %v7098_v27, 16 }
  0xd4   : >> { %8187 = vmatprep.subr.bf16.mxu0 %v8958_v61  ;;  %v2582_v38 = vor.u32 %v2581_v54, %v10158_v9  ;;  %v2602_v51 = vrot.slane %v2600_v50, 4  ;;  %v8980_v9 = vld [vmem:[%s9469_s14 + $0x18] sm:$0xff]   ;;  %v10254_v50 = vld [vmem:[%s9469_s14 + $0x64] sm:$0xf] }
  0xd5   : >> { %v10209_v8 = vrot.slane %v2568_v4, 4  ;;  %v7107_v4 = vld [vmem:[%s9469_s14 + $0x60] sm:$0xf] }
  0xd6   : >> { %8172 = vmatmul.mubr.bf16.vlgmr.msra.gmra.mrb[0].mxu0 %v8957_v13  ;;  %8062 = vmatpush3.bf16.msra.mxu1 %v8959_v5  ;;  %v10162_v5 = vld [vmem:[%s9469_s14 + $0x40] sm:$0xf]  ;;  %v2591_v13 = vrot.slane %v2589_v39, 4  ;;  %v2583_v49 = vrot.slane %v2582_v38, 4  ;;  %v2619_v39 = vshll.u32 %v10216_v63, 16 }
  0xd7   : >> { %8188 = vmatpush3.bf16.msra.mxu0 %v8958_v61  ;;  %8175 = vmatprep.mubr.bf16.mxu0 %v8961_v53  ;;  %v8969_v61 = vld [vmem:[%s9469_s14 + $0x54] sm:$0xff]   ;;  %v2595_v53 = vshll.u32 %v10154_v28, 16  ;;  %v2609_v46 = vshll.u32 %v10162_v5, 16  ;;  %v10282_v38 = vld [vmem:[%s9469_s14 + $0x5c] sm:$0x1] }
  0xd8   : >> { %8189 = vmatprep.subr.bf16.mxu0 %v8960_v25  ;;  %8063 = vmatprep.subr.bf16.mxu1 %v8962_v34 }
  0xd9   : >> { %8048 = vmatmul.mubr.bf16.gmra.mrb[4].mxu1 %v6872_v55  ;;  %v2544_v55 = vor.u32 %v2543_v3, %v10109_v24 }
  0xda   : >> { %8064 = vmatpush3.bf16.msra.mxu1 %v8962_v34  ;;  %8051 = vmatprep.mubr.bf16.mxu1 %v6873_v42  ;;  %v2557_v42 = vrot.slane %v2555_v0, 5  ;;  %v10180_v34 = vld [vmem:[%s9469_s14 + $0x4c] sm:$0xf] }
  0xdb   : >> { %8190 = vmatpush3.bf16.msra.mxu0 %v8960_v25  ;;  %8065 = vmatprep.subr.bf16.mxu1 %v8965_v40  ;;  %v10156_v45 = vrot.slane %v2544_v55, 4  ;;  %v7101_v25 = vld [vmem:[%s9469_s14 + $0x48] sm:$0xf]  ;;  %v2633_v18 = vshll.u32 %v10180_v34, 16  ;;  %v2637_v3 = vshrl.u32 %v10180_v34, 16  ;;  %v8979_v0 = vld [vmem:[%s9469_s14 + $0xc] sm:$0xff]  }
  0xdc   : >> { %8191 = vmatprep.subr.bf16.mxu0 %v8964_v2  ;;  %v2558_v47 = vor.u32 %v2557_v42, %v2554_v22 }
  0xdd   : >> { %v2550_v43 = vsel %vm9514_vm7, %v10156_v45, %v10138_v60  ;;  %v10222_v60 = vld [vmem:[%s9469_s14 + $0x50] sm:$0x1]  ;;  %v10227_v6 = vrot.slane %v2633_v18, 5  ;;  %v10237_v45 = vld [vmem:[%s9469_s14 + $0x58] sm:$0xf] }
  0xde   : >> { %8176 = vmatmul.mubr.bf16.gmra.mrb[4].mxu0 %v8963_v17  ;;  %8066 = vmatpush3.bf16.msra.mxu1 %v8965_v40  ;;  %v10196_v52 = vrot.slane %v2558_v47, 4  ;;  %v2627_v40 = vshll.u32 %v7101_v25, 16  ;;  %v2592_v17 = vor.u32 %v2591_v13, %v10169_v16  ;;  %v2643_v15 = vshll.u32 %v10222_v60, 16 }
  0xdf   : >> { %8192 = vmatpush3.bf16.msra.mxu0 %v8964_v2  ;;  %8179 = vmatprep.mubr.bf16.mxu0 %v8967_v23  ;;  %v2624_v2 = vshrl.u32 %v7101_v25, 16  ;;  %v2605_v23 = vrot.slane %v2603_v41, 5  ;;  %v2574_v47 = vsel %vm9514_vm7, %v10209_v8, %v10198_v10  ;;  %v2588_v41 = vsel %vm9514_vm7, %v2583_v49, %v10169_v16  ;;  %v10279_v8 = vld [vmem:[%s11519_s1 + $0x210] sm:$0xff]  }
  0xe0   : >> { %8193 = vmatprep.subr.bf16.mxu0 %v8966_v37  ;;  %8067 = vmatprep.subr.bf16.mxu1 %v8968_v20  ;;  %v2629_v42 = vrot.slane %v2627_v40, 5  ;;  %v2593_v21 = vrot.slane %v2592_v17, 4  ;;  %v2564_v27 = vsel %vm9514_vm7, %v10196_v52, %v10151_v11  ;;  %v8983_v11 = vld [vmem:[%s9469_s14 + $0x24] sm:$0xff]   ;;  %v2661_v25 = vshrl.u32 %v10237_v45, 16 }
  0xe1   : >> { %8052 = vmatmul.mubr.bf16.gmra.mrb[8].mxu1 %v6874_v7  ;;  %v2613_v7 = vshrl.u32 %v10162_v5, 16  ;;  %v2626_v22 = vrot.slane %v2624_v2, 4  ;;  %v2606_v59 = vor.u32 %v2605_v23, %v2602_v51  ;;  %v10272_v16 = vrot.slane %v2643_v15, 5  ;;  %v7110_v23 = vld [vmem:[%s9469_s14 + $0x6c] sm:$0xf] }
  0xe2   : >> { %8068 = vmatpush3.bf16.msra.mxu1 %v8968_v20  ;;  %8055 = vmatprep.mubr.bf16.mxu1 %v6875_v14  ;;  %v2540_v14 = vsel %vm9514_vm7, %v10144_v31, %v10109_v24  ;;  %v8976_v24 = vld [vmem:[%s11519_s1 + $0x1f0] sm:$0xff]   ;;  %v10218_v20 = vrot.slane %v2609_v46, 5  ;;  %v8978_v31 = vld [vmem:[%s11519_s1 + $0x1f8] sm:$0xff]   ;;  %v10260_v46 = vrot.slane %v2619_v39, 5  ;;  %v2672_v52 = vshrl.u32 %v7107_v4, 16 }
  0xe3   : >> { %8194 = vmatpush3.bf16.msra.mxu0 %v8966_v37  ;;  %8069 = vmatprep.subr.bf16.mxu1 %v8971_v30  ;;  %v10213_v37 = vrot.slane %v2595_v53, 5  ;;  %v2615_v55 = vrot.slane %v2613_v7, 4  ;;  %v7129_v33 = vcombine.low %v2540_v14, %v2550_v43  ;;  %v2657_v7 = vshll.u32 %v10237_v45, 16 }
  0xe4   : >> { %8195 = vmatprep.subr.bf16.mxu0 %v8970_v56  ;;  %v2607_v14 = vrot.slane %v2606_v59, 4  ;;  %v2675_v10 = vshll.u32 %v7107_v4, 16  ;;  %v2681_v2 = vshll.u32 %v10254_v50, 16  ;;  %v2685_v40 = vshrl.u32 %v10254_v50, 16 }
  0xe5   : >> { %v10284_v17 = vrot.slane %v2657_v7, 5  ;;  %v2696_v59 = vshrl.u32 %v7110_v23, 16 }
  0xe6   : >> { %8180 = vmatmul.mubr.bf16.gmra.mrb[8].mxu0 %v8969_v61  ;;  %8070 = vmatpush3.bf16.msra.mxu1 %v8971_v30  ;;  %v2639_v30 = vrot.slane %v2637_v3, 4  ;;  %v8981_v61 = vld [vmem:[%s11519_s1 + $0x200] sm:$0xff]   ;;  %v2612_v49 = vsel %vm9514_vm7, %v2607_v14, %v10218_v20 }
  0xe7   : >> { %8196 = vmatpush3.bf16.msra.mxu0 %v8970_v56  ;;  %8183 = vmatprep.mubr.bf16.mxu0 %v8973_v35  ;;  %v7104_v56 = vld [vmem:[%s9469_s14 + $0x54] sm:$0xf]  ;;  %v2630_v35 = vor.u32 %v2629_v42, %v2626_v22  ;;  %v2677_v22 = vrot.slane %v2675_v10, 5  ;;  %v10291_v42 = vrot.slane %v2681_v2, 5 }
  0xe8   : >> { %8197 = vmatprep.subr.bf16.mxu0 %v8972_v62  ;;  %8071 = vmatprep.subr.bf16.mxu1 %v8974_v32  ;;  %v2640_v54 = vor.u32 %v2639_v30, %v10227_v6  ;;  %v2648_v13 = vshrl.u32 %v7104_v56, 16  ;;  %v2651_v53 = vshll.u32 %v7104_v56, 16  ;;  %v2687_v30 = vrot.slane %v2685_v40, 4  ;;  %v10301_v56 = vld [vmem:[%s9469_s14 + $0x68] sm:$0x1] }
  0xe9   : >> { %8056 = vmatmul.mubr.bf16.gmra.mrb[12].mxu1 %v6876_v19  ;;  %v2616_v19 = vor.u32 %v2615_v55, %v10218_v20  ;;  %v2631_v18 = vrot.slane %v2630_v35, 4  ;;  %v10289_v55 = vld [vmem:[%s9469_s14 + $0x70] sm:$0xf]  ;;  %v10310_v20 = vld [vmem:[%s11519_s1 + $0x218] sm:$0xff]   ;;  %v2667_v35 = vshll.u32 %v10282_v38, 16 }
  0xea   : >> { %8072 = vmatpush3.bf16.msra.mxu1 %v8974_v32  ;;  %8075 = vmatprep.mubr.bf16.mxu1 %v8979_v0  ;;  %v2598_v32 = vsel %vm9514_vm7, %v2593_v21, %v10213_v37  ;;  %v2641_v3 = vrot.slane %v2640_v54, 4  ;;  %v7130_v0 = vcombine.low %v2564_v27, %v2574_v47  ;;  %v2663_v37 = vrot.slane %v2661_v25, 4  ;;  %v8987_v21 = vld [vmem:[%s9469_s14 + $0x3c] sm:$0xff]   ;;  %v7149_v40 = vld [vmem:[%s9469_s14 + $0x48] sm:$0xe] }
  0xeb   : >> { %8198 = vmatpush3.bf16.msra.mxu0 %v8972_v62  ;;  %8073 = vmatprep.subr.bf16.mxu1 %v8977_v12  ;;  %v10267_v62 = vld [vmem:[%s11519_s1 + $0x208] sm:$0xff]   ;;  %v2617_v43 = vrot.slane %v2616_v19, 4  ;;  %v7131_v51 = vcombine.low %v2588_v41, %v2598_v32  ;;  %v2699_v19 = vshll.u32 %v7110_v23, 16  ;;  %v2705_v15 = vshll.u32 %v10289_v55, 16 }
  0xec   : >> { %8199 = vmatprep.subr.bf16.mxu0 %v8976_v24  ;;  %v2636_v27 = vsel %vm9514_vm7, %v2631_v18, %v10227_v6  ;;  %v2664_v47 = vor.u32 %v2663_v37, %v10284_v17  ;;  %v2669_v14 = vrot.slane %v2667_v35, 5  ;;  %v8988_v18 = vld [vmem:[%s9469_s14 + $0x48] sm:$0xff]  }
  0xed   : >> { %v2701_v41 = vrot.slane %v2699_v19, 5  ;;  %v8990_v23 = vld [vmem:[%s11519_s1 + $0x228] sm:$0xff]  }
  0xee   : >> { %8184 = vmatmul.mubr.bf16.gmra.mrb[12].mxu0 %v8975_v48  ;;  %8074 = vmatpush3.bf16.msra.mxu1 %v8977_v12  ;;  %v2653_v12 = vrot.slane %v2651_v53, 5  ;;  %v2674_v48 = vrot.slane %v2672_v52, 4  ;;  %v2691_v53 = vshll.u32 %v10301_v56, 16  ;;  %v2665_v32 = vrot.slane %v2664_v47, 4  ;;  %v8989_v52 = vld [vmem:[%s11519_s1 + $0x220] sm:$0xff]  }
  0xef   : >> { %8200 = vmatpush3.bf16.msra.mxu0 %v8976_v24  ;;  %8203 = vmatprep.mubr.bf16.mxu0 %v7129_v33  ;;  %v2650_v24 = vrot.slane %v2648_v13, 4  ;;  %v8984_v33 = vld [vmem:[%s9469_s14 + $0x30] sm:$0xff]   ;;  %v2688_v13 = vor.u32 %v2687_v30, %v10291_v42  ;;  %v7151_v47 = vld [vmem:[%s9469_s14 + $0x60] sm:$0xe] }
  0xf0   : >> { %8201 = vmatprep.subr.bf16.mxu0 %v8978_v31  ;;  %8539 = vmatprep.subr.bf16.mxu1 %v8981_v61  ;;  %v2678_v54 = vor.u32 %v2677_v22, %v2674_v48  ;;  %v7157_v48 = vrot.slane %v7149_v40, 9 }
  0xf1   : >> { %8076 = vmatmul.mubr.bf16.vlgmr.msra.gmra.mrb[0].mxu1 %v8980_v9  ;;  %v2654_v39 = vor.u32 %v2653_v12, %v2650_v24  ;;  %v2709_v9 = vshrl.u32 %v10289_v55, 16  ;;  %v2689_v2 = vrot.slane %v2688_v13, 4  ;;  %v8991_v24 = vld [vmem:[%s9469_s14 + $0x54] sm:$0xff]  }
  0xf2   : >> { %8547 = vmatpush3.bf16.msra.mxu1 %v8981_v61  ;;  %8079 = vmatprep.mubr.bf16.mxu1 %v8983_v11  ;;  %v2698_v11 = vrot.slane %v2696_v59, 4  ;;  %v2679_v10 = vrot.slane %v2678_v54, 4 }
  0xf3   : >> { %8202 = vmatpush3.bf16.msra.mxu0 %v8978_v31  ;;  %8540 = vmatprep.subr.bf16.mxu1 %v10267_v62  ;;  %v2622_v31 = vsel %vm9514_vm7, %v2617_v43, %v10260_v46  ;;  %v2655_v4 = vrot.slane %v2654_v39, 4  ;;  %v10325_v46 = vrot.slane %v2705_v15, 5  ;;  %v2711_v7 = vrot.slane %v2709_v9, 4  ;;  %v10330_v43 = vld [vmem:[%s9469_s14 + $0x74] sm:$0x1] }
  0xf4   : >> { %8219 = vmatprep.subr.bf16.mxu0 %v8981_v61  ;;  %v7132_v6 = vcombine.low %v2612_v49, %v2622_v31  ;;  %v2702_v12 = vor.u32 %v2701_v41, %v2698_v11  ;;  %v2715_v37 = vshll.u32 %v10330_v43, 16  ;;  %v2684_v30 = vsel %vm9514_vm7, %v2679_v10, %v10291_v42  ;;  %v8994_v11 = vld [vmem:[%s11519_s1 + $0x238] sm:$0xff]  }
  0xf5   : >> { %v2966_v39 = vrot.slane %v10091_v1, 5  ;;  %v7150_v1 = vld [vmem:[%s9469_s14 + $0x54] sm:$0xe]  ;;  %v3005_v9 = vrot.slane %v10254_v50, 5  ;;  %v2970_v41 = vrot.slane %v10112_v36, 5 }
  0xf6   : >> { %8204 = vmatmul.mubr.bf16.vlgmr.msra.gmra.mrb[0].mxu0 %v7130_v0  ;;  %8548 = vmatpush3.bf16.msra.mxu1 %v10267_v62  ;;  %v2712_v0 = vor.u32 %v2711_v7, %v10325_v46  ;;  %v2717_v19 = vrot.slane %v2715_v37, 5  ;;  %v7159_v7 = vrot.slane %v7151_v47, 9 }
  0xf7   : >> { %8220 = vmatpush3.bf16.msra.mxu0 %v8981_v61  ;;  %8207 = vmatprep.mubr.bf16.mxu0 %v7131_v51  ;;  %v2646_v61 = vsel %vm9514_vm7, %v2641_v3, %v10272_v16  ;;  %v2991_v16 = vrot.slane %v10180_v34, 5  ;;  %v2963_v3 = vrot.slane %v10086_v29, 5  ;;  %v2660_v34 = vsel %vm9514_vm7, %v2655_v4, %v10284_v17  ;;  %v7145_v51 = vld [vmem:[%s9469_s14 + $0x18] sm:$0xe]  ;;  %v7146_v4 = vld [vmem:[%s9469_s14 + $0x24] sm:$0xe] }
  0xf8   : >> { %8221 = vmatprep.subr.bf16.mxu0 %v10267_v62  ;;  %8541 = vmatprep.subr.bf16.mxu1 %v10279_v8  ;;  %v7133_v25 = vcombine.low %v2636_v27, %v2646_v61  ;;  %v2670_v29 = vsel %vm9514_vm7, %v2665_v32, %v2669_v14  ;;  %v2994_v17 = vrot.slane %v10222_v60, 5  ;;  %v7153_v49 = vrot.slane %v7145_v51, 9  ;;  %v8993_v27 = vld [vmem:[%s11519_s1 + $0x230] sm:$0xff]   ;;  %v8992_v61 = vld [vmem:[%s9469_s14 + $0x60] sm:$0xff]  }
  0xf9   : >> { %8080 = vmatmul.mubr.bf16.gmra.mrb[4].mxu1 %v8984_v33  ;;  %v2993_v22 = vrot.slane %v2991_v16, 4  ;;  %v2998_v33 = vrot.slane %v10237_v45, 5  ;;  %v2965_v31 = vrot.slane %v2963_v3, 4  ;;  %v7134_v60 = vcombine.low %v2660_v34, %v2670_v29 }
  0xfa   : >> { %8549 = vmatpush3.bf16.msra.mxu1 %v10279_v8  ;;  %8083 = vmatprep.mubr.bf16.mxu1 %v8987_v21  ;;  %v2703_v21 = vrot.slane %v2702_v12, 4  ;;  %v2713_v59 = vrot.slane %v2712_v0, 4  ;;  %v2992_v15 = vsel %vm9811_vm10, %v7157_v48, %v2991_v16  ;;  %v2964_v54 = vsel %vm9811_vm10, %v7153_v49, %v2963_v3  ;;  %v7152_v3 = vld [vmem:[%s9469_s14 + $0x6c] sm:$0xe] }
  0xfb   : >> { %8222 = vmatpush3.bf16.msra.mxu0 %v10267_v62  ;;  %8542 = vmatprep.subr.bf16.mxu1 %v10310_v20  ;;  %v2693_v62 = vrot.slane %v2691_v53, 5  ;;  %v2995_v45 = vsel %vm9811_vm10, %v2993_v22, %v2994_v17  ;;  %v3000_v35 = vrot.slane %v2998_v33, 4  ;;  %v2967_v13 = vsel %vm9811_vm10, %v2965_v31, %v2966_v39  ;;  %v7148_v17 = vld [vmem:[%s9469_s14 + $0x3c] sm:$0xe] }
  0xfc   : >> { %8223 = vmatprep.subr.bf16.mxu0 %v10279_v8  ;;  %v2708_v50 = vsel %vm9514_vm7, %v2703_v21, %v10325_v46  ;;  %v2718_v53 = vsel %vm9514_vm7, %v2713_v59, %v2717_v19  ;;  %v3008_v32 = vrot.slane %v10301_v56, 5  ;;  %v2977_v46 = vrot.slane %v10131_v26, 5 }
  0xfd   : >> { %v7154_v14 = vrot.slane %v7146_v4, 9  ;;  %v7136_v10 = vcombine.low %v2708_v50, %v2718_v53  ;;  %v3012_v56 = vrot.slane %v10289_v55, 5  ;;  %v2973_v26 = vrot.slane %v10115_v57, 5 }
  0xfe   : >> { %8208 = vmatmul.mubr.bf16.gmra.mrb[4].mxu0 %v7132_v6  ;;  %8550 = vmatpush3.bf16.msra.mxu1 %v10310_v20  ;;  %v7181_v6 = vcombine.low %v2992_v15, %v2995_v45  ;;  %v3006_v40 = vsel %vm9811_vm10, %v7159_v7, %v3005_v9  ;;  %v2980_v12 = vrot.slane %v10154_v28, 5  ;;  %v7160_v37 = vrot.slane %v7152_v3, 9 }
  0xff   : >> { %8224 = vmatpush3.bf16.msra.mxu0 %v10279_v8  ;;  %8211 = vmatprep.mubr.bf16.mxu0 %v7133_v25  ;;  %v2694_v8 = vsel %vm9514_vm7, %v2689_v2, %v2693_v62  ;;  %v3007_v25 = vrot.slane %v3005_v9, 4  ;;  %v7177_v2 = vcombine.low %v2964_v54, %v2967_v13  ;;  %v2972_v62 = vrot.slane %v2970_v41, 4 }
 0x100   : >> { %8225 = vmatprep.subr.bf16.mxu0 %v10310_v20  ;;  %8543 = vmatprep.subr.bf16.mxu1 %v8989_v52  ;;  %v7135_v42 = vcombine.low %v2684_v30, %v2694_v8  ;;  %v3014_v51 = vrot.slane %v3012_v56, 4  ;;  %v3015_v57 = vrot.slane %v10330_v43, 5  ;;  %v2971_v29 = vsel %vm9811_vm10, %v7154_v14, %v2970_v41 }
 0x101   : >> { %8084 = vmatmul.mubr.bf16.gmra.mrb[8].mxu1 %v8988_v18  ;;  %v3009_v18 = vsel %vm9811_vm10, %v3007_v25, %v3008_v32  ;;  %v2984_v48 = vrot.slane %v10162_v5, 5  ;;  %v3013_v30 = vsel %vm9811_vm10, %v7160_v37, %v3012_v56  ;;  %v7156_v5 = vrot.slane %v7148_v17, 9 }
 0x102   : >> { %8551 = vmatpush3.bf16.msra.mxu1 %v8989_v52  ;;  %8087 = vmatprep.mubr.bf16.mxu1 %v8991_v24  ;;  %v2979_v24 = vrot.slane %v2977_v46, 4  ;;  %v7183_v55 = vcombine.low %v3006_v40, %v3009_v18  ;;  %v3016_v8 = vsel %vm9811_vm10, %v3014_v51, %v3015_v57  ;;  %v2987_v31 = vrot.slane %v10216_v63, 5 }
 0x103   : >> { %8226 = vmatpush3.bf16.msra.mxu0 %v10310_v20  ;;  %8544 = vmatprep.subr.bf16.mxu1 %v8990_v23  ;;  %v3001_v20 = vrot.slane %v10282_v38, 5  ;;  %v7158_v38 = vrot.slane %v7150_v1, 9  ;;  %v2986_v49 = vrot.slane %v2984_v48, 4  ;;  %v7184_v39 = vcombine.low %v3013_v30, %v3016_v8 }
 0x104   : >> { %8227 = vmatprep.subr.bf16.mxu0 %v8989_v52  ;;  %v2981_v22 = vsel %vm9811_vm10, %v2979_v24, %v2980_v12 }
 0x105   : >> { %v3002_v16 = vsel %vm9811_vm10, %v3000_v35, %v3001_v20  ;;  %v2999_v36 = vsel %vm9811_vm10, %v7158_v38, %v2998_v33  ;;  %v2988_v21 = vsel %vm9811_vm10, %v2986_v49, %v2987_v31 }
 0x106   : >> { %8212 = vmatmul.mubr.bf16.gmra.mrb[8].mxu0 %v7134_v60  ;;  %8552 = vmatpush3.bf16.msra.mxu1 %v8990_v23  ;;  %v7182_v0 = vcombine.low %v2999_v36, %v3002_v16  ;;  %v2985_v60 = vsel %vm9811_vm10, %v7156_v5, %v2984_v48 }
 0x107   : >> { %8228 = vmatpush3.bf16.msra.mxu0 %v8989_v52  ;;  %8215 = vmatprep.mubr.bf16.mxu0 %v7135_v42  ;;  %v7147_v52 = vld [vmem:[%s9469_s14 + $0x30] sm:$0xe]  ;;  %v7180_v59 = vcombine.low %v2985_v60, %v2988_v21  ;;  %s10469_s14 = scalar_lea.vmem [#allocation2], %s7571_s9  ;;  %s10602_s9 = smov (%p364_p6), 0  }
 0x108   : >> { %8229 = vmatprep.subr.bf16.mxu0 %v8990_v23  ;;  %8545 = vmatprep.subr.bf16.mxu1 %v8993_v27  ;;  %v7155_v34 = vrot.slane %v7147_v52, 9 }
 0x109   : >> { %8088 = vmatmul.mubr.bf16.gmra.mrb[12].mxu1 %v8992_v61 }
 0x10a   : >> { %8553 = vmatpush3.bf16.msra.mxu1 %v8993_v27  ;;  %8243 = vmatprep.mubr.bf16.mxu1 %v7181_v6  ;;  %v2978_v28 = vsel %vm9811_vm10, %v7155_v34, %v2977_v46  ;;  %v11563_v34 = vld [vmem:[#allocation10_spill] sm:$0xff] }
 0x10b   : >> { %8230 = vmatpush3.bf16.msra.mxu0 %v8990_v23  ;;  %8546 = vmatprep.subr.bf16.mxu1 %v8994_v11  ;;  %v2974_v23 = vsel %vm9811_vm10, %v2972_v62, %v2973_v26  ;;  %v7179_v33 = vcombine.low %v2978_v28, %v2981_v22 }
 0x10c   : >> { %8231 = vmatprep.subr.bf16.mxu0 %v8993_v27  ;;  %v7178_v43 = vcombine.low %v2971_v29, %v2974_v23 }
 0x10e   : >> { %8216 = vmatmul.mubr.bf16.gmra.mrb[12].mxu0 %v7136_v10  ;;  %8554 = vmatpush3.bf16.msra.mxu1 %v8994_v11 }
 0x10f   : >> { %8232 = vmatpush3.bf16.msra.mxu0 %v8993_v27  ;;  %8235 = vmatprep.mubr.bf16.mxu0 %v7177_v2 }
 0x110   : >> { %8233 = vmatprep.subr.bf16.mxu0 %v8994_v11 }
 0x111   : >> { %8244 = vmatmul.mubr.bf16.vlgmr.msra.gmra.mrb[16].mxu1 %v7182_v0 }
 0x112   : >> { %8247 = vmatprep.mubr.bf16.mxu1 %v7183_v55 }
 0x113   : >> { %8234 = vmatpush3.bf16.msra.mxu0 %v8994_v11 }
 0x116   : >> { %8236 = vmatmul.mubr.bf16.vlgmr.msra.gmra.mrb[0].mxu0 %v7178_v43 }
 0x117   : >> { %8239 = vmatprep.mubr.bf16.mxu0 %v7179_v33 }
 0x119   : >> { %8248 = vmatmul.mubr.bf16.gmra.mrb[20].mxu1 %v7184_v39 }
 0x11e   : >> { %8240 = vmatmul.mubr.bf16.gmra.mrb[4].mxu0 %v7180_v59 }
 0x1c4   : >> { %v8077_v19 = vpop.f32.mrb[0].mxu1 }
 0x1c5   : >> { %v1454_v42 = vpop.f32.mrb[1].mxu1 }
 0x1c6   : >> { %v8078_v15 = vpop.f32.mrb[2].mxu1 }
 0x1c7   : >> { %v10425_v45 = vpop.f32.mrb[3].mxu1 }
 0x1cc   : >> { %v10427_v1 = vpop.f32.mrb[4].mxu1 }
 0x1cd   : >> { %v10429_v63 = vpop.f32.mrb[5].mxu1 }
 0x1ce   : >> { %v10431_v9 = vpop.f32.mrb[6].mxu1 }
 0x1cf   : >> { %v10433_v27 = vpop.f32.mrb[7].mxu1 }
 0x1d4   : >> { %v8085_v47 = vpop.f32.mrb[8].mxu1 }
 0x1d5   : >> { %v1486_v35 = vpop.f32.mrb[9].mxu1 }
 0x1d6   : >> { %v8086_v20 = vpop.f32.mrb[10].mxu1 }
 0x1d7   : >> { %v1489_v61 = vpop.f32.mrb[11].mxu1 }
 0x1d9   : >> { %v8213_v54 = vpop.f32.mrb[8].mxu0 }
 0x1da   : >> { %v8563_v13 = vadd.f32 %v8213_v54, %v8085_v47  ;;  %v2882_v50 = vpop.f32.mrb[9].mxu0 }
 0x1db   : >> { %v8565_v53 = vadd.f32 %v2882_v50, %v1486_v35  ;;  %v8214_v6 = vpop.f32.mrb[10].mxu0 }
 0x1dc   : >> { %v8567_v4 = vadd.f32 %v8214_v6, %v8086_v20  ;;  %v2885_v38 = vpop.f32.mrb[11].mxu0  ;;  %v8089_v11 = vpop.f32.mrb[12].mxu1 }
 0x1dd   : >> { %v8569_v41 = vadd.f32 %v2885_v38, %v1489_v61  ;;  %v1502_v7 = vpop.f32.mrb[13].mxu1 }
 0x1de   : >> { %v8090_v25 = vpop.f32.mrb[14].mxu1 }
 0x1df   : >> { %v1505_v32 = vpop.f32.mrb[15].mxu1 }
 0x1e1   : >> { %v8217_v46 = vpop.f32.mrb[12].mxu0 }
 0x1e2   : >> { %v10435_v14 = vadd.f32 %v8217_v46, %v8089_v11  ;;  %v2898_v16 = vpop.f32.mrb[13].mxu0 }
 0x1e3   : >> { %v10437_v52 = vadd.f32 %v2898_v16, %v1502_v7  ;;  %v8218_v10 = vpop.f32.mrb[14].mxu0 }
 0x1e4   : >> { %v10439_v2 = vadd.f32 %v8218_v10, %v8090_v25  ;;  %v2901_v36 = vpop.f32.mrb[15].mxu0  ;;  %v8245_v56 = vpop.f32.mrb[16].mxu1 }
 0x1e5   : >> { %v10441_v62 = vadd.f32 %v2901_v36, %v1505_v32  ;;  %v8564_v26 = vadd.f32 %v8563_v13, %v8245_v56  ;;  %v3180_v40 = vpop.f32.mrb[17].mxu1  ;;  %v7231_v36 = vld [vmem:[%s10469_s14 + $0x3c] sm:$0xf] }
 0x1e6   : >> { %v8566_v18 = vadd.f32 %v8565_v53, %v3180_v40  ;;  %v8246_v3 = vpop.f32.mrb[18].mxu1 }
 0x1e7   : >> { %v3237_v24 = vadd.f32 %v8564_v26, %v11563_v34  ;;  %v8568_v12 = vadd.f32 %v8567_v4, %v8246_v3  ;;  %v3183_v0 = vpop.f32.mrb[19].mxu1 }
 0x1e8   : >> { %v3235_v55 = vadd.f32 %v8566_v18, %v11563_v34  ;;  %v8570_v37 = vadd.f32 %v8569_v41, %v3183_v0  ;;  %v7236_v41 = vld [vmem:[%s10469_s14 + $0x48] sm:$0xf] }
 0x1e9   : >> { %v8237_v51 = vpop.f32.mrb[0].mxu0  ;;  %v3253_v57 = vmax.f32 %v3237_v24, 0.0  ;;  %v3238_v29 = vadd.f32 %v8568_v12, %v11563_v34 }
 0x1ea   : >> { %v8555_v23 = vadd.f32 %v8237_v51, %v8077_v19  ;;  %v3148_v48 = vpop.f32.mrb[1].mxu0  ;;  %v3251_v28 = vmax.f32 %v3235_v55, 0.0  ;;  %v10447_v22 = vadd.f32 %v8570_v37, %v11563_v34 }
 0x1eb   : >> { %v7582_v17 = vpack.c.bf16 %v3253_v57, %v3253_v57  ;;  %v8556_v43 = vadd.f32 %v3148_v48, %v1454_v42  ;;  %v8238_v30 = vpop.f32.mrb[2].mxu0  ;;  %v3254_v8 = vmax.f32 %v3238_v29, 0.0  ;;  %v7239_v57 = vld [vmem:[%s10469_s14 + $0x50] sm:$0x1] }
 0x1ec   : >> { %v3229_v33 = vadd.f32 %v8555_v23, %v11563_v34  ;;  %v7580_v5 = vpack.c.bf16 %v3251_v28, %v3251_v28  ;;  %v8557_v49 = vadd.f32 %v8238_v30, %v8078_v15  ;;  %v3151_v31 = vpop.f32.mrb[3].mxu0  ;;  %v3252_v39 = vmax.f32 %v10447_v22, 0.0  ;;  %v10451_v60 = vpop.f32.mrb[20].mxu1  ;;  %v7216_v30 = vld [vmem:[%s10469_s14 + $0x18] sm:$0xf] }
 0x1ed   : >> { %v3395_v21 = vshrl.u32 %v7582_v17, 16  ;;  %v3398_v59 = vshll.u32 %v7582_v17, 16  ;;  %v3227_v19 = vadd.f32 %v8556_v43, %v11563_v34  ;;  %v7583_v47 = vpack.c.bf16 %v3254_v8, %v3254_v8  ;;  %v10454_v35 = vpop.f32.mrb[21].mxu1 }
 0x1ee   : >> { %v3245_v42 = vmax.f32 %v3229_v33, 0.0  ;;  %v3378_v20 = vshrl.u32 %v7580_v5, 16  ;;  %v3381_v61 = vshll.u32 %v7580_v5, 16  ;;  %v3230_v54 = vadd.f32 %v8557_v49, %v11563_v34  ;;  %v10457_v13 = vpop.f32.mrb[22].mxu1 }
 0x1ef   : >> { %v3397_v15 = vrot.slane %v3395_v21, 7  ;;  %v3243_v50 = vmax.f32 %v3227_v19, 0.0  ;;  %v3403_v53 = vshrl.u32 %v7583_v47, 16  ;;  %v3406_v6 = vshll.u32 %v7583_v47, 16  ;;  %v10459_v4 = vpop.f32.mrb[23].mxu1 }
 0x1f0   : >> { %v7574_v38 = vpack.c.bf16 %v3245_v42, %v3245_v42  ;;  %v10472_v7 = vrot.slane %v3378_v20, 7  ;;  %v3246_v25 = vmax.f32 %v3230_v54, 0.0  ;;  %v8558_v32 = vadd.f32 %v3151_v31, %v10425_v45 }
 0x1f1   : >> { %v3400_v46 = vor.u32 %v3398_v59, %v3397_v15  ;;  %v3401_v16 = vrot.slane %v3397_v15, 4  ;;  %v7572_v10 = vpack.c.bf16 %v3243_v50, %v3243_v50  ;;  %v3405_v56 = vrot.slane %v3403_v53, 7  ;;  %v8241_v26 = vpop.f32.mrb[4].mxu0  ;;  %v7211_v59 = vld [vmem:[%s10469_s14 + $0xc] sm:$0xf] }
 0x1f2   : >> { %v3327_v40 = vshrl.u32 %v7574_v38, 16  ;;  %v3330_v18 = vshll.u32 %v7574_v38, 16  ;;  %v3383_v3 = vor.u32 %v3381_v61, %v10472_v7  ;;  %v3384_v24 = vrot.slane %v10472_v7, 4  ;;  %v3164_v12 = vpop.f32.mrb[5].mxu0  ;;  %v7219_v53 = vld [vmem:[%s10469_s14 + $0x20] sm:$0x1] }
 0x1f3   : >> { %v3509_v45 = vsel %vm10463_vm13, %v3400_v46, %v7236_v41  ;;  %v3310_v0 = vshrl.u32 %v7572_v10, 16  ;;  %v3313_v55 = vshll.u32 %v7572_v10, 16  ;;  %v7575_v37 = vpack.c.bf16 %v3246_v25, %v3246_v25  ;;  %v8242_v29 = vpop.f32.mrb[6].mxu0 }
 0x1f4   : >> { %v3329_v23 = vrot.slane %v3327_v40, 7  ;;  %7237 = vst [vmem:[%s10469_s14 + $0x48] sm:$0xf] %v3509_v45  ;;  %v3502_v48 = vsel %vm10463_vm13, %v3383_v3, %v7231_v36  ;;  %v3408_v28 = vor.u32 %v3406_v6, %v3405_v56  ;;  %v3410_v17 = vrot.slane %v3405_v56, 4  ;;  %v10490_v43 = vpop.f32.mrb[7].mxu0 }
 0x1f5   : >> { %v3312_v8 = vrot.slane %v3310_v0, 7  ;;  %7232 = vst [vmem:[%s10469_s14 + $0x3c] sm:$0xf] %v3502_v48  ;;  %v3335_v33 = vshrl.u32 %v7575_v37, 16  ;;  %v3338_v5 = vshll.u32 %v7575_v37, 16  ;;  %v3228_v49 = vadd.f32 %v8558_v32, %v11563_v34 }
 0x1f6   : >> { %v3332_v31 = vor.u32 %v3330_v18, %v3329_v23  ;;  %v3333_v21 = vrot.slane %v3329_v23, 4  ;;  %v3409_v19 = vsel %vm10482_vm14, %v3401_v16, %v3408_v28  ;;  %v3513_v42 = vsel %vm9340_vm2, %v3410_v17, %v7239_v57  ;;  %v7234_v0 = vld [vmem:[%s10469_s14 + $0x44] sm:$0x1]  ;;  %v7214_v23 = vld [vmem:[%s10469_s14 + $0x14] sm:$0x1] }
 0x1f7   : >> { %v3315_v20 = vor.u32 %v3313_v55, %v3312_v8  ;;  %v3316_v61 = vrot.slane %v3312_v8, 4  ;;  %v3337_v54 = vrot.slane %v3335_v33, 7  ;;  %7238 = vst [vmem:[%s10469_s14 + $0x4c] sm:$0xf] %v3409_v19  ;;  %7240 = vst [vmem:[%s10469_s14 + $0x50] sm:$0x1] %v3513_v42  ;;  %v7581_v6 = vpack.c.bf16 %v3252_v39, %v3252_v39 }
 0x1f8   : >> { %v3244_v15 = vmax.f32 %v3228_v49, 0.0  ;;  %v3481_v50 = vsel %vm10463_vm13, %v3332_v31, %v7216_v30  ;;  %v8559_v38 = vadd.f32 %v8241_v26, %v10427_v1  ;;  %v8572_v41 = vadd.f32 %v10435_v14, %v10451_v60 }
 0x1f9   : >> { %7217 = vst [vmem:[%s10469_s14 + $0x18] sm:$0xf] %v3481_v50  ;;  %v3474_v25 = vsel %vm10463_vm13, %v3315_v20, %v7211_v59  ;;  %v3340_v32 = vor.u32 %v3338_v5, %v3337_v54  ;;  %v3342_v46 = vrot.slane %v3337_v54, 4  ;;  %v3386_v10 = vshrl.u32 %v7581_v6, 16  ;;  %v7226_v59 = vld [vmem:[%s10469_s14 + $0x30] sm:$0xf] }
 0x1fa   : >> { %v7573_v16 = vpack.c.bf16 %v3244_v15, %v3244_v15  ;;  %7212 = vst [vmem:[%s10469_s14 + $0xc] sm:$0xf] %v3474_v25  ;;  %v3389_v22 = vshll.u32 %v7581_v6, 16  ;;  %v3233_v39 = vadd.f32 %v8559_v38, %v11563_v34  ;;  %v3241_v1 = vadd.f32 %v8572_v41, %v11563_v34  ;;  %v7246_v15 = vld [vmem:[%s10469_s14 + $0x60] sm:$0xf] }
 0x1fb   : >> { %v3341_v14 = vsel %vm10482_vm14, %v3333_v21, %v3340_v32  ;;  %v3485_v60 = vsel %vm9340_vm2, %v3342_v46, %v7219_v53  ;;  %v3388_v26 = vrot.slane %v3386_v10, 7  ;;  %v8560_v3 = vadd.f32 %v3164_v12, %v10429_v63 }
 0x1fc   : >> { %v3318_v36 = vshrl.u32 %v7573_v16, 16  ;;  %v3321_v56 = vshll.u32 %v7573_v16, 16  ;;  %7218 = vst [vmem:[%s10469_s14 + $0x1c] sm:$0xf] %v3341_v14  ;;  %7220 = vst [vmem:[%s10469_s14 + $0x20] sm:$0x1] %v3485_v60  ;;  %v8574_v55 = vadd.f32 %v10437_v52, %v10454_v35  ;;  %v8561_v37 = vadd.f32 %v8242_v29, %v10431_v9 }
 0x1fd   : >> { %v3249_v40 = vmax.f32 %v3233_v39, 0.0  ;;  %v3257_v18 = vmax.f32 %v3241_v1, 0.0  ;;  %v8576_v57 = vadd.f32 %v10439_v2, %v10457_v13  ;;  %v3391_v48 = vor.u32 %v3389_v22, %v3388_v26  ;;  %v7221_v14 = vld [vmem:[%s10469_s14 + $0x24] sm:$0xf]  ;;  %v7241_v60 = vld [vmem:[%s10469_s14 + $0x54] sm:$0xf] }
 0x1fe   : >> { %v3320_v45 = vrot.slane %v3318_v36, 7  ;;  %v3393_v28 = vrot.slane %v3388_v26, 4  ;;  %v3231_v8 = vadd.f32 %v8560_v3, %v11563_v34  ;;  %v3239_v52 = vadd.f32 %v8574_v55, %v11563_v34 }
 0x1ff   : >> { %v7578_v17 = vpack.c.bf16 %v3249_v40, %v3249_v40  ;;  %v7586_v30 = vpack.c.bf16 %v3257_v18, %v3257_v18  ;;  %v3392_v9 = vsel %vm10482_vm14, %v3384_v24, %v3391_v48  ;;  %v3234_v21 = vadd.f32 %v8561_v37, %v11563_v34 }
 0x200   : >> { %v3323_v63 = vor.u32 %v3321_v56, %v3320_v45  ;;  %v3325_v12 = vrot.slane %v3320_v45, 4  ;;  %v3506_v2 = vsel %vm9340_vm2, %v3393_v28, %v7234_v0  ;;  %7233 = vst [vmem:[%s10469_s14 + $0x40] sm:$0xf] %v3392_v9  ;;  %v3247_v49 = vmax.f32 %v3231_v8, 0.0 }
 0x201   : >> { %v3361_v35 = vshrl.u32 %v7578_v17, 16  ;;  %v3364_v13 = vshll.u32 %v7578_v17, 16  ;;  %7235 = vst [vmem:[%s10469_s14 + $0x44] sm:$0x1] %v3506_v2  ;;  %v3429_v5 = vshrl.u32 %v7586_v30, 16  ;;  %v3432_v7 = vshll.u32 %v7586_v30, 16 }
 0x202   : >> { %v3324_v29 = vsel %vm10482_vm14, %v3316_v61, %v3323_v63  ;;  %v3478_v33 = vsel %vm9340_vm2, %v3325_v12, %v7214_v23  ;;  %v3255_v31 = vmax.f32 %v3239_v52, 0.0  ;;  %v3242_v42 = vadd.f32 %v8576_v57, %v11563_v34  ;;  %v7229_v17 = vld [vmem:[%s10469_s14 + $0x38] sm:$0x1]  ;;  %v7249_v30 = vld [vmem:[%s10469_s14 + $0x68] sm:$0x1] }
 0x203   : >> { %7213 = vst [vmem:[%s10469_s14 + $0x10] sm:$0xf] %v3324_v29  ;;  %7215 = vst [vmem:[%s10469_s14 + $0x14] sm:$0x1] %v3478_v33  ;;  %v3363_v24 = vrot.slane %v3361_v35, 7  ;;  %v3431_v19 = vrot.slane %v3429_v5, 7  ;;  %v8562_v20 = vadd.f32 %v10490_v43, %v10433_v27  ;;  %v8578_v61 = vadd.f32 %v10441_v62, %v10459_v4 }
 0x204   : >> { %v7576_v50 = vpack.c.bf16 %v3247_v49, %v3247_v49  ;;  %v7584_v53 = vpack.c.bf16 %v3255_v31, %v3255_v31  ;;  %v3250_v38 = vmax.f32 %v3234_v21, 0.0  ;;  %v3258_v41 = vmax.f32 %v3242_v42, 0.0  ;;  %v7244_v42 = vld [vmem:[%s10469_s14 + $0x5c] sm:$0x1] }
 0x205   : >> { %v3366_v54 = vor.u32 %v3364_v13, %v3363_v24  ;;  %v3434_v6 = vor.u32 %v3432_v7, %v3431_v19  ;;  %v3232_v39 = vadd.f32 %v8562_v20, %v11563_v34  ;;  %v3240_v1 = vadd.f32 %v8578_v61, %v11563_v34 }
 0x206   : >> { %v3344_v32 = vshrl.u32 %v7576_v50, 16  ;;  %v3347_v46 = vshll.u32 %v7576_v50, 16  ;;  %v3412_v16 = vshrl.u32 %v7584_v53, 16  ;;  %v3415_v62 = vshll.u32 %v7584_v53, 16 }
 0x207   : >> { %v3495_v25 = vsel %vm10463_vm13, %v3366_v54, %v7226_v59  ;;  %v3523_v27 = vsel %vm10463_vm13, %v3434_v6, %v7246_v15  ;;  %v7579_v4 = vpack.c.bf16 %v3250_v38, %v3250_v38  ;;  %v7587_v43 = vpack.c.bf16 %v3258_v41, %v3258_v41 }
 0x208   : >> { %7227 = vst [vmem:[%s10469_s14 + $0x30] sm:$0xf] %v3495_v25  ;;  %7247 = vst [vmem:[%s10469_s14 + $0x60] sm:$0xf] %v3523_v27  ;;  %v3346_v10 = vrot.slane %v3344_v32, 7  ;;  %v3414_v22 = vrot.slane %v3412_v16, 7 }
 0x209   : >> { %v3369_v36 = vshrl.u32 %v7579_v4, 16  ;;  %v3437_v56 = vshrl.u32 %v7587_v43, 16  ;;  %v3372_v18 = vshll.u32 %v7579_v4, 16  ;;  %v3440_v3 = vshll.u32 %v7587_v43, 16 }
 0x20a   : >> { %v3349_v26 = vor.u32 %v3347_v46, %v3346_v10  ;;  %v3417_v40 = vor.u32 %v3415_v62, %v3414_v22  ;;  %v3248_v55 = vmax.f32 %v3232_v39, 0.0  ;;  %v3256_v37 = vmax.f32 %v3240_v1, 0.0 }
 0x20b   : >> { %v3371_v45 = vrot.slane %v3369_v36, 7  ;;  %v3439_v0 = vrot.slane %v3437_v56, 7  ;;  %v3367_v57 = vrot.slane %v3363_v24, 4  ;;  %v3435_v23 = vrot.slane %v3431_v19, 4  ;;  %v7224_v19 = vld [vmem:[%s10469_s14 + $0x2c] sm:$0x1] }
 0x20c   : >> { %v3488_v48 = vsel %vm10463_vm13, %v3349_v26, %v7221_v14  ;;  %v3516_v28 = vsel %vm10463_vm13, %v3417_v40, %v7241_v60  ;;  %v7577_v9 = vpack.c.bf16 %v3248_v55, %v3248_v55  ;;  %v7585_v2 = vpack.c.bf16 %v3256_v37, %v3256_v37 }
 0x20d   : >> { %7222 = vst [vmem:[%s10469_s14 + $0x24] sm:$0xf] %v3488_v48  ;;  %7242 = vst [vmem:[%s10469_s14 + $0x54] sm:$0xf] %v3516_v28  ;;  %v3374_v63 = vor.u32 %v3372_v18, %v3371_v45  ;;  %v3376_v12 = vrot.slane %v3371_v45, 4  ;;  %v3442_v8 = vor.u32 %v3440_v3, %v3439_v0  ;;  %v3444_v52 = vrot.slane %v3439_v0, 4 }
 0x20e   : >> { %v3352_v33 = vshrl.u32 %v7577_v9, 16  ;;  %v3420_v5 = vshrl.u32 %v7585_v2, 16  ;;  %v3355_v24 = vshll.u32 %v7577_v9, 16  ;;  %v3423_v31 = vshll.u32 %v7585_v2, 16 }
 0x20f   : >> { %v3375_v35 = vsel %vm10482_vm14, %v3367_v57, %v3374_v63  ;;  %v3499_v11 = vsel %vm9340_vm2, %v3376_v12, %v7229_v17  ;;  %v3443_v13 = vsel %vm10482_vm14, %v3435_v23, %v3442_v8  ;;  %v3527_v29 = vsel %vm9340_vm2, %v3444_v52, %v7249_v30 }
 0x210   : >> { %7228 = vst [vmem:[%s10469_s14 + $0x34] sm:$0xf] %v3375_v35  ;;  %7230 = vst [vmem:[%s10469_s14 + $0x38] sm:$0x1] %v3499_v11  ;;  %v3354_v7 = vrot.slane %v3352_v33, 7  ;;  %v3422_v49 = vrot.slane %v3420_v5, 7 }
 0x211   : >> { %7248 = vst [vmem:[%s10469_s14 + $0x64] sm:$0xf] %v3443_v13  ;;  %7250 = vst [vmem:[%s10469_s14 + $0x68] sm:$0x1] %v3527_v29  ;;  %v3350_v21 = vrot.slane %v3346_v10, 4  ;;  %v3418_v59 = vrot.slane %v3414_v22, 4 }
 0x212   : >> { %v3357_v20 = vor.u32 %v3355_v24, %v3354_v7  ;;  %v3359_v61 = vrot.slane %v3354_v7, 4  ;;  %v3425_v54 = vor.u32 %v3423_v31, %v3422_v49  ;;  %v3427_v15 = vrot.slane %v3422_v49, 4  ;;  %366 = sbr.rel (!%p364_p6) target bundleno = 88 (0x58), region = 121 }
 0x214   : >> { %v3358_v50 = vsel %vm10482_vm14, %v3350_v21, %v3357_v20  ;;  %v3492_v53 = vsel %vm9340_vm2, %v3359_v61, %v7224_v19  ;;  %v3426_v6 = vsel %vm10482_vm14, %v3418_v59, %v3425_v54  ;;  %v3520_v38 = vsel %vm9340_vm2, %v3427_v15, %v7244_v42 }
 0x215   : >> { %7223 = vst [vmem:[%s10469_s14 + $0x28] sm:$0xf] %v3358_v50  ;;  %7225 = vst [vmem:[%s10469_s14 + $0x2c] sm:$0x1] %v3492_v53 }
 0x216   : >> { %7243 = vst [vmem:[%s10469_s14 + $0x58] sm:$0xf] %v3426_v6  ;;  %7245 = vst [vmem:[%s10469_s14 + $0x5c] sm:$0x1] %v3520_v38 }
 0x219 LB: >> { %v8999_v51 = vld [vmem:[#allocation3 + $0x40] sm:$0xff]   ;;  %v9001_v25 = vld [vmem:[#allocation3 + $0x48] sm:$0xff]   ;;  %v9003_v46 = vld [vmem:[#allocation3 + $0x50] sm:$0xff]   ;;  %s7588_s17 = smul.u32 96, %s9209_s9  ;;  %vm6484_vm15 = vcmask 1046528   ;;  %s7606_s23 = sshll.u32 %s9209_s9, 6  ;;  %s9209_s9 = sphi %s10602_s9, %s3534_s9  }
 0x21a   : >> { %v9000_v41 = vld [vmem:[#allocation3 + $0x100] sm:$0xff]   ;;  %8251 = vmatprep.subr.bf16.mxu1 %v8999_v51  ;;  %v9002_v32 = vld [vmem:[#allocation3 + $0x108] sm:$0xff]   ;;  %v9004_v16 = vld [vmem:[#allocation3 + $0x110] sm:$0xff]   ;;  %s11426_s25 = scalar_lea.vmem %s232_s16, %s7606_s23 [#allocation6]  ;;  %s3534_s9 = sadd.s32 1, %s9209_s9  }
 0x21b   : >> { %8379 = vmatprep.subr.bf16.mxu0 %v9000_v41  ;;  %8252 = vmatpush3.bf16.msra.mxu1 %v8999_v51  ;;  %v9005_v34 = vld [vmem:[#allocation3 + $0x58] sm:$0xff]   ;;  %v9007_v27 = vld [vmem:[#allocation3 + $0x60] sm:$0xff]   ;;  %v9009_v4 = vld [vmem:[#allocation3 + $0x68] sm:$0xff]   ;;  %s10610_s12 = scalar_lea.vmem [#allocation2], %s7588_s17  ;;  %s11327_s13 = scalar_lea.vmem %s9357_s15, %s7588_s17 }
 0x21c   : >> { %8380 = vmatpush3.bf16.msra.mxu0 %v9000_v41  ;;  %8253 = vmatprep.subr.bf16.mxu1 %v9001_v25  ;;  %v9006_v47 = vld [vmem:[#allocation3 + $0x118] sm:$0xff]   ;;  %v9008_v62 = vld [vmem:[#allocation3 + $0x120] sm:$0xff]   ;;  %v9010_v43 = vld [vmem:[#allocation3 + $0x128] sm:$0xff]   ;;  %p3531_p9 = scmp.ge.s32.totalorder %s3534_s9, 2  }
 0x21d   : >> { %8381 = vmatprep.subr.bf16.mxu0 %v9002_v32  ;;  %v10613_v10 = vld [vmem:[%s10610_s12] sm:$0xf]  ;;  %v10616_v22 = vld [vmem:[%s10610_s12 + $0x4] sm:$0xf]  ;;  %v3571_v39 = vld [vmem:[%s10610_s12 + $0x8] sm:$0x1] }
 0x21e   : >> { %v3583_v1 = vshrl.u32 %v10613_v10, 16  ;;  %v3586_v14 = vshll.u32 %v10613_v10, 16  ;;  %v3592_v60 = vshll.u32 %v10616_v22, 16  ;;  %v3596_v36 = vshrl.u32 %v10616_v22, 16  ;;  %v7344_v56 = vld [vmem:[%s10610_s12 + $0xc] sm:$0xf] }
 0x21f   : >> { %8254 = vmatpush3.bf16.msra.mxu1 %v9001_v25  ;;  %v3602_v26 = vshll.u32 %v3571_v39, 16  ;;  %v10625_v40 = vld [vmem:[%s10610_s12 + $0x10] sm:$0xf]  ;;  %v10628_v18 = vld [vmem:[%s10610_s12 + $0x14] sm:$0x1]  ;;  %v9011_v3 = vld [vmem:[#allocation3 + $0x70] sm:$0xff]  }
 0x220   : >> { %8382 = vmatpush3.bf16.msra.mxu0 %v9002_v32  ;;  %8255 = vmatprep.subr.bf16.mxu1 %v9003_v46  ;;  %v9012_v45 = vld [vmem:[#allocation3 + $0x130] sm:$0xff]   ;;  %v3585_v0 = vrot.slane %v3583_v1, 4  ;;  %v3588_v55 = vrot.slane %v3586_v14, 5  ;;  %v3594_v37 = vrot.slane %v3592_v60, 5  ;;  %v3598_v57 = vrot.slane %v3596_v36, 4  ;;  %v9013_v7 = vld [vmem:[#allocation3 + $0x78] sm:$0xff]  }
 0x221   : >> { %8383 = vmatprep.subr.bf16.mxu0 %v9004_v16  ;;  %v3604_v23 = vrot.slane %v3602_v26, 5  ;;  %v4725_v48 = vshrl.u32 %v7344_v56, 16  ;;  %v4728_v28 = vshll.u32 %v7344_v56, 16  ;;  %v4734_v17 = vshll.u32 %v10625_v40, 16  ;;  %v10632_v30 = vld [vmem:[%s10610_s12 + $0xc] sm:$0xf] }
 0x222   : >> { %v3589_v63 = vor.u32 %v3588_v55, %v3585_v0  ;;  %v3599_v12 = vor.u32 %v3598_v57, %v3594_v37  ;;  %v4738_v8 = vshrl.u32 %v10625_v40, 16  ;;  %v4744_v52 = vshll.u32 %v10628_v18, 16  ;;  %v10637_v9 = vld [vmem:[%s10610_s12 + $0x10] sm:$0xf]  ;;  %v3572_v49 = vld [vmem:[%s10610_s12 + $0x14] sm:$0x1] }
 0x223   : >> { %8256 = vmatpush3.bf16.msra.mxu1 %v9003_v46  ;;  %v4727_v2 = vrot.slane %v4725_v48, 4  ;;  %v4730_v35 = vrot.slane %v4728_v28, 5  ;;  %v4736_v11 = vrot.slane %v4734_v17, 5  ;;  %v3607_v31 = vshrl.u32 %v10632_v30, 16  ;;  %v9014_v19 = vld [vmem:[#allocation3 + $0x138] sm:$0xff]   ;;  %s7607_s26 = sshll.u32 (%p3531_p9), %s9269_s22, 11 }
 0x224   : >> { %8384 = vmatpush3.bf16.msra.mxu0 %v9004_v16  ;;  %8257 = vmatprep.subr.bf16.mxu1 %v9005_v34  ;;  %v3590_v13 = vrot.slane %v3589_v63, 4  ;;  %v3600_v29 = vrot.slane %v3599_v12, 4  ;;  %v4740_v33 = vrot.slane %v4738_v8, 4  ;;  %v4746_v5 = vrot.slane %v4744_v52, 5  ;;  %v7347_v15 = vld [vmem:[%s10610_s12 + $0x18] sm:$0xf]  ;;  %s11469_s10 = scalar_lea.hbm (%p3531_p9), %s11523_s5, %s7607_s26 }
 0x225   : >> { %8385 = vmatprep.subr.bf16.mxu0 %v9006_v47  ;;  %v4731_v24 = vor.u32 %v4730_v35, %v4727_v2  ;;  %v3610_v21 = vshll.u32 %v10632_v30, 16  ;;  %v3616_v59 = vshll.u32 %v10637_v9, 16  ;;  %v3620_v54 = vshrl.u32 %v10637_v9, 16  ;;  %v10650_v51 = vld [vmem:[%s10610_s12 + $0x1c] sm:$0xf]  ;;  %s6670_s11 = sshll.u32 (%p3531_p9), %s232_s16, 4  ;;  %s11473_s11 = int_to_ptr.vmem [resolvable:$true] %s6670_s11 }
 0x226   : >> { %v3595_v42 = vsel %vm9514_vm7, %v3590_v13, %v3594_v37  ;;  %v3605_v20 = vsel %vm9514_vm7, %v3600_v29, %v3604_v23  ;;  %v4741_v61 = vor.u32 %v4740_v33, %v4736_v11  ;;  %v3609_v6 = vrot.slane %v3607_v31, 4  ;;  %v9015_v16 = vld [vmem:[#allocation3] sm:$0xff]   ;;  %v3573_v2 = vld [vmem:[%s10610_s12 + $0x20] sm:$0x1]  ;;  %s11477_s14 = scalar_lea.sflag (%p3531_p9), [#allocation5], %s230_s6  ;;  %s9127_s15 = scalar_lea.vmem (%p3531_p9), %s11473_s11, 2048 }
 0x227   : >> { %8258 = vmatpush3.bf16.msra.mxu1 %v9005_v34  ;;  %v7254_v50 = vcombine.low %v3595_v42, %v3605_v20  ;;  %v4732_v53 = vrot.slane %v4731_v24, 4  ;;  %v3612_v38 = vrot.slane %v3610_v21, 5  ;;  %v3618_v25 = vrot.slane %v3616_v59, 5  ;;  %v10653_v34 = vld [vmem:[%s10610_s12 + $0x20] sm:$0x1]  ;;  %p9128_p10 = scmp.ne.s32.totalorder (%p3531_p9), %s11473_s11, %s9127_s15  ;;  %p11584_p12 = scmp.ne.s32.totalorder (%p3531_p9), %s11538_s28, 0 }
 0x228   : >> { %8386 = vmatpush3.bf16.msra.mxu0 %v9006_v47  ;;  %8259 = vmatprep.subr.bf16.mxu1 %v9007_v27  ;;  %v4742_v41 = vrot.slane %v4741_v61, 4  ;;  %v3622_v32 = vrot.slane %v3620_v54, 4  ;;  %v3626_v46 = vshll.u32 %v3572_v49, 16  ;;  %v10655_v47 = vld [vmem:[#allocation3 + $0x140] sm:$0xff]   ;;  %v4749_v60 = vshrl.u32 %v7347_v15, 16  ;;  %s9215_s22 = smov (%p3531_p9), [#allocation6]  }
 0x229   : >> { %8387 = vmatprep.subr.bf16.mxu0 %v9008_v62  ;;  %8267 = vmatprep.mubr.bf16.mxu1 %v7254_v50  ;;  %v4758_v55 = vshll.u32 %v10650_v51, 16  ;;  %v4762_v37 = vshrl.u32 %v10650_v51, 16  ;;  %v4768_v28 = vshll.u32 %v10653_v34, 16  ;;  %v10674_v17 = vld [vmem:[%s10610_s12 + $0x18] sm:$0xf]  ;;  %v3650_v61 = vshll.u32 %v3573_v2, 16  ;;  %p9129_p2 = pnand (%p3531_p9), %p9128_p10, %p11584_p12 }
 0x22a   : >> { %v4747_v39 = vsel %vm9514_vm7, %v4742_v41, %v4746_v5  ;;  %v3623_v1 = vor.u32 %v3622_v32, %v3618_v25  ;;  %v3628_v14 = vrot.slane %v3626_v46, 5  ;;  %v4751_v0 = vrot.slane %v4749_v60, 4  ;;  %v10680_v52 = vld [vmem:[%s10610_s12 + $0x1c] sm:$0xf]  ;;  %v9017_v5 = vld [vmem:[#allocation3 + $0x8] sm:$0xff]   ;;  %v9019_v46 = vld [vmem:[#allocation3 + $0x10] sm:$0xff]  }
 0x22b   : >> { %8260 = vmatpush3.bf16.msra.mxu1 %v9007_v27  ;;  %v4737_v27 = vsel %vm9514_vm7, %v4732_v53, %v4736_v11  ;;  %v4760_v12 = vrot.slane %v4758_v55, 5  ;;  %v4764_v8 = vrot.slane %v4762_v37, 4  ;;  %v3631_v31 = vshrl.u32 %v10674_v17, 16  ;;  %v10691_v59 = vld [vmem:[%s10610_s12 + $0x28] sm:$0xf]  ;;  %p9130_p3 = pneg (%p3531_p9), %p9129_p2  ;;  %s9131_s9 = sshll.u32 (%p3531_p9), %s9215_s22, 4  ;;  %s9132_s9 = int_to_ptr.vmem [resolvable:$false] %s9131_s9 }
 0x22c   : >> { %8388 = vmatpush3.bf16.msra.mxu0 %v9008_v62  ;;  %8261 = vmatprep.subr.bf16.mxu1 %v9009_v4  ;;  %v3613_v62 = vor.u32 %v3612_v38, %v3609_v6  ;;  %v7368_v36 = vcombine.low %v4737_v27, %v4747_v39  ;;  %v3634_v21 = vshll.u32 %v10674_v17, 16  ;;  %v3640_v42 = vshll.u32 %v10680_v52, 16  ;;  %v10696_v54 = vld [vmem:[%s10610_s12 + $0x2c] sm:$0x1]  ;;  %s9133_s17 = scalar_lea.vmem (%p3531_p9), %s9132_s9, 4096  ;;  %p9134_p4 = scmp.lt.s32.totalorder (%p3531_p9), %s11473_s11, %s9132_s9 }
 0x22d   : >> { %8389 = vmatprep.subr.bf16.mxu0 %v9010_v43  ;;  %v4765_v24 = vor.u32 %v4764_v8, %v4760_v12  ;;  %v3644_v20 = vshrl.u32 %v10680_v52, 16  ;;  %v3633_v53 = vrot.slane %v3631_v31, 4  ;;  %v3652_v32 = vrot.slane %v3650_v61, 5  ;;  %v10726_v61 = vld [vmem:[%s10610_s12 + $0x34] sm:$0xf]  ;;  %p9135_p7 = scmp.lt.s32.totalorder (%p3531_p9), %s9133_s17, %s9127_s15 }
 0x22e   : >> { %v3614_v56 = vrot.slane %v3613_v62, 4  ;;  %8395 = vmatprep.mubr.bf16.mxu0 %v7368_v36  ;;  %v3636_v6 = vrot.slane %v3634_v21, 5  ;;  %v3642_v41 = vrot.slane %v3640_v42, 5  ;;  %v9018_v62 = vld [vmem:[#allocation3 + $0x148] sm:$0xff]   ;;  %v4782_v36 = vshll.u32 %v10691_v59, 16  ;;  %v9020_v21 = vld [vmem:[#allocation3 + $0x150] sm:$0xff]  }
 0x22f   : >> { %8262 = vmatpush3.bf16.msra.mxu1 %v9009_v4  ;;  %v11533_v4 = vrot.slane %v10637_v9, 5  ;;  %v4792_v37 = vshll.u32 %v10696_v54, 16  ;;  %p9136_p8 = por (%p3531_p9), %p9135_p7, %p9134_p4 }
 0x230   : >> { %8390 = vmatpush3.bf16.msra.mxu0 %v9010_v43  ;;  %8263 = vmatprep.subr.bf16.mxu1 %v9011_v3  ;;  %v4200_v43 = vrot.slane %v3572_v49, 5  ;;  %v3619_v57 = vsel %vm9514_vm7, %v3614_v56, %v3618_v25  ;;  %v4770_v49 = vrot.slane %v4768_v28, 5  ;;  %v3646_v25 = vrot.slane %v3644_v20, 4 }
 0x231   : >> { %8391 = vmatprep.subr.bf16.mxu0 %v9012_v45  ;;  %v4199_v26 = vrot.slane %v11533_v4, 4  ;;  %v4786_v56 = vshrl.u32 %v10691_v59, 16  ;;  %p9137_p11 = pnand (%p3531_p9), %p9136_p8, %p9130_p3 }
 0x232   : >> { %v3647_v60 = vor.u32 %v3646_v25, %v3642_v41 }
 0x233   : >> { %8264 = vmatpush3.bf16.msra.mxu1 %v9011_v3  ;;  %v4752_v3 = vshll.u32 %v7347_v15, 16  ;;  %v10670_v23 = vsel %vm9811_vm10, %v4199_v26, %v4200_v43  ;;  %v4766_v15 = vrot.slane %v4765_v24, 4  ;;  %v3637_v43 = vor.u32 %v3636_v6, %v3633_v53  ;;  %v10709_v26 = vld [vmem:[%s10610_s12 + $0x28] sm:$0xf] }
 0x234   : >> { %8392 = vmatpush3.bf16.msra.mxu0 %v9012_v45  ;;  %8265 = vmatprep.subr.bf16.mxu1 %v9013_v7  ;;  %v3624_v45 = vrot.slane %v3623_v1, 4  ;;  %v10704_v1 = vld [vmem:[%s10610_s12 + $0x24] sm:$0xf]  ;;  %v3648_v28 = vrot.slane %v3647_v60, 4  ;;  %v3664_v31 = vshll.u32 %v10709_v26, 16  ;;  %v3668_v20 = vshrl.u32 %v10709_v26, 16 }
 0x235   : >> { %8393 = vmatprep.subr.bf16.mxu0 %v9014_v19  ;;  %v4754_v48 = vrot.slane %v4752_v3, 5  ;;  %v4771_v27 = vsel %vm9514_vm7, %v4766_v15, %v4770_v49  ;;  %v9021_v3 = vld [vmem:[#allocation3 + $0x18] sm:$0xff]   ;;  %v3655_v8 = vshrl.u32 %v10704_v1, 16 }
 0x236   : >> { %v3629_v63 = vsel %vm9514_vm7, %v3624_v45, %v3628_v14  ;;  %v3638_v45 = vrot.slane %v3637_v43, 4  ;;  %v3666_v53 = vrot.slane %v3664_v31, 5  ;;  %v10732_v43 = vld [vmem:[%s10610_s12 + $0x38] sm:$0x1] }
 0x237   : >> { %8266 = vmatpush3.bf16.msra.mxu1 %v9013_v7  ;;  %v7255_v13 = vcombine.low %v3619_v57, %v3629_v63  ;;  %v4755_v29 = vor.u32 %v4754_v48, %v4751_v0  ;;  %v7350_v7 = vld [vmem:[%s10610_s12 + $0x24] sm:$0xf]  ;;  %v10713_v57 = vld [vmem:[%s10610_s12 + $0x2c] sm:$0x1]  ;;  %v7353_v48 = vld [vmem:[%s10610_s12 + $0x30] sm:$0xf] }
 0x238   : >> { %8394 = vmatpush3.bf16.msra.mxu0 %v9014_v19  ;;  %8283 = vmatprep.subr.bf16.mxu1 %v9015_v16  ;;  %v4773_v39 = vshrl.u32 %v7350_v7, 16  ;;  %v4784_v63 = vrot.slane %v4782_v36, 5  ;;  %v3643_v2 = vsel %vm9514_vm7, %v3638_v45, %v3642_v41  ;;  %v3657_v49 = vrot.slane %v3655_v8, 4  ;;  %v9023_v41 = vld [vmem:[#allocation3 + $0x20] sm:$0xff]   ;;  %v9022_v36 = vld [vmem:[#allocation3 + $0x158] sm:$0xff]  }
 0x239   : >> { %8411 = vmatprep.subr.bf16.mxu0 %v10655_v47  ;;  %v4756_v19 = vrot.slane %v4755_v29, 4  ;;  %v4794_v29 = vrot.slane %v4792_v37, 5  ;;  %v3674_v6 = vshll.u32 %v10713_v57, 16  ;;  %v4816_v8 = vshll.u32 %v10732_v43, 16 }
 0x23a   : >> { %8268 = vmatmul.mubr.bf16.vlgmr.msra.gmra.mrb[0].mxu1 %v7255_v13  ;;  %v4775_v0 = vrot.slane %v4773_v39, 4  ;;  %v4800_v39 = vshll.u32 %v7353_v48, 16 }
 0x23b   : >> { %8284 = vmatpush3.bf16.msra.mxu1 %v9015_v16  ;;  %v4761_v38 = vsel %vm9514_vm7, %v4756_v19, %v4760_v12  ;;  %v4776_v16 = vshll.u32 %v7350_v7, 16  ;;  %v4788_v12 = vrot.slane %v4786_v56, 4  ;;  %v3653_v7 = vsel %vm9514_vm7, %v3648_v28, %v3652_v32  ;;  %v10741_v56 = vld [vmem:[%s10610_s12 + $0x34] sm:$0xf]  ;;  %v9025_v28 = vld [vmem:[#allocation3 + $0x28] sm:$0xff]  }
 0x23c   : >> { %8285 = vmatprep.subr.bf16.mxu1 %v9017_v5  ;;  %v7369_v14 = vcombine.low %v4761_v38, %v4771_v27  ;;  %v7256_v19 = vcombine.low %v3643_v2, %v3653_v7  ;;  %v4797_v38 = vshrl.u32 %v7353_v48, 16  ;;  %v3670_v27 = vrot.slane %v3668_v20, 4  ;;  %v10744_v48 = vld [vmem:[%s10610_s12 + $0x38] sm:$0x1] }
 0x23d   : >> { %v4778_v55 = vrot.slane %v4776_v16, 5  ;;  %v4789_v24 = vor.u32 %v4788_v12, %v4784_v63  ;;  %v4802_v37 = vrot.slane %v4800_v39, 5  ;;  %v4810_v12 = vshrl.u32 %v10726_v61, 16  ;;  %v9026_v39 = vld [vmem:[#allocation3 + $0x168] sm:$0xff]  }
 0x23e   : >> { %8396 = vmatmul.mubr.bf16.vlgmr.msra.gmra.mrb[0].mxu0 %v7369_v14  ;;  %8271 = vmatprep.mubr.bf16.mxu1 %v7256_v19  ;;  %v3676_v14 = vrot.slane %v3674_v6, 5  ;;  %v4799_v60 = vrot.slane %v4797_v38, 4  ;;  %v4818_v31 = vrot.slane %v4816_v8, 5  ;;  %v10761_v38 = vld [vmem:[%s10610_s12 + $0x44] sm:$0x1] }
 0x23f   : >> { %8286 = vmatpush3.bf16.msra.mxu1 %v9017_v5  ;;  %8412 = vmatpush3.bf16.msra.mxu0 %v10655_v47  ;;  %v4779_v13 = vor.u32 %v4778_v55, %v4775_v0  ;;  %v3658_v5 = vshll.u32 %v10704_v1, 16  ;;  %v4790_v15 = vrot.slane %v4789_v24, 4  ;;  %v3671_v55 = vor.u32 %v3670_v27, %v3666_v53  ;;  %v10771_v8 = vld [vmem:[%s10610_s12 + $0x40] sm:$0xf] }
 0x240   : >> { %8287 = vmatprep.subr.bf16.mxu1 %v9019_v46  ;;  %8413 = vmatprep.subr.bf16.mxu0 %v9018_v62  ;;  %v4803_v7 = vor.u32 %v4802_v37, %v4799_v60  ;;  %v3698_v27 = vshll.u32 %v10744_v48, 16 }
 0x241   : >> { %v4780_v42 = vrot.slane %v4779_v13, 4  ;;  %v3660_v47 = vrot.slane %v3658_v5, 5  ;;  %v4795_v16 = vsel %vm9514_vm7, %v4790_v15, %v4794_v29  ;;  %v7356_v13 = vld [vmem:[%s10610_s12 + $0x3c] sm:$0xf] }
 0x242   : >> { %v9024_v29 = vld [vmem:[#allocation3 + $0x160] sm:$0xff]   ;;  %v4804_v15 = vrot.slane %v4803_v7, 4  ;;  %v4824_v37 = vshll.u32 %v7356_v13, 16 }
 0x243   : >> { %8288 = vmatpush3.bf16.msra.mxu1 %v9019_v46  ;;  %8414 = vmatpush3.bf16.msra.mxu0 %v9018_v62  ;;  %v4785_v25 = vsel %vm9514_vm7, %v4780_v42, %v4784_v63  ;;  %v3661_v32 = vor.u32 %v3660_v47, %v3657_v49  ;;  %v10735_v46 = vld [vmem:[%s10610_s12 + $0x30] sm:$0xf]  ;;  %v4806_v62 = vshll.u32 %v10726_v61, 16  ;;  %v4812_v49 = vrot.slane %v4810_v12, 4  ;;  %v10755_v47 = vld [vmem:[%s10610_s12 + $0x40] sm:$0xf] }
 0x244   : >> { %8289 = vmatprep.subr.bf16.mxu1 %v9021_v3  ;;  %8415 = vmatprep.subr.bf16.mxu0 %v9020_v21  ;;  %v7370_v45 = vcombine.low %v4785_v25, %v4795_v16  ;;  %v3679_v2 = vshrl.u32 %v10735_v46, 16  ;;  %v3682_v24 = vshll.u32 %v10735_v46, 16  ;;  %v3688_v42 = vshll.u32 %v10741_v56, 16  ;;  %v9027_v16 = vld [vmem:[#allocation3 + $0x30] sm:$0xff]  }
 0x245   : >> { %v3662_v0 = vrot.slane %v3661_v32, 4  ;;  %v4808_v63 = vrot.slane %v4806_v62, 5  ;;  %v4830_v12 = vshll.u32 %v10755_v47, 16  ;;  %v4826_v7 = vrot.slane %v4824_v37, 5 }
 0x246   : >> { %8399 = vmatprep.mubr.bf16.mxu0 %v7370_v45  ;;  %v3681_v19 = vrot.slane %v3679_v2, 4  ;;  %v3684_v6 = vrot.slane %v3682_v24, 5  ;;  %v3690_v32 = vrot.slane %v3688_v42, 5  ;;  %v4821_v45 = vshrl.u32 %v7356_v13, 16  ;;  %v9029_v13 = vld [vmem:[#allocation3 + $0x38] sm:$0xff]  }
 0x247   : >> { %8290 = vmatpush3.bf16.msra.mxu1 %v9021_v3  ;;  %v3667_v5 = vsel %vm9514_vm7, %v3662_v0, %v3666_v53  ;;  %v3672_v3 = vrot.slane %v3671_v55, 4  ;;  %8416 = vmatpush3.bf16.msra.mxu0 %v9020_v21  ;;  %v3692_v53 = vshrl.u32 %v10741_v56, 16  ;;  %v4813_v25 = vor.u32 %v4812_v49, %v4808_v63  ;;  %v10767_v0 = vld [vmem:[%s10610_s12 + $0x3c] sm:$0xf] }
 0x248   : >> { %8291 = vmatprep.subr.bf16.mxu1 %v9023_v41  ;;  %8417 = vmatprep.subr.bf16.mxu0 %v9022_v36  ;;  %v3685_v60 = vor.u32 %v3684_v6, %v3681_v19  ;;  %v3700_v55 = vrot.slane %v3698_v27, 5  ;;  %v4832_v24 = vrot.slane %v4830_v12, 5  ;;  %v4840_v49 = vshll.u32 %v10761_v38, 16 }
 0x249   : >> { %v3677_v20 = vsel %vm9514_vm7, %v3672_v3, %v3676_v14  ;;  %v4809_v14 = vsel %vm9514_vm7, %v4804_v15, %v4808_v63  ;;  %v3694_v62 = vrot.slane %v3692_v53, 4  ;;  %v4823_v3 = vrot.slane %v4821_v45, 4  ;;  %v10780_v53 = vld [vmem:[%s10610_s12 + $0x44] sm:$0x1] }
 0x24a   : >> { %v7257_v21 = vcombine.low %v3667_v5, %v3677_v20  ;;  %v3686_v2 = vrot.slane %v3685_v60, 4  ;;  %11569 = vst [vmem:[#allocation14_spill] sm:$0xff] %v10780_v53  ;;  %v7359_v60 = vld [vmem:[%s10610_s12 + $0x48] sm:$0xf] }
 0x24b   : >> { %8292 = vmatpush3.bf16.msra.mxu1 %v9023_v41  ;;  %8418 = vmatpush3.bf16.msra.mxu0 %v9022_v36  ;;  %v4814_v41 = vrot.slane %v4813_v25, 4  ;;  %v3695_v5 = vor.u32 %v3694_v62, %v3690_v32  ;;  %v4834_v36 = vshrl.u32 %v10755_v47, 16  ;;  %v4827_v6 = vor.u32 %v4826_v7, %v4823_v3  ;;  %v9028_v25 = vld [vmem:[#allocation3 + $0x170] sm:$0xff]  }
 0x24c   : >> { %8293 = vmatprep.subr.bf16.mxu1 %v9025_v28  ;;  %8272 = vmatmul.mubr.bf16.gmra.mrb[4].mxu1 %v7257_v21  ;;  %v3691_v42 = vsel %vm9514_vm7, %v3686_v2, %v3690_v32  ;;  %v3706_v21 = vshll.u32 %v10767_v0, 16  ;;  %v10790_v62 = vld [vmem:[%s10610_s12 + $0x4c] sm:$0xf]  ;;  %v10793_v2 = vld [vmem:[%s10610_s12 + $0x50] sm:$0x1] }
 0x24d   : >> { %8419 = vmatprep.subr.bf16.mxu0 %v9024_v29  ;;  %v4819_v63 = vsel %vm9514_vm7, %v4814_v41, %v4818_v31  ;;  %v3696_v20 = vrot.slane %v3695_v5, 4  ;;  %v4836_v15 = vrot.slane %v4834_v36, 4  ;;  %v3703_v31 = vshrl.u32 %v10767_v0, 16  ;;  %v10795_v5 = vld [vmem:[#allocation3 + $0x80] sm:$0xff]   ;;  %v10799_v7 = vld [vmem:[%s10610_s12 + $0x48] sm:$0xf] }
 0x24e   : >> { %v7371_v19 = vcombine.low %v4809_v14, %v4819_v63  ;;  %v3712_v14 = vshll.u32 %v10771_v8, 16  ;;  %v4828_v41 = vrot.slane %v4827_v6, 4  ;;  %v3708_v12 = vrot.slane %v3706_v21, 5 }
 0x24f   : >> { %8294 = vmatpush3.bf16.msra.mxu1 %v9025_v28  ;;  %8420 = vmatpush3.bf16.msra.mxu0 %v9024_v29  ;;  %v4842_v28 = vrot.slane %v4840_v49, 5  ;;  %v3701_v32 = vsel %vm9514_vm7, %v3696_v20, %v3700_v55  ;;  %v4837_v27 = vor.u32 %v4836_v15, %v4832_v24  ;;  %v3716_v29 = vshrl.u32 %v10771_v8, 16  ;;  %v10804_v20 = vld [vmem:[%s10610_s12 + $0x4c] sm:$0xf]  ;;  %v9030_v15 = vld [vmem:[#allocation3 + $0x178] sm:$0xff]  }
 0x250   : >> { %8295 = vmatprep.subr.bf16.mxu1 %v9027_v16  ;;  %8421 = vmatprep.subr.bf16.mxu0 %v9026_v39  ;;  %v7258_v45 = vcombine.low %v3691_v42, %v3701_v32  ;;  %v3705_v37 = vrot.slane %v3703_v31, 4  ;;  %v3714_v3 = vrot.slane %v3712_v14, 5  ;;  %v3722_v63 = vshll.u32 %v10780_v53, 16 }
 0x251   : >> { %8400 = vmatmul.mubr.bf16.gmra.mrb[4].mxu0 %v7371_v19  ;;  %v4838_v55 = vrot.slane %v4837_v27, 4  ;;  %v3718_v36 = vrot.slane %v3716_v29, 4  ;;  %v4845_v19 = vshrl.u32 %v7359_v60, 16  ;;  %v4848_v42 = vshll.u32 %v7359_v60, 16  ;;  %v10810_v29 = vld [vmem:[%s10610_s12 + $0x50] sm:$0x1] }
 0x252   : >> { %8275 = vmatprep.mubr.bf16.mxu1 %v7258_v45  ;;  %v3709_v49 = vor.u32 %v3708_v12, %v3705_v37  ;;  %v4854_v21 = vshll.u32 %v10790_v62, 16  ;;  %11570 = vst [vmem:[#allocation15_spill] sm:$0xff] %v10810_v29  ;;  %v7362_v37 = vld [vmem:[%s10610_s12 + $0x54] sm:$0xf]  ;;  %v3746_v4 = vshll.u32 %v10810_v29, 16 }
 0x253   : >> { %8296 = vmatpush3.bf16.msra.mxu1 %v9027_v16  ;;  %8422 = vmatpush3.bf16.msra.mxu0 %v9026_v39  ;;  %v4833_v16 = vsel %vm9514_vm7, %v4828_v41, %v4832_v24  ;;  %v4843_v6 = vsel %vm9514_vm7, %v4838_v55, %v4842_v28  ;;  %v3719_v31 = vor.u32 %v3718_v36, %v3714_v3  ;;  %v3724_v39 = vrot.slane %v3722_v63, 5  ;;  %v10821_v63 = vld [vmem:[%s10610_s12 + $0x58] sm:$0xf] }
 0x254   : >> { %8297 = vmatprep.subr.bf16.mxu1 %v9029_v13  ;;  %8423 = vmatprep.subr.bf16.mxu0 %v9028_v25  ;;  %v7372_v32 = vcombine.low %v4833_v16, %v4843_v6  ;;  %v3710_v27 = vrot.slane %v3709_v49, 4  ;;  %v4847_v24 = vrot.slane %v4845_v19, 4  ;;  %v4850_v14 = vrot.slane %v4848_v42, 5  ;;  %v10823_v16 = vld [vmem:[#allocation3 + $0x180] sm:$0xff]  }
 0x255   : >> { %v3720_v60 = vrot.slane %v3719_v31, 4  ;;  %v4856_v45 = vrot.slane %v4854_v21, 5  ;;  %v4858_v41 = vshrl.u32 %v10790_v62, 16  ;;  %v4864_v28 = vshll.u32 %v10793_v2, 16 }
 0x256   : >> { %8403 = vmatprep.mubr.bf16.mxu0 %v7372_v32  ;;  %v4851_v12 = vor.u32 %v4850_v14, %v4847_v24  ;;  %v3727_v55 = vshrl.u32 %v10799_v7, 16  ;;  %v3730_v36 = vshll.u32 %v10799_v7, 16  ;;  %v3736_v42 = vshll.u32 %v10804_v20, 16  ;;  %v10829_v32 = vld [vmem:[%s10610_s12 + $0x5c] sm:$0x1] }
 0x257   : >> { %8298 = vmatpush3.bf16.msra.mxu1 %v9029_v13  ;;  %8424 = vmatpush3.bf16.msra.mxu0 %v9028_v25  ;;  %v3715_v13 = vsel %vm9514_vm7, %v3710_v27, %v3714_v3  ;;  %v3725_v49 = vsel %vm9514_vm7, %v3720_v60, %v3724_v39  ;;  %v4860_v19 = vrot.slane %v4858_v41, 4  ;;  %v4866_v25 = vrot.slane %v4864_v28, 5 }
 0x258   : >> { %8315 = vmatprep.subr.bf16.mxu1 %v10795_v5  ;;  %8425 = vmatprep.subr.bf16.mxu0 %v9030_v15  ;;  %v7259_v6 = vcombine.low %v3715_v13, %v3725_v49  ;;  %v4852_v3 = vrot.slane %v4851_v12, 4  ;;  %v3729_v31 = vrot.slane %v3727_v55, 4  ;;  %v3732_v21 = vrot.slane %v3730_v36, 5  ;;  %v10836_v13 = vld [vmem:[%s10610_s12 + $0x54] sm:$0xf] }
 0x259   : >> { %v4861_v27 = vor.u32 %v4860_v19, %v4856_v45  ;;  %v3738_v24 = vrot.slane %v3736_v42, 5  ;;  %v3740_v14 = vshrl.u32 %v10804_v20, 16  ;;  %v4869_v41 = vshrl.u32 %v7362_v37, 16  ;;  %11571 = vst [vmem:[#allocation16_spill] sm:$0xff] %v10836_v13  ;;  %v10841_v19 = vld [vmem:[%s10610_s12 + $0x58] sm:$0xf] }
 0x25a   : >> { %8276 = vmatmul.mubr.bf16.gmra.mrb[8].mxu1 %v7259_v6  ;;  %v4857_v39 = vsel %vm9514_vm7, %v4852_v3, %v4856_v45  ;;  %v3733_v60 = vor.u32 %v3732_v21, %v3729_v31  ;;  %v4872_v28 = vshll.u32 %v7362_v37, 16  ;;  %v3748_v36 = vrot.slane %v3746_v4, 5 }
 0x25b   : >> { %8426 = vmatpush3.bf16.msra.mxu0 %v9030_v15  ;;  %v4862_v12 = vrot.slane %v4861_v27, 4  ;;  %v3742_v55 = vrot.slane %v3740_v14, 4  ;;  %v4878_v49 = vshll.u32 %v10821_v63, 16  ;;  %v4871_v42 = vrot.slane %v4869_v41, 4  ;;  %v10848_v27 = vld [vmem:[%s10610_s12 + $0x5c] sm:$0x1] }
 0x25c   : >> { %8443 = vmatprep.subr.bf16.mxu0 %v10823_v16  ;;  %v3734_v15 = vrot.slane %v3733_v60, 4  ;;  %v4874_v6 = vrot.slane %v4872_v28, 5  ;;  %v4882_v45 = vshrl.u32 %v10821_v63, 16  ;;  %v4888_v21 = vshll.u32 %v10829_v32, 16  ;;  %11572 = vst [vmem:[#allocation17_spill] sm:$0xff] %v10848_v27 }
 0x25d   : >> { %v4867_v37 = vsel %vm9514_vm7, %v4862_v12, %v4866_v25  ;;  %v3743_v3 = vor.u32 %v3742_v55, %v3738_v24  ;;  %v4880_v31 = vrot.slane %v4878_v49, 5  ;;  %v7365_v41 = vld [vmem:[%s10610_s12 + $0x60] sm:$0xf]  ;;  %v3751_v11 = vshrl.u32 %v10836_v13, 16  ;;  %v10856_v12 = vld [vmem:[%s10610_s12 + $0x64] sm:$0xf] }
 0x25e   : >> { %v7373_v4 = vcombine.low %v4857_v39, %v4867_v37  ;;  %v3739_v14 = vsel %vm9514_vm7, %v3734_v15, %v3738_v24  ;;  %v4875_v50 = vor.u32 %v4874_v6, %v4871_v42  ;;  %v4884_v60 = vrot.slane %v4882_v45, 4  ;;  %v10864_v37 = vld [vmem:[%s10610_s12 + $0x68] sm:$0x1] }
 0x25f   : >> { %v3744_v28 = vrot.slane %v3743_v3, 4  ;;  %v4890_v35 = vrot.slane %v4888_v21, 5  ;;  %v3754_v25 = vshll.u32 %v10836_v13, 16  ;;  %v3760_v39 = vshll.u32 %v10841_v19, 16 }
 0x260   : >> { %8404 = vmatmul.mubr.bf16.gmra.mrb[8].mxu0 %v7373_v4  ;;  %v4876_v55 = vrot.slane %v4875_v50, 4  ;;  %v4885_v49 = vor.u32 %v4884_v60, %v4880_v31  ;;  %v3764_v24 = vshrl.u32 %v10841_v19, 16  ;;  %v3753_v42 = vrot.slane %v3751_v11, 4  ;;  %v7384_v60 = vld [vmem:[%s10610_s12 + $0xc] sm:$0xe] }
 0x261   : >> { %v3749_v15 = vsel %vm9514_vm7, %v3744_v28, %v3748_v36  ;;  %v3756_v6 = vrot.slane %v3754_v25, 5  ;;  %v3770_v45 = vshll.u32 %v10848_v27, 16  ;;  %v3762_v50 = vrot.slane %v3760_v39, 5 }
 0x262   : >> { %v7260_v3 = vcombine.low %v3739_v14, %v3749_v15  ;;  %v4881_v21 = vsel %vm9514_vm7, %v4876_v55, %v4880_v31  ;;  %v4886_v4 = vrot.slane %v4885_v49, 4  ;;  %v3766_v29 = vrot.slane %v3764_v24, 4 }
 0x263   : >> { %v3757_v33 = vor.u32 %v3756_v6, %v3753_v42  ;;  %v3772_v53 = vrot.slane %v3770_v45, 5  ;;  %v4893_v13 = vshrl.u32 %v7365_v41, 16  ;;  %v4896_v36 = vshll.u32 %v7365_v41, 16  ;;  %v7385_v6 = vld [vmem:[%s10610_s12 + $0x18] sm:$0xe] }
 0x264   : >> { %8279 = vmatprep.mubr.bf16.mxu1 %v7260_v3  ;;  %v4891_v11 = vsel %vm9514_vm7, %v4886_v4, %v4890_v35  ;;  %v4902_v28 = vshll.u32 %v10856_v12, 16  ;;  %v4906_v14 = vshrl.u32 %v10856_v12, 16  ;;  %v3767_v55 = vor.u32 %v3766_v29, %v3762_v50  ;;  %v7386_v45 = vld [vmem:[%s10610_s12 + $0x24] sm:$0xe] }
 0x265   : >> { %v7374_v25 = vcombine.low %v4881_v21, %v4891_v11  ;;  %v3758_v31 = vrot.slane %v3757_v33, 4  ;;  %v4895_v49 = vrot.slane %v4893_v13, 4  ;;  %v4898_v39 = vrot.slane %v4896_v36, 5 }
 0x266   : >> { %v4904_v15 = vrot.slane %v4902_v28, 5  ;;  %v4908_v24 = vrot.slane %v4906_v14, 4  ;;  %v4912_v42 = vshll.u32 %v10864_v37, 16  ;;  %v3768_v41 = vrot.slane %v3767_v55, 4 }
 0x267   : >> { %8407 = vmatprep.mubr.bf16.mxu0 %v7374_v25  ;;  %v3763_v35 = vsel %vm9514_vm7, %v3758_v31, %v3762_v50  ;;  %v7392_v3 = vrot.slane %v7384_v60, 9  ;;  %v5160_v4 = vrot.slane %v10625_v40, 5  ;;  %v4899_v27 = vor.u32 %v4898_v39, %v4895_v49 }
 0x268   : >> { %v4909_v21 = vor.u32 %v4908_v24, %v4904_v15  ;;  %v4914_v33 = vrot.slane %v4912_v42, 5  ;;  %v7271_v29 = vcombine.low %v10632_v30, %v10637_v9  ;;  %v11573_v13 = vrot.slane %v10650_v51, 5  ;;  %v9035_v51 = vld [vmem:[#allocation3 + $0x88] sm:$0xff]  }
 0x269   : >> { %v3773_v36 = vsel %vm9514_vm7, %v3768_v41, %v3772_v53  ;;  %v5161_v28 = vsel %vm9811_vm10, %v7392_v3, %v5160_v4  ;;  %v5162_v50 = vrot.slane %v5160_v4, 4  ;;  %v4900_v60 = vrot.slane %v4899_v27, 4  ;;  %v7387_v41 = vld [vmem:[%s10610_s12 + $0x30] sm:$0xe] }
 0x26a   : >> { %v5169_v11 = vrot.slane %v11573_v13, 4  ;;  %v7261_v14 = vcombine.low %v3763_v35, %v3773_v36  ;;  %v4910_v25 = vrot.slane %v4909_v21, 4  ;;  %v11574_v40 = vrot.slane %v10628_v18, 5 }
 0x26b   : >> { %v7393_v30 = vrot.slane %v7385_v6, 9  ;;  %v7394_v55 = vrot.slane %v7386_v45, 9  ;;  %v5174_v49 = vrot.slane %v10691_v59, 5  ;;  %v4905_v53 = vsel %vm9514_vm7, %v4900_v60, %v4904_v15  ;;  %v4162_v60 = vld [vmem:[%s10610_s12 + $0xc] sm:$0xe] }
 0x26c   : >> { %v5164_v31 = vsel %vm9811_vm10, %v5162_v50, %v11574_v40  ;;  %8280 = vmatmul.mubr.bf16.gmra.mrb[12].mxu1 %v7261_v14  ;;  %v4915_v39 = vsel %vm9514_vm7, %v4910_v25, %v4914_v33  ;;  %v11575_v18 = vcombine.low %v10613_v10, %v10616_v22  ;;  %v5177_v6 = vrot.slane %v10696_v54, 5  ;;  %v7388_v54 = vld [vmem:[%s10610_s12 + $0x3c] sm:$0xe]  ;;  %v7389_v50 = vld [vmem:[%s10610_s12 + $0x48] sm:$0xe] }
 0x26d   : >> { %v7400_v27 = vcombine.low %v5161_v28, %v5164_v31  ;;  %v7375_v24 = vcombine.low %v4905_v53, %v4915_v39  ;;  %v5176_v42 = vrot.slane %v5174_v49, 4  ;;  %v11576_v59 = vrot.slane %v10653_v34, 5  ;;  %v7390_v14 = vld [vmem:[%s10610_s12 + $0x54] sm:$0xe]  ;;  %v9040_v40 = vld [vmem:[#allocation3 + $0x190] sm:$0xff]  }
 0x26e   : >> { %8299 = vmatprep.mubr.bf16.mxu1 %v11575_v18  ;;  %v11577_v15 = vmov %v11573_v13  ;;  %v5181_v3 = vrot.slane %v10726_v61, 5  ;;  %v7272_v10 = vcombine.low %v10674_v17, %v10680_v52  ;;  %v5175_v22 = vsel %vm9811_vm10, %v7394_v55, %v5174_v49  ;;  %v9036_v61 = vld [vmem:[#allocation3 + $0x188] sm:$0xff]  }
 0x26f   : >> { %8408 = vmatmul.mubr.bf16.gmra.mrb[12].mxu0 %v7375_v24  ;;  %v5171_v45 = vsel %vm9811_vm10, %v5169_v11, %v11576_v59  ;;  %v5168_v35 = vsel %vm9811_vm10, %v7393_v30, %v11577_v15  ;;  %v5178_v34 = vsel %vm9811_vm10, %v5176_v42, %v5177_v6  ;;  %v5188_v4 = vrot.slane %v10755_v47, 5  ;;  %v9039_v11 = vld [vmem:[#allocation3 + $0x90] sm:$0xff]   ;;  %v10951_v24 = vld [vmem:[%s10610_s12 + $0x60] sm:$0xe]  ;;  %v9042_v42 = vld [vmem:[#allocation3 + $0x198] sm:$0xff]  }
 0x270   : >> { %8427 = vmatprep.mubr.bf16.mxu0 %v7400_v27  ;;  %v7401_v21 = vcombine.low %v5168_v35, %v5171_v45  ;;  %v7395_v33 = vrot.slane %v7387_v41, 9  ;;  %v7402_v13 = vcombine.low %v5175_v22, %v5178_v34  ;;  %v5183_v17 = vrot.slane %v5181_v3, 4  ;;  %v10934_v30 = vld [vmem:[%s10610_s12 + $0x8] sm:$0x1]  ;;  %v9045_v15 = vld [vmem:[#allocation3 + $0xa0] sm:$0xff]  }
 0x271   : >> { %v5184_v52 = vrot.slane %v10732_v43, 5  ;;  %v7396_v36 = vrot.slane %v7388_v54, 9  ;;  %v5190_v28 = vrot.slane %v5188_v4, 4  ;;  %v5191_v47 = vrot.slane %v10761_v38, 5  ;;  %v4161_v41 = vld [vmem:[%s10610_s12] sm:$0xe] }
 0x272   : >> { %v7287_v25 = vrot.slane %v4162_v60, 9  ;;  %v7273_v43 = vcombine.low %v10704_v1, %v10709_v26  ;;  %v5202_v31 = vrot.slane %v10821_v63, 5  ;;  %v11578_v49 = vrot.slane %v10637_v9, 5  ;;  %v9048_v60 = vld [vmem:[#allocation3 + $0x1a8] sm:$0xff]  }
 0x273   : >> { %v5185_v38 = vsel %vm9811_vm10, %v5183_v17, %v5184_v52  ;;  %v5189_v1 = vsel %vm9811_vm10, %v7396_v36, %v5188_v4  ;;  %v5192_v55 = vsel %vm9811_vm10, %v5190_v28, %v5191_v47  ;;  %v7274_v63 = vcombine.low %v10735_v46, %v10741_v56 }
 0x274   : >> { %8300 = vmatmul.mubr.bf16.vlgmr.msra.gmra.mrb[0].mxu1 %v7271_v29  ;;  %v5195_v29 = vrot.slane %v10790_v62, 5  ;;  %v4193_v62 = vrot.slane %v10934_v30, 5  ;;  %v10945_v53 = vsel %vm9811_vm10, %v7287_v25, %v11578_v49  ;;  %v7397_v39 = vrot.slane %v7389_v50, 9 }
 0x275   : >> { %8316 = vmatpush3.bf16.msra.mxu1 %v10795_v5  ;;  %8303 = vmatprep.mubr.bf16.mxu1 %v7272_v10  ;;  %v5182_v5 = vsel %vm9811_vm10, %v7395_v33, %v5181_v3  ;;  %v5198_v27 = vrot.slane %v10793_v2, 5  ;;  %v7295_v18 = vcombine.low %v10945_v53, %v10670_v23  ;;  %v7398_v59 = vrot.slane %v7390_v14, 9  ;;  %v9096_v2 = vld [vmem:[%s10610_s12 + $0x4] sm:$0xf] }
 0x276   : >> { %8317 = vmatprep.subr.bf16.mxu1 %v9035_v51  ;;  %v7403_v9 = vcombine.low %v5182_v5, %v5185_v38  ;;  %v5197_v6 = vrot.slane %v5195_v29, 4  ;;  %v7404_v45 = vcombine.low %v5189_v1, %v5192_v55  ;;  %v5204_v35 = vrot.slane %v5202_v31, 4  ;;  %v4164_v10 = vld [vmem:[%s10610_s12 + $0x24] sm:$0xe]  ;;  %v4165_v5 = vld [vmem:[%s10610_s12 + $0x30] sm:$0xe] }
 0x277   : >> { %8428 = vmatmul.mubr.bf16.vlgmr.msra.gmra.mrb[0].mxu0 %v7401_v21  ;;  %v5205_v46 = vrot.slane %v10829_v32, 5  ;;  %v4190_v3 = vrot.slane %v9096_v2, 5  ;;  %v4211_v22 = vrot.slane %v10709_v26, 5  ;;  %v7275_v34 = vcombine.low %v10767_v0, %v10771_v8  ;;  %v9047_v0 = vld [vmem:[#allocation3 + $0xa8] sm:$0xff]   ;;  %v9051_v38 = vld [vmem:[#allocation3 + $0xb0] sm:$0xff]   ;;  %v11581_v2 = vld [vmem:[#allocation15_spill] sm:$0xff] }
 0x278   : >> { %8444 = vmatpush3.bf16.msra.mxu0 %v10823_v16  ;;  %8431 = vmatprep.mubr.bf16.mxu0 %v7402_v13  ;;  %v9041_v16 = vld [vmem:[#allocation3 + $0x98] sm:$0xff]   ;;  %v7289_v54 = vrot.slane %v4164_v10, 9  ;;  %v4214_v4 = vrot.slane %v10713_v57, 5  ;;  %v5196_v32 = vsel %vm9811_vm10, %v7397_v39, %v5195_v29  ;;  %v5203_v21 = vsel %vm9811_vm10, %v7398_v59, %v5202_v31  ;;  %v11579_v29 = vld [vmem:[#allocation16_spill] sm:$0xff]  ;;  %v4166_v1 = vld [vmem:[%s10610_s12 + $0x3c] sm:$0xe] }
 0x279   : >> { %8445 = vmatprep.subr.bf16.mxu0 %v9036_v61  ;;  %8318 = vmatpush3.bf16.msra.mxu1 %v9035_v51  ;;  %v9046_v51 = vld [vmem:[#allocation3 + $0x1a0] sm:$0xff]   ;;  %v7399_v33 = vrot.slane %v10951_v24, 9  ;;  %v5199_v26 = vsel %vm9811_vm10, %v5197_v6, %v5198_v27  ;;  %v5209_v13 = vrot.slane %v10856_v12, 5  ;;  %v5206_v17 = vsel %vm9811_vm10, %v5204_v35, %v5205_v46  ;;  %v11580_v39 = vld [vmem:[#allocation14_spill] sm:$0xff]  ;;  %v9052_v6 = vld [vmem:[#allocation3 + $0x1b0] sm:$0xff]  }
 0x27a   : >> { %8319 = vmatprep.subr.bf16.mxu1 %v9039_v11  ;;  %v10973_v57 = vsel %vm9811_vm10, %v7289_v54, %v4211_v22  ;;  %v7286_v52 = vrot.slane %v4161_v41, 9  ;;  %v4221_v28 = vrot.slane %v10744_v48, 5  ;;  %v7276_v12 = vcombine.low %v10799_v7, %v10804_v20  ;;  %v9097_v55 = vld [vmem:[%s10610_s12 + $0x1c] sm:$0xf]  ;;  %v9053_v46 = vld [vmem:[#allocation3 + $0xb8] sm:$0xff]  }
 0x27b   : >> { %v4192_v47 = vrot.slane %v4190_v3, 4  ;;  %v7405_v14 = vcombine.low %v5196_v32, %v5199_v26  ;;  %v7277_v25 = vcombine.low %v11579_v29, %v10841_v19  ;;  %v4225_v48 = vrot.slane %v10771_v8, 5  ;;  %v9098_v10 = vld [vmem:[%s10610_s12 + $0x20] sm:$0x1] }
 0x27c   : >> { %8446 = vmatpush3.bf16.msra.mxu0 %v9036_v61  ;;  %8304 = vmatmul.mubr.bf16.gmra.mrb[4].mxu1 %v7273_v43  ;;  %v4213_v61 = vrot.slane %v4211_v22, 4  ;;  %v5212_v43 = vrot.slane %v10864_v37, 5  ;;  %v7406_v7 = vcombine.low %v5203_v21, %v5206_v17  ;;  %v7290_v31 = vrot.slane %v4165_v5, 9  ;;  %v9054_v21 = vld [vmem:[#allocation3 + $0x1b8] sm:$0xff]   ;;  %v9059_v5 = vld [vmem:[#allocation3 + $0xc8] sm:$0xff]  }
 0x27d   : >> { %8447 = vmatprep.subr.bf16.mxu0 %v9040_v40  ;;  %8320 = vmatpush3.bf16.msra.mxu1 %v9039_v11  ;;  %v4218_v11 = vrot.slane %v10741_v56, 5  ;;  %v4204_v49 = vrot.slane %v9097_v55, 5  ;;  %v7291_v37 = vrot.slane %v4166_v1, 9  ;;  %v4228_v8 = vrot.slane %v11580_v39, 5  ;;  %v11070_v39 = vld [vmem:[%s10610_s12 + $0x20] sm:$0x1] }
 0x27e   : >> { %8321 = vmatprep.subr.bf16.mxu1 %v9041_v16  ;;  %8307 = vmatprep.mubr.bf16.mxu1 %v7274_v63  ;;  %v10980_v36 = vsel %vm9811_vm10, %v4213_v61, %v4214_v4  ;;  %v4227_v63 = vrot.slane %v4225_v48, 4  ;;  %v4191_v27 = vsel %vm9811_vm10, %v7286_v52, %v4190_v3  ;;  %v4194_v24 = vsel %vm9811_vm10, %v4192_v47, %v4193_v62  ;;  %v4167_v4 = vld [vmem:[%s10610_s12 + $0x48] sm:$0xe] }
 0x27f   : >> { %8432 = vmatmul.mubr.bf16.gmra.mrb[4].mxu0 %v7403_v9  ;;  %v7297_v56 = vcombine.low %v10973_v57, %v10980_v36  ;;  %v4220_v50 = vrot.slane %v4218_v11, 4  ;;  %v4163_v9 = vld [vmem:[%s10610_s12 + $0x18] sm:$0xe]  ;;  %v4232_v62 = vrot.slane %v10804_v20, 5  ;;  %v4235_v3 = vrot.slane %v11581_v2, 5  ;;  %v11582_v52 = vld [vmem:[#allocation17_spill] sm:$0xff] }
 0x280   : >> { %8448 = vmatpush3.bf16.msra.mxu0 %v9040_v40  ;;  %8435 = vmatprep.mubr.bf16.mxu0 %v7404_v45  ;;  %v5211_v40 = vrot.slane %v5209_v13, 4  ;;  %v11014_v45 = vsel %vm9811_vm10, %v7291_v37, %v4225_v48  ;;  %v11018_v30 = vsel %vm9811_vm10, %v4227_v63, %v4228_v8  ;;  %v4207_v20 = vrot.slane %v9098_v10, 5  ;;  %v9060_v63 = vld [vmem:[#allocation3 + $0x1c8] sm:$0xff]   ;;  %v11081_v2 = vld [vmem:[%s10610_s12 + $0x2c] sm:$0x1]  ;;  %v9065_v10 = vld [vmem:[#allocation3 + $0xd8] sm:$0xff]  }
 0x281   : >> { %8449 = vmatprep.subr.bf16.mxu0 %v9042_v42  ;;  %8322 = vmatpush3.bf16.msra.mxu1 %v9041_v16  ;;  %v10994_v16 = vsel %vm9811_vm10, %v4220_v50, %v4221_v28  ;;  %v7299_v41 = vcombine.low %v11014_v45, %v11018_v30  ;;  %v4234_v22 = vrot.slane %v4232_v62, 4  ;;  %v4206_v54 = vrot.slane %v4204_v49, 4  ;;  %v7453_v8 = vld [vmem:[%s10610_s12 + $0x24] sm:$0xf]  ;;  %v9070_v36 = vld [vmem:[#allocation3 + $0x1e0] sm:$0xff]  }
 0x282   : >> { %8323 = vmatprep.subr.bf16.mxu1 %v9045_v15  ;;  %v5213_v35 = vsel %vm9811_vm10, %v5211_v40, %v5212_v43  ;;  %v4239_v32 = vrot.slane %v10841_v19, 5  ;;  %v7292_v61 = vrot.slane %v4167_v4, 9  ;;  %v4242_v28 = vrot.slane %v11582_v52, 5  ;;  %v9058_v43 = vld [vmem:[#allocation3 + $0x1c0] sm:$0xff]   ;;  %v9057_v40 = vld [vmem:[%s10610_s12 + $0x24] sm:$0xff]  }
 0x283   : >> { %v11033_v26 = vsel %vm9811_vm10, %v4234_v22, %v4235_v3  ;;  %v4208_v29 = vsel %vm9811_vm10, %v4206_v54, %v4207_v20  ;;  %v5719_v23 = vshrl.u32 %v7453_v8, 16  ;;  %v5722_v53 = vshll.u32 %v7453_v8, 16  ;;  %v9063_v3 = vld [vmem:[%s10610_s12 + $0x3c] sm:$0xff]  }
 0x284   : >> { %8450 = vmatpush3.bf16.msra.mxu0 %v9042_v42  ;;  %8308 = vmatmul.mubr.bf16.gmra.mrb[8].mxu1 %v7275_v34  ;;  %v11008_v42 = vsel %vm9811_vm10, %v7290_v31, %v4218_v11  ;;  %v7294_v34 = vcombine.low %v4191_v27, %v4194_v24  ;;  %v4241_v17 = vrot.slane %v4239_v32, 4  ;;  %v11040_v19 = vsel %vm9811_vm10, %v7292_v61, %v4232_v62  ;;  %v9061_v31 = vld [vmem:[%s10610_s12 + $0x30] sm:$0xff]   ;;  %v9062_v27 = vld [vmem:[#allocation3 + $0xd0] sm:$0xff]  }
 0x285   : >> { %8451 = vmatprep.subr.bf16.mxu0 %v9046_v51  ;;  %8324 = vmatpush3.bf16.msra.mxu1 %v9045_v15  ;;  %v7298_v59 = vcombine.low %v11008_v42, %v10994_v16  ;;  %v5210_v15 = vsel %vm9811_vm10, %v7399_v33, %v5209_v13  ;;  %v7288_v33 = vrot.slane %v4163_v9, 9  ;;  %v4168_v13 = vld [vmem:[%s10610_s12 + $0x54] sm:$0xe]  ;;  %v7300_v47 = vcombine.low %v11040_v19, %v11033_v26  ;;  %v7456_v61 = vld [vmem:[%s10610_s12 + $0x30] sm:$0xf]  ;;  %v9071_v16 = vld [vmem:[#allocation3 + $0xe8] sm:$0xff]  }
 0x286   : >> { %8325 = vmatprep.subr.bf16.mxu1 %v9047_v0  ;;  %8311 = vmatprep.mubr.bf16.mxu1 %v7276_v12  ;;  %v7293_v11 = vrot.slane %v4168_v13, 9  ;;  %v9056_v12 = vld [vmem:[#allocation3 + $0xc0] sm:$0xff]   ;;  %v5714_v22 = vshll.u32 %v11070_v39, 16  ;;  %v5724_v54 = vrot.slane %v5722_v53, 5  ;;  %v9066_v13 = vld [vmem:[#allocation3 + $0x1d8] sm:$0xff]  }
 0x287   : >> { %8436 = vmatmul.mubr.bf16.gmra.mrb[8].mxu0 %v7405_v14  ;;  %v11050_v14 = vsel %vm9811_vm10, %v4241_v17, %v4242_v28  ;;  %v5743_v28 = vshrl.u32 %v7456_v61, 16 }
 0x288   : >> { %8452 = vmatpush3.bf16.msra.mxu0 %v9046_v51  ;;  %8439 = vmatprep.mubr.bf16.mxu0 %v7406_v7  ;;  %v7407_v51 = vcombine.low %v5210_v15, %v5213_v35  ;;  %v11046_v50 = vsel %vm9811_vm10, %v7293_v11, %v4239_v32  ;;  %v7450_v7 = vld [vmem:[%s10610_s12 + $0x18] sm:$0xf]  ;;  %v11102_v57 = vrot.slane %v5714_v22, 5 }
 0x289   : >> { %8453 = vmatprep.subr.bf16.mxu0 %v9048_v60  ;;  %8326 = vmatpush3.bf16.msra.mxu1 %v9047_v0  ;;  %v9055_v0 = vld [vmem:[%s10610_s12 + $0x18] sm:$0xff]   ;;  %v5695_v1 = vshrl.u32 %v7450_v7, 16  ;;  %v5698_v55 = vshll.u32 %v7450_v7, 16 }
 0x28a   : >> { %8327 = vmatprep.subr.bf16.mxu1 %v9051_v38  ;;  %v9068_v11 = vld [vmem:[#allocation3 + $0xe0] sm:$0xff]  }
 0x28b   : >> { %v5697_v24 = vrot.slane %v5695_v1, 4  ;;  %v5700_v9 = vrot.slane %v5698_v55, 5  ;;  %v11115_v7 = vld [vmem:[%s10610_s12 + $0x38] sm:$0x1] }
 0x28c   : >> { %8454 = vmatpush3.bf16.msra.mxu0 %v9048_v60  ;;  %8312 = vmatmul.mubr.bf16.gmra.mrb[12].mxu1 %v7277_v25  ;;  %v4205_v60 = vsel %vm9811_vm10, %v7288_v33, %v4204_v49  ;;  %v7301_v25 = vcombine.low %v11046_v50, %v11050_v14  ;;  %v5738_v33 = vshll.u32 %v11081_v2, 16  ;;  %v5762_v19 = vshll.u32 %v11115_v7, 16 }
 0x28d   : >> { %8455 = vmatprep.subr.bf16.mxu0 %v9052_v6  ;;  %8328 = vmatpush3.bf16.msra.mxu1 %v9051_v38  ;;  %v7296_v48 = vcombine.low %v4205_v60, %v4208_v29  ;;  %v11060_v38 = vld [vmem:[%s10610_s12 + $0x1c] sm:$0xf]  ;;  %v5701_v20 = vor.u32 %v5700_v9, %v5697_v24  ;;  %v7462_v24 = vld [vmem:[%s10610_s12 + $0x48] sm:$0xf] }
 0x28e   : >> { %8329 = vmatprep.subr.bf16.mxu1 %v9053_v46  ;;  %8331 = vmatprep.mubr.bf16.mxu1 %v7294_v34  ;;  %v5704_v49 = vshll.u32 %v11060_v38, 16  ;;  %v5708_v37 = vshrl.u32 %v11060_v38, 16  ;;  %v5721_v34 = vrot.slane %v5719_v23, 4  ;;  %v5791_v45 = vshrl.u32 %v7462_v24, 16 }
 0x28f   : >> { %8440 = vmatmul.mubr.bf16.gmra.mrb[12].mxu0 %v7407_v51  ;;  %v9067_v51 = vld [vmem:[%s10610_s12 + $0x48] sm:$0xff]   ;;  %v11100_v17 = vrot.slane %v5701_v20, 4  ;;  %v5794_v30 = vshll.u32 %v7462_v24, 16  ;;  %v9082_v24 = vld [vmem:[#allocation3 + $0x208] sm:$0xff]  }
 0x290   : >> { %8456 = vmatpush3.bf16.msra.mxu0 %v9052_v6  ;;  %8459 = vmatprep.mubr.bf16.mxu0 %v9055_v0  ;;  %v11074_v6 = vld [vmem:[%s10610_s12 + $0x28] sm:$0xf]  ;;  %v11077_v62 = vrot.slane %v5704_v49, 5  ;;  %v5710_v15 = vrot.slane %v5708_v37, 4  ;;  %v11095_v0 = vld [vmem:[%s10610_s12 + $0x34] sm:$0xf] }
 0x291   : >> { %8457 = vmatprep.subr.bf16.mxu0 %v9054_v21  ;;  %8330 = vmatpush3.bf16.msra.mxu1 %v9053_v46  ;;  %v5732_v35 = vshrl.u32 %v11074_v6, 16  ;;  %v9064_v46 = vld [vmem:[#allocation3 + $0x1d0] sm:$0xff]   ;;  %v5752_v60 = vshll.u32 %v11095_v0, 16  ;;  %v5756_v29 = vshrl.u32 %v11095_v0, 16  ;;  %v5745_v49 = vrot.slane %v5743_v28, 4 }
 0x292   : >> { %8347 = vmatprep.subr.bf16.mxu1 %v9056_v12 }
 0x293   : >> { %v5734_v32 = vrot.slane %v5732_v35, 4  ;;  %v11124_v9 = vrot.slane %v5752_v60, 5  ;;  %v5758_v23 = vrot.slane %v5756_v29, 4  ;;  %v11174_v60 = vld [vmem:[#allocation3 + $0x200] sm:$0xff]  }
 0x294   : >> { %8458 = vmatpush3.bf16.msra.mxu0 %v9054_v21  ;;  %8332 = vmatmul.mubr.bf16.vlgmr.msra.gmra.mrb[0].mxu1 %v7295_v18  ;;  %v5728_v18 = vshll.u32 %v11074_v6, 16  ;;  %v5711_v21 = vor.u32 %v5710_v15, %v11077_v62  ;;  %v11129_v15 = vld [vmem:[%s10610_s12 + $0x4c] sm:$0xf] }
 0x295   : >> { %8475 = vmatprep.subr.bf16.mxu0 %v9058_v43  ;;  %8348 = vmatpush3.bf16.msra.mxu1 %v9056_v12  ;;  %v5746_v12 = vshll.u32 %v7456_v61, 16  ;;  %v5804_v35 = vshrl.u32 %v11129_v15, 16  ;;  %v5793_v61 = vrot.slane %v5791_v45, 4 }
 0x296   : >> { %8349 = vmatprep.subr.bf16.mxu1 %v9059_v5  ;;  %8335 = vmatprep.mubr.bf16.mxu1 %v7296_v48  ;;  %v11085_v4 = vrot.slane %v5728_v18, 5  ;;  %v11105_v42 = vrot.slane %v5711_v21, 4  ;;  %v9073_v48 = vld [vmem:[%s10610_s12 + $0x60] sm:$0xff]  }
 0x297   : >> { %8460 = vmatmul.mubr.bf16.vlgmr.msra.gmra.mrb[0].mxu0 %v9057_v40  ;;  %v11118_v40 = vld [vmem:[%s10610_s12 + $0x40] sm:$0xf]  ;;  %v5748_v37 = vrot.slane %v5746_v12, 5 }
 0x298   : >> { %8476 = vmatpush3.bf16.msra.mxu0 %v9058_v43  ;;  %8463 = vmatprep.mubr.bf16.mxu0 %v9061_v31  ;;  %v5735_v52 = vor.u32 %v5734_v32, %v11085_v4  ;;  %v9069_v43 = vld [vmem:[%s10610_s12 + $0x54] sm:$0xff]   ;;  %v9072_v31 = vld [vmem:[#allocation3 + $0x1e8] sm:$0xff]   ;;  %v5776_v53 = vshll.u32 %v11118_v40, 16  ;;  %v5780_v18 = vshrl.u32 %v11118_v40, 16  ;;  %v5717_v26 = vsel %vm9514_vm7, %v11105_v42, %v11102_v57  ;;  %v9075_v57 = vld [vmem:[%s10610_s12 + $0x6c] sm:$0xff]  }
 0x299   : >> { %8477 = vmatprep.subr.bf16.mxu0 %v9060_v63  ;;  %8350 = vmatpush3.bf16.msra.mxu1 %v9059_v5  ;;  %v7459_v5 = vld [vmem:[%s10610_s12 + $0x3c] sm:$0xf]  ;;  %v5749_v22 = vor.u32 %v5748_v37, %v5745_v49  ;;  %v11172_v42 = vld [vmem:[%s10610_s12 + $0x58] sm:$0xf] }
 0x29a   : >> { %8351 = vmatprep.subr.bf16.mxu1 %v9062_v27  ;;  %v5736_v55 = vrot.slane %v5735_v52, 4  ;;  %v5767_v8 = vshrl.u32 %v7459_v5, 16  ;;  %v11156_v21 = vrot.slane %v5776_v53, 5  ;;  %v5824_v49 = vshll.u32 %v11172_v42, 16 }
 0x29b   : >> { %v5750_v12 = vrot.slane %v5749_v22, 4  ;;  %v5828_v37 = vshrl.u32 %v11172_v42, 16 }
 0x29c   : >> { %8478 = vmatpush3.bf16.msra.mxu0 %v9060_v63  ;;  %8336 = vmatmul.mubr.bf16.gmra.mrb[4].mxu1 %v7297_v56  ;;  %v5725_v56 = vor.u32 %v5724_v54, %v5721_v34  ;;  %v9074_v63 = vld [vmem:[#allocation3 + $0xf0] sm:$0xff]   ;;  %v11150_v34 = vld [vmem:[%s10610_s12 + $0x44] sm:$0x1]  ;;  %v11198_v22 = vrot.slane %v5824_v49, 5 }
 0x29d   : >> { %8479 = vmatprep.subr.bf16.mxu0 %v9064_v46  ;;  %8352 = vmatpush3.bf16.msra.mxu1 %v9062_v27  ;;  %v5770_v27 = vshll.u32 %v7459_v5, 16 }
 0x29e   : >> { %8353 = vmatprep.subr.bf16.mxu1 %v9065_v10  ;;  %8339 = vmatprep.mubr.bf16.mxu1 %v7298_v59  ;;  %v11107_v59 = vrot.slane %v5738_v33, 5  ;;  %v5726_v1 = vrot.slane %v5725_v56, 4  ;;  %v5782_v33 = vrot.slane %v5780_v18, 4  ;;  %v7465_v56 = vld [vmem:[%s10610_s12 + $0x54] sm:$0xf] }
 0x29f   : >> { %8464 = vmatmul.mubr.bf16.gmra.mrb[4].mxu0 %v9063_v3  ;;  %v5707_v3 = vsel %vm9514_vm7, %v11100_v17, %v11077_v62  ;;  %v5769_v62 = vrot.slane %v5767_v8, 4  ;;  %v5772_v54 = vrot.slane %v5770_v27, 5  ;;  %v5806_v17 = vrot.slane %v5804_v35, 4 }
 0x2a0   : >> { %8480 = vmatpush3.bf16.msra.mxu0 %v9064_v46  ;;  %8467 = vmatprep.mubr.bf16.mxu0 %v9067_v51  ;;  %v9076_v46 = vld [vmem:[#allocation3 + $0x1f0] sm:$0xff]   ;;  %v5731_v20 = vsel %vm9514_vm7, %v5726_v1, %v11085_v4  ;;  %v5741_v32 = vsel %vm9514_vm7, %v5736_v55, %v11107_v59  ;;  %v5759_v51 = vor.u32 %v5758_v23, %v11124_v9  ;;  %v11159_v4 = vld [vmem:[%s10610_s12 + $0x50] sm:$0x1]  ;;  %v5818_v1 = vshll.u32 %v7465_v56, 16  ;;  %v7468_v55 = vld [vmem:[%s10610_s12 + $0x60] sm:$0xf] }
 0x2a1   : >> { %8481 = vmatprep.subr.bf16.mxu0 %v9066_v13  ;;  %8354 = vmatpush3.bf16.msra.mxu1 %v9065_v10  ;;  %v9079_v10 = vld [vmem:[%s10610_s12 + $0xc] sm:$0xff]   ;;  %v7474_v52 = vcombine.low %v5707_v3, %v5717_v26  ;;  %v11168_v28 = vcombine.low %v5731_v20, %v5741_v32  ;;  %v5783_v50 = vor.u32 %v5782_v33, %v11156_v21  ;;  %v5810_v14 = vshll.u32 %v11159_v4, 16 }
 0x2a2   : >> { %8355 = vmatprep.subr.bf16.mxu1 %v9068_v11  ;;  %v9078_v59 = vld [vmem:[#allocation3 + $0x1f8] sm:$0xff]   ;;  %v5760_v29 = vrot.slane %v5759_v51, 4  ;;  %v5839_v8 = vshrl.u32 %v7468_v55, 16  ;;  %v5842_v27 = vshll.u32 %v7468_v55, 16  ;;  %v5755_v23 = vsel %vm9514_vm7, %v5750_v12, %v11124_v9  ;;  %v11196_v9 = vld [vmem:[%s10610_s12 + $0x5c] sm:$0x1] }
 0x2a3   : >> { %v5812_v3 = vrot.slane %v5810_v14, 5  ;;  %v5820_v20 = vrot.slane %v5818_v1, 5  ;;  %v9087_v1 = vld [vmem:[%s10610_s12 + $0x3c] sm:$0xff]  }
 0x2a4   : >> { %8482 = vmatpush3.bf16.msra.mxu0 %v9066_v13  ;;  %8340 = vmatmul.mubr.bf16.gmra.mrb[8].mxu1 %v7299_v41  ;;  %v5800_v41 = vshll.u32 %v11129_v15, 16  ;;  %v5796_v13 = vrot.slane %v5794_v30, 5  ;;  %v9083_v30 = vld [vmem:[%s10610_s12 + $0x24] sm:$0xff]  }
 0x2a5   : >> { %8483 = vmatprep.subr.bf16.mxu0 %v9070_v36  ;;  %8356 = vmatpush3.bf16.msra.mxu1 %v9068_v11 }
 0x2a6   : >> { %8357 = vmatprep.subr.bf16.mxu1 %v9071_v16  ;;  %8343 = vmatprep.mubr.bf16.mxu1 %v7300_v47  ;;  %v9077_v47 = vld [vmem:[#allocation3 + $0xf8] sm:$0xff]   ;;  %v11161_v11 = vrot.slane %v5800_v41, 5  ;;  %v5797_v5 = vor.u32 %v5796_v13, %v5793_v61  ;;  %v7471_v61 = vld [vmem:[%s10610_s12 + $0x6c] sm:$0xf] }
 0x2a7   : >> { %8468 = vmatmul.mubr.bf16.gmra.mrb[8].mxu0 %v9069_v43  ;;  %v5773_v43 = vor.u32 %v5772_v54, %v5769_v62  ;;  %v5841_v62 = vrot.slane %v5839_v8, 4  ;;  %v5844_v54 = vrot.slane %v5842_v27, 5  ;;  %v11206_v13 = vld [vmem:[%s10610_s12 + $0x70] sm:$0xf] }
 0x2a8   : >> { %8484 = vmatpush3.bf16.msra.mxu0 %v9070_v36  ;;  %8471 = vmatprep.mubr.bf16.mxu0 %v9073_v48  ;;  %v5764_v36 = vrot.slane %v5762_v19, 5  ;;  %v5807_v48 = vor.u32 %v5806_v17, %v11161_v11  ;;  %v5798_v26 = vrot.slane %v5797_v5, 4  ;;  %v5872_v14 = vshll.u32 %v11206_v13, 16 }
 0x2a9   : >> { %8485 = vmatprep.subr.bf16.mxu0 %v9072_v31  ;;  %8358 = vmatpush3.bf16.msra.mxu1 %v9071_v16  ;;  %v5786_v16 = vshll.u32 %v11150_v34, 16  ;;  %v5774_v35 = vrot.slane %v5773_v43, 4  ;;  %v5863_v43 = vshrl.u32 %v7471_v61, 16 }
 0x2aa   : >> { %8359 = vmatprep.subr.bf16.mxu1 %v9074_v63  ;;  %v5765_v41 = vsel %vm9514_vm7, %v5760_v29, %v5764_v36  ;;  %v5808_v19 = vrot.slane %v5807_v48, 4  ;;  %v9085_v36 = vld [vmem:[#allocation3 + $0x210] sm:$0xff]   ;;  %v5803_v12 = vsel %vm9514_vm7, %v5798_v26, %v11161_v11  ;;  %v9084_v29 = vld [vmem:[%s10610_s12 + $0x30] sm:$0xff]   ;;  %v5845_v11 = vor.u32 %v5844_v54, %v5841_v62  ;;  %v9090_v54 = vld [vmem:[#allocation3 + $0x228] sm:$0xff]  }
 0x2ab   : >> { %v5788_v53 = vrot.slane %v5786_v16, 5  ;;  %v7476_v32 = vcombine.low %v5755_v23, %v5765_v41  ;;  %v5779_v17 = vsel %vm9514_vm7, %v5774_v35, %v11156_v21  ;;  %v5865_v8 = vrot.slane %v5863_v43, 4  ;;  %v11234_v41 = vld [vmem:[%s10610_s12 + $0x74] sm:$0x1]  ;;  %v9089_v35 = vld [vmem:[#allocation3 + $0x220] sm:$0xff]  }
 0x2ac   : >> { %8486 = vmatpush3.bf16.msra.mxu0 %v9072_v31  ;;  %8344 = vmatmul.mubr.bf16.gmra.mrb[12].mxu1 %v7301_v25  ;;  %v9080_v25 = vld [vmem:[%s10610_s12 + $0x18] sm:$0xff]   ;;  %v5815_v31 = vshrl.u32 %v7465_v56, 16  ;;  %v5834_v56 = vshll.u32 %v11196_v9, 16  ;;  %v5813_v16 = vsel %vm9514_vm7, %v5808_v19, %v5812_v3  ;;  %v11231_v23 = vrot.slane %v5872_v14, 5  ;;  %v9088_v3 = vld [vmem:[%s10610_s12 + $0x48] sm:$0xff]  }
 0x2ad   : >> { %8487 = vmatprep.subr.bf16.mxu0 %v9076_v46  ;;  %8360 = vmatpush3.bf16.msra.mxu1 %v9074_v63  ;;  %v11184_v63 = vld [vmem:[%s10610_s12 + $0x64] sm:$0xf]  ;;  %v6130_v62 = vrot.slane %v11060_v38, 5  ;;  %v7495_v43 = vld [vmem:[%s10610_s12 + $0x54] sm:$0xe] }
 0x2ae   : >> { %8361 = vmatprep.subr.bf16.mxu1 %v9077_v47  ;;  %8363 = vmatprep.mubr.bf16.mxu1 %v9079_v10  ;;  %v5848_v18 = vshll.u32 %v11184_v63, 16  ;;  %v5852_v45 = vshrl.u32 %v11184_v63, 16  ;;  %v5817_v10 = vrot.slane %v5815_v31, 4  ;;  %v9086_v31 = vld [vmem:[#allocation3 + $0x218] sm:$0xff]  }
 0x2af   : >> { %8472 = vmatmul.mubr.bf16.gmra.mrb[12].mxu0 %v9075_v57 }
 0x2b0   : >> { %8488 = vmatpush3.bf16.msra.mxu0 %v9076_v46  ;;  %8491 = vmatprep.mubr.bf16.mxu0 %v7474_v52  ;;  %v5784_v46 = vrot.slane %v5783_v50, 4  ;;  %v11200_v51 = vrot.slane %v5848_v18, 5  ;;  %v5854_v33 = vrot.slane %v5852_v45, 4  ;;  %v11215_v52 = vld [vmem:[%s10610_s12 + $0x68] sm:$0x1]  ;;  %v5866_v50 = vshll.u32 %v7471_v61, 16 }
 0x2b1   : >> { %8489 = vmatprep.subr.bf16.mxu0 %v9078_v59  ;;  %8362 = vmatpush3.bf16.msra.mxu1 %v9077_v47  ;;  %v5830_v47 = vrot.slane %v5828_v37, 4  ;;  %v5858_v5 = vshll.u32 %v11215_v52, 16  ;;  %v5836_v37 = vrot.slane %v5834_v56, 5  ;;  %v5846_v18 = vrot.slane %v5845_v11, 4  ;;  %v7496_v11 = vld [vmem:[%s10610_s12 + $0x60] sm:$0xe] }
 0x2b2   : >> { %8683 = vmatprep.subr.bf16.mxu1 %v11174_v60  ;;  %v5789_v57 = vsel %vm9514_vm7, %v5784_v46, %v5788_v53  ;;  %v5868_v27 = vrot.slane %v5866_v50, 5  ;;  %v6158_v46 = vrot.slane %v11129_v15, 5  ;;  %v6172_v50 = vrot.slane %v11184_v63, 5 }
 0x2b3   : >> { %v5831_v21 = vor.u32 %v5830_v47, %v11198_v22  ;;  %v7477_v48 = vcombine.low %v5779_v17, %v5789_v57  ;;  %v7494_v47 = vld [vmem:[%s10610_s12 + $0x48] sm:$0xe]  ;;  %v5851_v15 = vsel %vm9514_vm7, %v5846_v18, %v11200_v51 }
 0x2b4   : >> { %8490 = vmatpush3.bf16.msra.mxu0 %v9078_v59  ;;  %8364 = vmatmul.mubr.bf16.vlgmr.msra.gmra.mrb[0].mxu1 %v9080_v25  ;;  %v5821_v59 = vor.u32 %v5820_v20, %v5817_v10  ;;  %v5855_v25 = vor.u32 %v5854_v33, %v11200_v51  ;;  %v5869_v19 = vor.u32 %v5868_v27, %v5865_v8  ;;  %v5882_v20 = vshll.u32 %v11234_v41, 16  ;;  %v7490_v33 = vld [vmem:[%s10610_s12 + $0x18] sm:$0xe] }
 0x2b5   : >> { %8507 = vmatprep.subr.bf16.mxu0 %v11174_v60  ;;  %8691 = vmatpush3.bf16.msra.mxu1 %v11174_v60  ;;  %v5832_v49 = vrot.slane %v5831_v21, 4  ;;  %v7502_v17 = vrot.slane %v7494_v47, 9  ;;  %v6160_v57 = vrot.slane %v6158_v46, 4  ;;  %v7498_v38 = vrot.slane %v7490_v33, 9 }
 0x2b6   : >> { %8684 = vmatprep.subr.bf16.mxu1 %v9082_v24  ;;  %8367 = vmatprep.mubr.bf16.mxu1 %v9083_v30  ;;  %v5822_v55 = vrot.slane %v5821_v59, 4  ;;  %v5856_v45 = vrot.slane %v5855_v25, 4  ;;  %v5860_v30 = vrot.slane %v5858_v5, 5  ;;  %v6165_v59 = vrot.slane %v11172_v42, 5  ;;  %v9092_v25 = vld [vmem:[%s10610_s12 + $0x60] sm:$0xff]  }
 0x2b7   : >> { %8492 = vmatmul.mubr.bf16.vlgmr.msra.gmra.mrb[0].mxu0 %v11168_v28  ;;  %v5876_v28 = vshrl.u32 %v11206_v13, 16  ;;  %v5837_v26 = vsel %vm9514_vm7, %v5832_v49, %v5836_v37  ;;  %v6132_v21 = vrot.slane %v6130_v62, 4  ;;  %v6159_v14 = vsel %vm9811_vm10, %v7502_v17, %v6158_v46  ;;  %v9094_v49 = vld [vmem:[#allocation3 + $0x238] sm:$0xff]  }
 0x2b8   : >> { %8508 = vmatpush3.bf16.msra.mxu0 %v11174_v60  ;;  %8495 = vmatprep.mubr.bf16.mxu0 %v7476_v32  ;;  %v7478_v60 = vcombine.low %v5803_v12, %v5813_v16  ;;  %v9091_v32 = vld [vmem:[%s10610_s12 + $0x54] sm:$0xff]   ;;  %v5870_v12 = vrot.slane %v5869_v19, 4  ;;  %v5884_v16 = vrot.slane %v5882_v20, 5  ;;  %v7504_v8 = vrot.slane %v7496_v11, 9  ;;  %v7666_v11 = vld [vmem:[%s11327_s13 + $0x48] sm:$0xff]  }
 0x2b9   : >> { %8509 = vmatprep.subr.bf16.mxu0 %v9082_v24  ;;  %8692 = vmatpush3.bf16.msra.mxu1 %v9082_v24  ;;  %v5878_v53 = vrot.slane %v5876_v28, 4  ;;  %v6137_v28 = vrot.slane %v11074_v6, 5  ;;  %v6131_v6 = vsel %vm9811_vm10, %v7498_v38, %v6130_v62  ;;  %v6174_v27 = vrot.slane %v6172_v50, 4 }
 0x2ba   : >> { %8685 = vmatprep.subr.bf16.mxu1 %v9085_v36  ;;  %v5875_v63 = vsel %vm9514_vm7, %v5870_v12, %v11231_v23  ;;  %v6147_v46 = vrot.slane %v11115_v7, 5  ;;  %v7497_v7 = vld [vmem:[%s10610_s12 + $0x6c] sm:$0xe]  ;;  %v6154_v12 = vrot.slane %v11150_v34, 5 }
 0x2bb   : >> { %v5879_v10 = vor.u32 %v5878_v53, %v11231_v23  ;;  %v6175_v23 = vrot.slane %v11215_v52, 5  ;;  %v6139_v18 = vrot.slane %v6137_v28, 4 }
 0x2bc   : >> { %8510 = vmatpush3.bf16.msra.mxu0 %v9082_v24  ;;  %8368 = vmatmul.mubr.bf16.gmra.mrb[4].mxu1 %v9084_v29  ;;  %v5827_v24 = vsel %vm9514_vm7, %v5822_v55, %v11198_v22  ;;  %v5861_v22 = vsel %vm9514_vm7, %v5856_v45, %v5860_v30  ;;  %v6133_v29 = vrot.slane %v11070_v39, 5  ;;  %v6168_v39 = vrot.slane %v11196_v9, 5  ;;  %v7492_v55 = vld [vmem:[%s10610_s12 + $0x30] sm:$0xe] }
 0x2bd   : >> { %8511 = vmatprep.subr.bf16.mxu0 %v9085_v36  ;;  %8693 = vmatpush3.bf16.msra.mxu1 %v9085_v36  ;;  %v7479_v61 = vcombine.low %v5827_v24, %v5837_v26  ;;  %v7480_v56 = vcombine.low %v5851_v15, %v5861_v22  ;;  %v5880_v51 = vrot.slane %v5879_v10, 4  ;;  %v6140_v45 = vrot.slane %v11081_v2, 5 }
 0x2be   : >> { %8686 = vmatprep.subr.bf16.mxu1 %v9086_v31  ;;  %8371 = vmatprep.mubr.bf16.mxu1 %v9087_v1  ;;  %v6167_v1 = vrot.slane %v6165_v59, 4  ;;  %v6134_v9 = vsel %vm9811_vm10, %v6132_v21, %v6133_v29  ;;  %v6179_v26 = vrot.slane %v11206_v13, 5  ;;  %v6173_v2 = vsel %vm9811_vm10, %v7504_v8, %v6172_v50 }
 0x2bf   : >> { %8496 = vmatmul.mubr.bf16.gmra.mrb[4].mxu0 %v7477_v48  ;;  %v5885_v5 = vsel %vm9514_vm7, %v5880_v51, %v5884_v16  ;;  %v7491_v48 = vld [vmem:[%s10610_s12 + $0x24] sm:$0xe]  ;;  %v7506_v30 = vcombine.low %v6131_v6, %v6134_v9  ;;  %v6176_v19 = vsel %vm9811_vm10, %v6174_v27, %v6175_v23  ;;  %v6141_v20 = vsel %vm9811_vm10, %v6139_v18, %v6140_v45  ;;  %v7536_v9 = vld [vmem:[%s11327_s13 + $0x3c] sm:$0xff]  }
 0x2c0   : >> { %8512 = vmatpush3.bf16.msra.mxu0 %v9085_v36  ;;  %8499 = vmatprep.mubr.bf16.mxu0 %v7478_v60  ;;  %v6161_v36 = vrot.slane %v11159_v4, 5  ;;  %v9093_v4 = vld [vmem:[#allocation3 + $0x230] sm:$0xff]   ;;  %v7503_v60 = vrot.slane %v7495_v43, 9  ;;  %v7481_v53 = vcombine.low %v5875_v63, %v5885_v5  ;;  %v6151_v22 = vrot.slane %v11118_v40, 5 }
 0x2c1   : >> { %8513 = vmatprep.subr.bf16.mxu0 %v9086_v31  ;;  %8694 = vmatpush3.bf16.msra.mxu1 %v9086_v31  ;;  %v7512_v62 = vcombine.low %v6173_v2, %v6176_v19  ;;  %v6181_v33 = vrot.slane %v6179_v26, 4  ;;  %v7665_v19 = vld [vmem:[%s11327_s13 + $0x30] sm:$0xff]  }
 0x2c2   : >> { %8687 = vmatprep.subr.bf16.mxu1 %v9089_v35  ;;  %v6162_v42 = vsel %vm9811_vm10, %v6160_v57, %v6161_v36  ;;  %v6166_v52 = vsel %vm9811_vm10, %v7503_v60, %v6165_v59 }
 0x2c3   : >> { %v7510_v37 = vcombine.low %v6159_v14, %v6162_v42 }
 0x2c4   : >> { %8514 = vmatpush3.bf16.msra.mxu0 %v9086_v31  ;;  %8372 = vmatmul.mubr.bf16.gmra.mrb[8].mxu1 %v9088_v3  ;;  %v6144_v31 = vrot.slane %v11095_v0, 5  ;;  %v7499_v0 = vrot.slane %v7491_v48, 9  ;;  %v6169_v3 = vsel %vm9811_vm10, %v6167_v1, %v6168_v39  ;;  %v7524_v39 = vld [vmem:[%s11327_s13 + $0xc] sm:$0xff]   ;;  %v7618_v48 = vunpack.c.l.bf16 %v7666_v11 }
 0x2c5   : >> { %8515 = vmatprep.subr.bf16.mxu0 %v9089_v35  ;;  %8695 = vmatpush3.bf16.msra.mxu1 %v9089_v35  ;;  %v7511_v13 = vcombine.low %v6166_v52, %v6169_v3  ;;  %v7619_v1 = vunpack.c.h.bf16 %v7666_v11  ;;  %v6420_v6 = vunpack.c.l.bf16 %v7524_v39 }
 0x2c6   : >> { %8688 = vmatprep.subr.bf16.mxu1 %v9090_v54  ;;  %8375 = vmatprep.mubr.bf16.mxu1 %v9091_v32  ;;  %v6146_v24 = vrot.slane %v6144_v31, 4  ;;  %v6138_v10 = vsel %vm9811_vm10, %v7499_v0, %v6137_v28  ;;  %v7505_v32 = vrot.slane %v7497_v7, 9  ;;  %v7664_v28 = vld [vmem:[%s11327_s13 + $0x18] sm:$0xff]   ;;  %v6510_v45 = vrot.slane %v7618_v48, 1 }
 0x2c7   : >> { %8500 = vmatmul.mubr.bf16.gmra.mrb[8].mxu0 %v7479_v61  ;;  %v6182_v61 = vrot.slane %v11234_v41, 5  ;;  %v7507_v17 = vcombine.low %v6138_v10, %v6141_v20  ;;  %v7611_v63 = vunpack.c.h.bf16 %v7664_v28  ;;  %v6485_v2 = vrot.slane %v6420_v6, 1  ;;  %v7542_v6 = vld [vmem:[%s11327_s13 + $0x54] sm:$0xff]  }
 0x2c8   : >> { %8516 = vmatpush3.bf16.msra.mxu0 %v9089_v35  ;;  %8503 = vmatprep.mubr.bf16.mxu0 %v7480_v56  ;;  %v7500_v35 = vrot.slane %v7492_v55, 9  ;;  %v6148_v15 = vsel %vm9811_vm10, %v6146_v24, %v6147_v46  ;;  %v6153_v56 = vrot.slane %v6151_v22, 4  ;;  %v6180_v40 = vsel %vm9811_vm10, %v7505_v32, %v6179_v26  ;;  %v7526_v24 = vld [vmem:[%s11327_s13 + $0x14] sm:$0x1]  ;;  %v7538_v46 = vld [vmem:[%s11327_s13 + $0x44] sm:$0x1] }
 0x2c9   : >> { %8517 = vmatprep.subr.bf16.mxu0 %v9090_v54  ;;  %8696 = vmatpush3.bf16.msra.mxu1 %v9090_v54  ;;  %v6183_v51 = vsel %vm9811_vm10, %v6181_v33, %v6182_v61  ;;  %v6421_v55 = vunpack.c.h.bf16 %v7524_v39  ;;  %v11338_v23 = vrot.slane %v7611_v63, 1  ;;  %v6511_v26 = vrot.slane %v7619_v1, 1  ;;  %v7547_v39 = vld [vmem:[%s11327_s13 + $0x68] sm:$0x1] }
 0x2ca   : >> { %8689 = vmatprep.subr.bf16.mxu1 %v9093_v4  ;;  %v6145_v47 = vsel %vm9811_vm10, %v7500_v35, %v6144_v31  ;;  %v6155_v16 = vsel %vm9811_vm10, %v6153_v56, %v6154_v12  ;;  %v7513_v59 = vcombine.low %v6180_v40, %v6183_v51  ;;  %v6433_v35 = vunpack.c.h.bf16 %v7536_v9 }
 0x2cb   : >> { %v7508_v57 = vcombine.low %v6145_v47, %v6148_v15  ;;  %v6486_v20 = vrot.slane %v6421_v55, 1  ;;  %v7667_v15 = vld [vmem:[%s11327_s13 + $0x60] sm:$0xff]   ;;  %v7614_v61 = vunpack.c.l.bf16 %v7665_v19  ;;  %v11359_v12 = vsel %vm6484_vm15, %v6510_v45, %v6511_v26 }
 0x2cc   : >> { %8518 = vmatpush3.bf16.msra.mxu0 %v9090_v54  ;;  %8376 = vmatmul.mubr.bf16.gmra.mrb[12].mxu1 %v9092_v25  ;;  %v7493_v54 = vld [vmem:[%s10610_s12 + $0x3c] sm:$0xe]  ;;  %v7610_v25 = vunpack.c.l.bf16 %v7664_v28  ;;  %v7622_v40 = vunpack.c.l.bf16 %v7667_v15  ;;  %v7623_v51 = vunpack.c.h.bf16 %v7667_v15  ;;  %v6443_v45 = vunpack.c.l.bf16 %v7547_v39 }
 0x2cd   : >> { %8519 = vmatprep.subr.bf16.mxu0 %v9093_v4  ;;  %8697 = vmatpush3.bf16.msra.mxu1 %v9093_v4  ;;  %v7501_v36 = vrot.slane %v7493_v54, 9  ;;  %v6434_v54 = vunpack.c.l.bf16 %v7538_v46  ;;  %v6500_v55 = vrot.slane %v7614_v61, 1  ;;  %v6438_v46 = vunpack.c.l.bf16 %v7542_v6 }
 0x2ce   : >> { %8690 = vmatprep.subr.bf16.mxu1 %v9094_v49  ;;  %8531 = vmatprep.mubr.bf16.mxu1 %v7510_v37  ;;  %v6490_v27 = vrot.slane %v7610_v25, 1 }
 0x2cf   : >> { %8504 = vmatmul.mubr.bf16.gmra.mrb[12].mxu0 %v7481_v53  ;;  %v6152_v41 = vsel %vm9811_vm10, %v7501_v36, %v6151_v22  ;;  %v7541_v53 = vld [vmem:[%s11327_s13 + $0x50] sm:$0x1]  ;;  %v6508_v48 = vrot.slane %v6434_v54, 1 }
 0x2d0   : >> { %8520 = vmatpush3.bf16.msra.mxu0 %v9093_v4  ;;  %8523 = vmatprep.mubr.bf16.mxu0 %v7506_v30  ;;  %v7509_v38 = vcombine.low %v6152_v41, %v6155_v16  ;;  %v6432_v30 = vunpack.c.l.bf16 %v7536_v9  ;;  %v6437_v47 = vunpack.c.l.bf16 %v7541_v53  ;;  %v11356_v56 = vsel %vm6484_vm15, %v6490_v27, %v11338_v23  ;;  %v7535_v41 = vld [vmem:[%s11327_s13 + $0x38] sm:$0x1] }
 0x2d1   : >> { %8521 = vmatprep.subr.bf16.mxu0 %v9094_v49  ;;  %8698 = vmatpush3.bf16.msra.mxu1 %v9094_v49  ;;  %v6520_v53 = vrot.slane %v7622_v40, 1  ;;  %v6523_v40 = vrot.slane %v6443_v45, 1 }
 0x2d2   : >> { %v6505_v33 = vrot.slane %v6432_v30, 1  ;;  %v6513_v11 = vrot.slane %v6437_v47, 1  ;;  %v7532_v47 = vld [vmem:[%s11327_s13 + $0x2c] sm:$0x1] }
 0x2d4   : >> { %8522 = vmatpush3.bf16.msra.mxu0 %v9094_v49  ;;  %8532 = vmatmul.mubr.bf16.vlgmr.msra.gmra.mrb[16].mxu1 %v7511_v13  ;;  %v7529_v49 = vld [vmem:[%s11327_s13 + $0x20] sm:$0x1] }
 0x2d5   : >> { %8535 = vmatprep.mubr.bf16.mxu1 %v7512_v62  ;;  %v6425_v13 = vunpack.c.l.bf16 %v7529_v49  ;;  %v6422_v62 = vunpack.c.l.bf16 %v7526_v24 }
 0x2d7   : >> { %8524 = vmatmul.mubr.bf16.vlgmr.msra.gmra.mrb[0].mxu0 %v7507_v17  ;;  %v7615_v17 = vunpack.c.h.bf16 %v7665_v19  ;;  %v6493_v28 = vrot.slane %v6425_v13, 1 }
 0x2d8   : >> { %8527 = vmatprep.mubr.bf16.mxu0 %v7508_v57  ;;  %v7530_v57 = vld [vmem:[%s11327_s13 + $0x24] sm:$0xff]  }
 0x2d9   : >> { %v6427_v1 = vunpack.c.h.bf16 %v7530_v57  ;;  %v6501_v49 = vrot.slane %v7615_v17, 1  ;;  %v6494_v19 = vsel %vm6484_vm15, %v11338_v23, %v6493_v28  ;;  %v11583_v28 = vld [vmem:[#allocation11_spill] sm:$0xff] }
 0x2db   : >> { %v11378_v13 = vrot.slane %v6427_v1, 1 }
 0x2dc   : >> { %8536 = vmatmul.mubr.bf16.gmra.mrb[20].mxu1 %v7513_v59  ;;  %v11363_v59 = vsel %vm6484_vm15, %v6485_v2, %v6486_v20 }
 0x2df   : >> { %8528 = vmatmul.mubr.bf16.gmra.mrb[4].mxu0 %v7509_v38  ;;  %v6506_v38 = vrot.slane %v6433_v35, 1 }
 0x2e1   : >> { %v6507_v24 = vsel %vm6484_vm15, %v6505_v33, %v6506_v38  ;;  %v7544_v33 = vld [vmem:[%s11327_s13 + $0x5c] sm:$0x1] }
 0x387   : >> { %v11312_v34 = vpop.f32.mrb[0].mxu1 }
 0x388   : >> { %v11314_v21 = vpop.f32.mrb[1].mxu1 }
 0x389   : >> { %v11316_v29 = vpop.f32.mrb[2].mxu1 }
 0x38a   : >> { %v11318_v4 = vpop.f32.mrb[3].mxu1 }
 0x38f   : >> { %v11320_v43 = vpop.f32.mrb[4].mxu1 }
 0x390   : >> { %v11322_v50 = vpop.f32.mrb[5].mxu1 }
 0x391   : >> { %v11329_v14 = vpop.f32.mrb[6].mxu1 }
 0x392   : >> { %v11331_v42 = vpop.f32.mrb[7].mxu1 }
 0x397   : >> { %v8373_v5 = vpop.f32.mrb[8].mxu1 }
 0x398   : >> { %v4653_v31 = vpop.f32.mrb[9].mxu1 }
 0x399   : >> { %v8374_v60 = vpop.f32.mrb[10].mxu1 }
 0x39a   : >> { %v8501_v37 = vpop.f32.mrb[8].mxu0  ;;  %v4656_v8 = vpop.f32.mrb[11].mxu1 }
 0x39b   : >> { %v11341_v0 = vadd.f32 %v8501_v37, %v8373_v5  ;;  %v6049_v18 = vpop.f32.mrb[9].mxu0  ;;  %v6488_v5 = vrot.slane %v6422_v62, 1  ;;  %v6431_v37 = vunpack.c.l.bf16 %v7535_v41  ;;  %v6514_v62 = vsel %vm6484_vm15, %v6511_v26, %v6513_v11 }
 0x39c   : >> { %v11345_v3 = vadd.f32 %v6049_v18, %v4653_v31  ;;  %v8502_v52 = vpop.f32.mrb[10].mxu0  ;;  %v6426_v31 = vunpack.c.l.bf16 %v7530_v57  ;;  %v6521_v18 = vrot.slane %v7623_v51, 1  ;;  %v11393_v26 = vrot.slane %v6438_v46, 1 }
 0x39d   : >> { %v11348_v7 = vadd.f32 %v8502_v52, %v8374_v60  ;;  %v6052_v10 = vpop.f32.mrb[11].mxu0  ;;  %v6439_v52 = vunpack.c.h.bf16 %v7542_v6  ;;  %v6489_v54 = vsel %vm6484_vm15, %v6486_v20, %v6488_v5  ;;  %v6503_v61 = vrot.slane %v6431_v37, 1 }
 0x39e   : >> { %v11351_v22 = vadd.f32 %v6052_v10, %v4656_v8  ;;  %v6495_v10 = vrot.slane %v6426_v31, 1  ;;  %v11390_v23 = vsel %vm6484_vm15, %v6520_v53, %v6521_v18  ;;  %v6524_v37 = vsel %vm6484_vm15, %v6521_v18, %v6523_v40 }
 0x39f   : >> { %v8377_v32 = vpop.f32.mrb[12].mxu1  ;;  %v11395_v20 = vrot.slane %v6439_v52, 1  ;;  %v11407_v1 = vsel %vm6484_vm15, %v6501_v49, %v6503_v61 }
 0x3a0   : >> { %v4669_v36 = vpop.f32.mrb[13].mxu1 }
 0x3a1   : >> { %v8378_v16 = vpop.f32.mrb[14].mxu1 }
 0x3a2   : >> { %v8505_v25 = vpop.f32.mrb[12].mxu0  ;;  %v4672_v63 = vpop.f32.mrb[15].mxu1 }
 0x3a3   : >> { %v11367_v9 = vadd.f32 %v8505_v25, %v8377_v32  ;;  %v6065_v60 = vpop.f32.mrb[13].mxu0  ;;  %v6509_v32 = vsel %vm6484_vm15, %v6506_v38, %v6508_v48  ;;  %v11401_v25 = vsel %vm6484_vm15, %v6495_v10, %v11378_v13 }
 0x3a4   : >> { %v11369_v8 = vadd.f32 %v6065_v60, %v4669_v36  ;;  %v8506_v27 = vpop.f32.mrb[14].mxu0  ;;  %v11387_v36 = vsel %vm6484_vm15, %v6500_v55, %v6501_v49 }
 0x3a5   : >> { %v11371_v30 = vadd.f32 %v8506_v27, %v8378_v16  ;;  %v6068_v35 = vpop.f32.mrb[15].mxu0  ;;  %v6428_v16 = vunpack.c.l.bf16 %v7532_v47 }
 0x3a6   : >> { %v11374_v2 = vadd.f32 %v6068_v35, %v4672_v63  ;;  %v6440_v63 = vunpack.c.l.bf16 %v7544_v33 }
 0x3a7   : >> { %v8533_v15 = vpop.f32.mrb[16].mxu1  ;;  %v6498_v35 = vrot.slane %v6428_v16, 1 }
 0x3a8   : >> { %v8708_v17 = vadd.f32 %v11341_v0, %v8533_v15  ;;  %v6347_v57 = vpop.f32.mrb[17].mxu1  ;;  %v6518_v16 = vrot.slane %v6440_v63, 1 }
 0x3a9   : >> { %v8710_v51 = vadd.f32 %v11345_v3, %v6347_v57  ;;  %v8534_v41 = vpop.f32.mrb[18].mxu1 }
 0x3aa   : >> { %v8525_v38 = vpop.f32.mrb[0].mxu0  ;;  %v6454_v11 = vadd.f32 %v8708_v17, %v11583_v28  ;;  %v8712_v0 = vadd.f32 %v11348_v7, %v8534_v41  ;;  %v6350_v39 = vpop.f32.mrb[19].mxu1 }
 0x3ab   : >> { %v8699_v5 = vadd.f32 %v8525_v38, %v11312_v34  ;;  %v6315_v3 = vpop.f32.mrb[1].mxu0  ;;  %v6452_v48 = vadd.f32 %v8710_v51, %v11583_v28  ;;  %v8714_v31 = vadd.f32 %v11351_v22, %v6350_v39 }
 0x3ac   : >> { %v6551_v6 = vadd.f32 %v11359_v12, %v6454_v11  ;;  %v8700_v7 = vadd.f32 %v6315_v3, %v11314_v21  ;;  %v8526_v60 = vpop.f32.mrb[2].mxu0  ;;  %v6455_v55 = vadd.f32 %v8712_v0, %v11583_v28 }
 0x3ad   : >> { %v6446_v34 = vadd.f32 %v8699_v5, %v11583_v28  ;;  %v6549_v27 = vadd.f32 %v6507_v24, %v6452_v48  ;;  %v8701_v53 = vadd.f32 %v8526_v60, %v11316_v29  ;;  %v6318_v45 = vpop.f32.mrb[3].mxu0  ;;  %v6453_v22 = vadd.f32 %v8714_v31, %v11583_v28 }
 0x3ae   : >> { %v6444_v49 = vadd.f32 %v8700_v7, %v11583_v28  ;;  %v6552_v12 = vadd.f32 %v6514_v62, %v6455_v55  ;;  %v8702_v21 = vadd.f32 %v6318_v45, %v11318_v4  ;;  %v6567_v52 = vmax.f32 %v6551_v6, 0.0 }
 0x3af   : >> { %v6543_v46 = vadd.f32 %v11356_v56, %v6446_v34  ;;  %v6447_v18 = vadd.f32 %v8701_v53, %v11583_v28  ;;  %v6550_v10 = vadd.f32 %v6509_v32, %v6453_v22  ;;  %v8537_v24 = vpop.f32.mrb[20].mxu1  ;;  %v6565_v17 = vmax.f32 %v6549_v27, 0.0 }
 0x3b0   : >> { %v6541_v29 = vadd.f32 %v11363_v59, %v6444_v49  ;;  %v6568_v47 = vmax.f32 %v6552_v12, 0.0  ;;  %v6445_v15 = vadd.f32 %v8702_v21, %v11583_v28  ;;  %v8716_v61 = vadd.f32 %v11367_v9, %v8537_v24  ;;  %v6363_v33 = vpop.f32.mrb[21].mxu1 }
 0x3b1   : >> { %v6544_v62 = vadd.f32 %v6494_v19, %v6447_v18  ;;  %v6566_v4 = vmax.f32 %v6550_v10, 0.0  ;;  %v8718_v56 = vadd.f32 %v11369_v8, %v6363_v33  ;;  %v8538_v57 = vpop.f32.mrb[22].mxu1  ;;  %v6559_v9 = vmax.f32 %v6543_v46, 0.0 }
 0x3b2   : >> { %v7652_v32 = vpack.c.bf16 %v6568_v47, %v6567_v52  ;;  %v6542_v40 = vadd.f32 %v6489_v54, %v6445_v15  ;;  %v8529_v51 = vpop.f32.mrb[4].mxu0  ;;  %v6458_v59 = vadd.f32 %v8716_v61, %v11583_v28  ;;  %v6366_v41 = vpop.f32.mrb[23].mxu1  ;;  %v6557_v39 = vmax.f32 %v6541_v29, 0.0 }
 0x3b3   : >> { %v6560_v38 = vmax.f32 %v6544_v62, 0.0  ;;  %v7647_v11 = vpack.c.bf16 %v6566_v4, %v6565_v17  ;;  %v8703_v19 = vadd.f32 %v8529_v51, %v11320_v43  ;;  %v6331_v0 = vpop.f32.mrb[5].mxu0  ;;  %v8720_v54 = vadd.f32 %v11371_v30, %v8538_v57 }
 0x3b4   : >> { %7672 = vst [vmem:[%s11426_s25 + $0x28] sm:$0xff] %v7652_v32   ;;  %v6558_v5 = vmax.f32 %v6542_v40, 0.0  ;;  %v8704_v8 = vadd.f32 %v6331_v0, %v11322_v50  ;;  %v8530_v3 = vpop.f32.mrb[6].mxu0  ;;  %v6456_v31 = vadd.f32 %v8718_v56, %v11583_v28  ;;  %v6555_v60 = vadd.f32 %v11390_v23, %v6458_v59 }
 0x3b5   : >> { %v7632_v48 = vpack.c.bf16 %v6560_v38, %v6559_v9  ;;  %7671 = vst [vmem:[%s11426_s25 + $0x20] sm:$0xff] %v7647_v11   ;;  %v6450_v63 = vadd.f32 %v8703_v19, %v11583_v28  ;;  %v8705_v6 = vadd.f32 %v8530_v3, %v11329_v14  ;;  %v6334_v43 = vpop.f32.mrb[7].mxu0  ;;  %v6459_v50 = vadd.f32 %v8720_v54, %v11583_v28 }
 0x3b6   : >> { %v7627_v7 = vpack.c.bf16 %v6558_v5, %v6557_v39  ;;  %v6448_v55 = vadd.f32 %v8704_v8, %v11583_v28  ;;  %v6517_v34 = vsel %vm6484_vm15, %v11393_v26, %v11395_v20  ;;  %v8706_v53 = vadd.f32 %v6334_v43, %v11331_v42 }
 0x3b7   : >> { %7668 = vst [vmem:[%s11426_s25 + $0x8] sm:$0xff] %v7632_v48   ;;  %v6547_v30 = vadd.f32 %v11387_v36, %v6450_v63  ;;  %v6451_v27 = vadd.f32 %v8705_v6, %v11583_v28  ;;  %v6556_v14 = vadd.f32 %v6524_v37, %v6459_v50  ;;  %v6499_v23 = vsel %vm6484_vm15, %v11378_v13, %v6498_v35 }
 0x3b8   : >> { %7628 = vst [vmem:[%s11426_s25] sm:$0xff] %v7627_v7   ;;  %v8722_v45 = vadd.f32 %v11374_v2, %v6366_v41  ;;  %v6545_v22 = vadd.f32 %v11401_v25, %v6448_v55  ;;  %v6449_v36 = vadd.f32 %v8706_v53, %v11583_v28  ;;  %v6519_v26 = vsel %vm6484_vm15, %v11395_v20, %v6518_v16 }
 0x3b9   : >> { %v6548_v49 = vadd.f32 %v11407_v1, %v6451_v27  ;;  %v6571_v12 = vmax.f32 %v6555_v60, 0.0  ;;  %v6553_v42 = vadd.f32 %v6517_v34, %v6456_v31  ;;  %v6572_v21 = vmax.f32 %v6556_v14, 0.0 }
 0x3ba   : >> { %v6457_v37 = vadd.f32 %v8722_v45, %v11583_v28  ;;  %v6563_v13 = vmax.f32 %v6547_v30, 0.0  ;;  %v6546_v35 = vadd.f32 %v6499_v23, %v6449_v36  ;;  %v6561_v1 = vmax.f32 %v6545_v22, 0.0 }
 0x3bb   : >> { %v6564_v2 = vmax.f32 %v6548_v49, 0.0  ;;  %v7662_v25 = vpack.c.bf16 %v6572_v21, %v6571_v12  ;;  %v6569_v10 = vmax.f32 %v6553_v42, 0.0 }
 0x3bc   : >> { %v6554_v46 = vadd.f32 %v6519_v26, %v6457_v37  ;;  %v6562_v18 = vmax.f32 %v6546_v35, 0.0  ;;  %3533 = sbr.rel (!%p3531_p9) target bundleno = 537 (0x219), region = 132 }
 0x3bd   : >> { %v7642_v52 = vpack.c.bf16 %v6564_v2, %v6563_v13  ;;  %7674 = vst [vmem:[%s11426_s25 + $0x38] sm:$0xff] %v7662_v25  }
 0x3be   : >> { %v6570_v24 = vmax.f32 %v6554_v46, 0.0  ;;  %v7637_v20 = vpack.c.bf16 %v6562_v18, %v6561_v1 }
 0x3bf   : >> { %7670 = vst [vmem:[%s11426_s25 + $0x18] sm:$0xff] %v7642_v52  }
 0x3c0   : >> { %v7657_v29 = vpack.c.bf16 %v6570_v24, %v6569_v10  ;;  %7669 = vst [vmem:[%s11426_s25 + $0x10] sm:$0xff] %v7637_v20  }
 0x3c2   : >> { %7673 = vst [vmem:[%s11426_s25 + $0x30] sm:$0xff] %v7657_v29  }
 0x3c3   : > { %9140 = shalt.err (!%p9137_p11)
}
 0x3c4   : > { %s9141_s6 = scalar_lea.hbm %s11469_s10, 2048  ;;  %s9145_s12 = scalar_lea.hbm %s11523_s5, 4096 }
 0x3c5   : > { %p9142_p13 = scmp.ne.s32.totalorder %s11469_s10, %s9141_s6  ;;  %p9146_p5 = scmp.lt.u32.totalorder %s11469_s10, %s11523_s5 }
 0x3c6   : > { %p9147_p6 = scmp.lt.u32.totalorder %s9145_s12, %s9141_s6  ;;  %p9149_p10 = scmp.lt.u32.totalorder %s9141_s6, %s11469_s10 }
 0x3c7   : > { %p9143_p1 = pnand %p9142_p13, %p11584_p12 }
 0x3c8   : > { %p9148_p9 = por %p9147_p6, %p9146_p5 }
 0x3c9   : > { %p9144_p0 = pneg %p9143_p1 }
 0x3ca   : > { %p9150_p2 = por %p9149_p10, %p9148_p9 }
 0x3cc   : > { %p9151_p3 = pnand %p9150_p2, %p9144_p0 }
 0x3ce   : > { %9154 = shalt.err (!%p9151_p3)
}
 0x3cf   : > { %s9216_s25 = smov 64   ;;  %s9217_s26 = smov 4  }
 0x3d0   : > { %8832 = dma.vmem_to_hbm [thread:$0]  (%p11584_p12), %s11473_s11, 2048, %s11469_s10, %s11477_s14, %s9216_s25, %s9216_s25, %s9217_s26  }
 0x3d1 PF: > { %p8844_p4 = scmp.ge.s32.totalorder %s9201_s21, 2  ;;  %s6685_s30 = sand.u32 1, %s9189_s18  }
 0x3d2   : > { %p11585_p7 = scmp.ne.s32.totalorder %s11539_s29, 0  ;;  %s6686_s7 = scalar_lea.sflag [#allocation5], %s6685_s30 }
 0x3d4   : > { %p8839_p8 = pnand %p8844_p4, %p11585_p7 }
 0x3d6   : > { %9184 = dma.done.wait (!%p8839_p8), %s6686_s7, 2048  }
 0x3d7   : > { %9186 = vsyncadd (!%p8839_p8), %s6686_s7, 4294965248  ;;  %p16_p11 = scmp.ge.s32.totalorder %s9273_s24, 4   ;;  %s11586_s18 = smov %s9193_s19 }
 0x3d8   : > { %s11587_s19 = smov %s9197_s20  ;;  %s11588_s20 = smov %s9284_s27 }
 0x3d9   : > { %s11589_s21 = smov %s9273_s24  ;;  %18 = sbr.rel (!%p16_p11) target bundleno = 4 (0x4), region = 143 }
 0x3e0   :  { %6691 = vsyncpa [#allocation4], 1 }
 0x3e1   :  { %6693 = vsyncpa [#allocation4 + $0x1], 1 }
 0x3e2   :  { %6694 = vsyncpa [#allocation5], 1 }
 0x3e3   :  { %6696 = vsyncpa [#allocation5 + $0x1], 1 }

</bundles_post_ra>
